<compile_context>
chip_gen: v7x
topology: tpu7x:2x2x1
jax: 0.10.0
libtpu: 0.0.40
codegen_flags: <defaults>
</compile_context>

<pallas_src>
import functools

import jax
import jax.numpy as jnp
from jax import lax
from jax.experimental import pallas as pl
from jax.experimental.pallas import tpu as pltpu


def _default_vmem_limit():
    """Generation-aware scoped-VMEM limit: ~3/4 of physical, capped at 96 MiB."""
    try:
        cap = int(pltpu.get_tpu_info().vmem_capacity_bytes)
        return min((cap * 3) // 4, 96 * 1024 * 1024)
    except Exception:
        return 32 * 1024 * 1024


_VMEM_LIMIT = _default_vmem_limit()
_LN_EPS = 1e-5


# ------------------------ in-kernel building blocks ------------------------

def _layer_norm(x, g, b):
    mu = jnp.mean(x, axis=-1, keepdims=True)
    c = x - mu
    var = jnp.mean(c * c, axis=-1, keepdims=True)
    return c * lax.rsqrt(var + _LN_EPS) * g + b


def _mha(x_q, x_k, x_v, pad_row, wq, wk, wv, wo, bo, *, heads, inv_scale, causal):
    """Multi-head attention matching the reference SelfAttention quirks.

    x_q receives the `queries` dxd projection, x_k the `keys` projection and
    x_v the `values` projection (the caller handles the reference's
    (values, queries, keys) argument-order shuffle).  The shared dxd weights
    are applied per head (no block-diagonal expansion), masking happens BEFORE
    the 1/sqrt(embed_size) scaling, and the per-head outputs are accumulated
    directly against the matching rows of Wo (no concat + relayout).
    MXU operands are bf16; softmax and the accumulator stay in f32.
    """
    Lq, E = x_q.shape
    Lk = x_k.shape[0]
    d = E // heads

    xq_b = x_q.astype(jnp.bfloat16)
    xk_b = x_k.astype(jnp.bfloat16)
    xv_b = x_v.astype(jnp.bfloat16)

    if pad_row is not None:
        pad_masked = pad_row == 0.0                       # (1, Lk), hoisted out of the loop
    if causal:
        row = lax.broadcasted_iota(jnp.int32, (Lq, Lk), 0)
        col = lax.broadcasted_iota(jnp.int32, (Lq, Lk), 1)
        future = col > row                                # strictly-upper = masked

    out = jnp.zeros((Lq, E), jnp.float32)
    for h in range(heads):                                # static unroll, small head count
        sl = slice(h * d, (h + 1) * d)
        q_h = jnp.dot(xq_b[:, sl], wq, preferred_element_type=jnp.float32)  # (Lq, d)
        k_h = jnp.dot(xk_b[:, sl], wk, preferred_element_type=jnp.float32)  # (Lk, d)
        v_h = jnp.dot(xv_b[:, sl], wv, preferred_element_type=jnp.float32)  # (Lv, d)
        # (Lq, d) x (Lk, d) contracting d -> (Lq, Lk), no transpose.
        energy = lax.dot_general(q_h.astype(jnp.bfloat16), k_h.astype(jnp.bfloat16),
                                 (((1,), (1,)), ((), ())),
                                 preferred_element_type=jnp.float32)
        # masked_fill BEFORE the sqrt(embed_size) scaling, exactly like the reference.
        if pad_row is not None:
            energy = jnp.where(pad_masked, -1e20, energy)
        if causal:
            energy = jnp.where(future, -1e20, energy)
        energy = energy * inv_scale
        e = jnp.exp(energy - jnp.max(energy, axis=-1, keepdims=True))
        attn = e / jnp.sum(e, axis=-1, keepdims=True)     # exact divide for parity
        o_h = jnp.dot(attn.astype(jnp.bfloat16), v_h.astype(jnp.bfloat16),
                      preferred_element_type=jnp.float32)                  # (Lq, d)
        out = out + jnp.dot(o_h.astype(jnp.bfloat16), wo[sl, :],
                            preferred_element_type=jnp.float32)            # (Lq, E)
    return out + bo                                       # fc_out bias


def _ffn(x, w1, b1, w2, b2):
    h = jnp.dot(x.astype(jnp.bfloat16), w1, preferred_element_type=jnp.float32) + b1
    h = jnp.maximum(h, 0.0)
    return jnp.dot(h.astype(jnp.bfloat16), w2, preferred_element_type=jnp.float32) + b2


# ----------------------------- Pallas kernels ------------------------------

def _encoder_block_kernel(x_ref, m_ref,
                          wq_ref, wk_ref, wv_ref, wo_ref, bo_ref, n1g_ref, n1b_ref,
                          w1_ref, b1_ref, w2_ref, b2_ref, n2g_ref, n2b_ref,
                          o_ref, *, heads, inv_scale):
    """Whole encoder TransformerBlock for one batch element, fully fused."""
    x = x_ref[...]                                        # (L, E): value == key == query
    x_b = x.astype(jnp.bfloat16)
    attn = _mha(x_b, x_b, x_b, m_ref[...],
                wq_ref[...], wk_ref[...], wv_ref[...], wo_ref[...], bo_ref[...],
                heads=heads, inv_scale=inv_scale, causal=False)
    h = _layer_norm(attn + x, n1g_ref[...], n1b_ref[...])          # norm1(attn + query)
    ff = _ffn(h, w1_ref[...], b1_ref[...], w2_ref[...], b2_ref[...])
    o_ref[...] = _layer_norm(ff + h, n2g_ref[...], n2b_ref[...]).astype(o_ref.dtype)


def _decoder_block_kernel(x_ref, enc_ref, m_ref,
                          swq_ref, swk_ref, swv_ref, swo_ref, sbo_ref, sng_ref, snb_ref,
                          cwq_ref, cwk_ref, cwv_ref, cwo_ref, cbo_ref, n1g_ref, n1b_ref,
                          w1_ref, b1_ref, w2_ref, b2_ref, n2g_ref, n2b_ref,
                          o_ref, *, heads, inv_scale):
    """Whole DecoderBlock for one batch element, fully fused:
    causal self-attention + norm, cross-attention + norm1, FFN + norm2."""
    x = x_ref[...]                                        # (L, E) decoder stream
    enc = enc_ref[...]                                    # (L, E) encoder output
    pad = m_ref[...]                                      # (1, L) source pad-mask row

    x_b = x.astype(jnp.bfloat16)
    sa = _mha(x_b, x_b, x_b, None,
              swq_ref[...], swk_ref[...], swv_ref[...], swo_ref[...], sbo_ref[...],
              heads=heads, inv_scale=inv_scale, causal=True)
    query = _layer_norm(sa + x, sng_ref[...], snb_ref[...])

    # Cross attention (reference call: attention(values=enc, queries=enc, keys=query)):
    # Q projection from enc, K projection from the decoder query, V from enc,
    # residual is the decoder query.
    enc_b = enc.astype(jnp.bfloat16)
    ca = _mha(enc_b, query.astype(jnp.bfloat16), enc_b, pad,
              cwq_ref[...], cwk_ref[...], cwv_ref[...], cwo_ref[...], cbo_ref[...],
              heads=heads, inv_scale=inv_scale, causal=False)
    h = _layer_norm(ca + query, n1g_ref[...], n1b_ref[...])
    ff = _ffn(h, w1_ref[...], b1_ref[...], w2_ref[...], b2_ref[...])
    o_ref[...] = _layer_norm(ff + h, n2g_ref[...], n2b_ref[...]).astype(o_ref.dtype)


def _linear_kernel(x_ref, w_ref, b_ref, o_ref):
    o_ref[...] = (jnp.dot(x_ref[...].astype(jnp.bfloat16), w_ref[...],
                          preferred_element_type=jnp.float32)
                  + b_ref[...]).astype(o_ref.dtype)


# --------------------------- pallas_call wrappers ---------------------------

def _fixed(shape):
    """Weight/bias block: whole array, same block every grid step."""
    return pl.BlockSpec(shape, lambda *_: (0,) * len(shape))


def _per_batch(rest):
    """(N, *rest) array, one batch element per grid step (leading dim squeezed)."""
    return pl.BlockSpec((None,) + tuple(rest), lambda n: (n, 0, 0))


def _bf16(x):
    return x.astype(jnp.bfloat16)


def _row(x):
    return x.reshape(1, -1)


def _row_tile(m):
    for t in (512, 256, 128, 64, 32, 16, 8):
        if m % t == 0:
            return t
    return m


def encoder_block_forward(p, x, pad_mask, *, heads):
    """Reference TransformerBlock.forward(out, out, out, mask), fully fused."""
    N, L, E = x.shape
    d = E // heads
    a = p["attn"]
    hid = p["ff_W1"].shape[1]
    kernel = functools.partial(_encoder_block_kernel, heads=heads,
                               inv_scale=1.0 / (float(E) ** 0.5))
    # TODO(synk): at production E/hid/L, tile the FFN contraction axis and the
    # attention Lk axis (flash-style), and give the constant-index weight specs
    # pipeline_mode=pl.Buffered(1) so full-size weights fit v7x's 64 MiB VMEM.
    return pl.pallas_call(
        kernel,
        out_shape=jax.ShapeDtypeStruct((N, L, E), jnp.float32),
        grid=(N,),
        in_specs=[
            _per_batch((L, E)),                                   # x
            _per_batch((1, L)),                                   # pad-mask row
            _fixed((d, d)), _fixed((d, d)), _fixed((d, d)),       # Wq, Wk, Wv (shared/head)
            _fixed((E, E)),                                       # Wo
            _fixed((1, E)), _fixed((1, E)), _fixed((1, E)),       # bo, norm1 gamma/beta
            _fixed((E, hid)), _fixed((1, hid)),                   # ff W1, b1
            _fixed((hid, E)), _fixed((1, E)),                     # ff W2, b2
            _fixed((1, E)), _fixed((1, E)),                       # norm2 gamma/beta
        ],
        out_specs=_per_batch((L, E)),
        compiler_params=pltpu.CompilerParams(
            dimension_semantics=("parallel",),
            vmem_limit_bytes=_VMEM_LIMIT),
    )(x, pad_mask,
      _bf16(a["Wq"]), _bf16(a["Wk"]), _bf16(a["Wv"]), _bf16(a["Wo"]),
      _row(a["bo"]), _row(p["norm1_g"]), _row(p["norm1_b"]),
      _bf16(p["ff_W1"]), _row(p["ff_b1"]),
      _bf16(p["ff_W2"]), _row(p["ff_b2"]),
      _row(p["norm2_g"]), _row(p["norm2_b"]))


def decoder_block_forward(p, x, enc_out, src_pad_mask, *, heads):
    """Reference DecoderBlock.forward, fully fused into one kernel."""
    N, L, E = x.shape
    assert enc_out.shape == (N, L, E)   # reference broadcasting requires equal lengths
    d = E // heads
    sa, blk = p["attn"], p["block"]
    ca = blk["attn"]
    hid = blk["ff_W1"].shape[1]
    kernel = functools.partial(_decoder_block_kernel, heads=heads,
                               inv_scale=1.0 / (float(E) ** 0.5))
    return pl.pallas_call(
        kernel,
        out_shape=jax.ShapeDtypeStruct((N, L, E), jnp.float32),
        grid=(N,),
        in_specs=[
            _per_batch((L, E)),                                   # x (decoder stream)
            _per_batch((L, E)),                                   # enc_out
            _per_batch((1, L)),                                   # source pad-mask row
            _fixed((d, d)), _fixed((d, d)), _fixed((d, d)), _fixed((E, E)),  # self-attn W
            _fixed((1, E)), _fixed((1, E)), _fixed((1, E)),       # s_bo, norm gamma/beta
            _fixed((d, d)), _fixed((d, d)), _fixed((d, d)), _fixed((E, E)),  # cross-attn W
            _fixed((1, E)), _fixed((1, E)), _fixed((1, E)),       # c_bo, norm1 gamma/beta
            _fixed((E, hid)), _fixed((1, hid)),                   # ff W1, b1
            _fixed((hid, E)), _fixed((1, E)),                     # ff W2, b2
            _fixed((1, E)), _fixed((1, E)),                       # norm2 gamma/beta
        ],
        out_specs=_per_batch((L, E)),
        compiler_params=pltpu.CompilerParams(
            dimension_semantics=("parallel",),
            vmem_limit_bytes=_VMEM_LIMIT),
    )(x, enc_out, src_pad_mask,
      _bf16(sa["Wq"]), _bf16(sa["Wk"]), _bf16(sa["Wv"]), _bf16(sa["Wo"]),
      _row(sa["bo"]), _row(p["norm_g"]), _row(p["norm_b"]),
      _bf16(ca["Wq"]), _bf16(ca["Wk"]), _bf16(ca["Wv"]), _bf16(ca["Wo"]),
      _row(ca["bo"]), _row(blk["norm1_g"]), _row(blk["norm1_b"]),
      _bf16(blk["ff_W1"]), _row(blk["ff_b1"]),
      _bf16(blk["ff_W2"]), _row(blk["ff_b2"]),
      _row(blk["norm2_g"]), _row(blk["norm2_b"]))


def linear_proj(x2d, w, b):
    """(M, K) @ (K, Dout) + b, lane-dense: Dout is padded to a multiple of 128 in
    the kernel (unmasked vector stores) and the pad columns are sliced off outside."""
    M, K = x2d.shape
    Dout = w.shape[1]
    Dp = ((Dout + 127) // 128) * 128
    if Dp != Dout:
        w = jnp.pad(w, ((0, 0), (0, Dp - Dout)))
        b = jnp.pad(b, ((0, Dp - Dout),))
    tm = _row_tile(M)
    tn = next(t for t in (512, 256, 128) if Dp % t == 0)
    # TODO(synk): at production E, also tile the K axis with a VMEM accumulator.
    out = pl.pallas_call(
        _linear_kernel,
        out_shape=jax.ShapeDtypeStruct((M, Dp), jnp.float32),
        grid=(M // tm, Dp // tn),
        in_specs=[
            pl.BlockSpec((tm, K), lambda i, j: (i, 0)),
            pl.BlockSpec((K, tn), lambda i, j: (0, j)),
            pl.BlockSpec((1, tn), lambda i, j: (0, j)),
        ],
        out_specs=pl.BlockSpec((tm, tn), lambda i, j: (i, j)),
        compiler_params=pltpu.CompilerParams(
            dimension_semantics=("parallel", "parallel"),
            vmem_limit_bytes=_VMEM_LIMIT),
    )(x2d, w.astype(jnp.bfloat16), b.reshape(1, Dp))
    return out[:, :Dout] if Dp != Dout else out


# ------------------------- Model forward (JAX glue) -------------------------

def encoder_forward(p, tokens, pad_mask, heads):
    S = tokens.shape[1]
    # Embedding gathers (token-id lookups) stay in plain JAX.
    out = p["word_emb"][tokens] + p["pos_emb"][jnp.arange(S)[None, :]]
    for lp in p["layers"]:
        out = encoder_block_forward(lp, out, pad_mask, heads=heads)
    return out


def decoder_forward(p, tokens, enc_out, src_pad_mask, heads):
    N, S = tokens.shape
    x = p["word_emb"][tokens] + p["pos_emb"][jnp.arange(S)[None, :]]
    for lp in p["layers"]:
        x = decoder_block_forward(lp, x, enc_out, src_pad_mask, heads=heads)
    E = x.shape[-1]
    out = linear_proj(x.reshape(-1, E), p["fc_W"], p["fc_b"])
    return out.reshape(N, S, -1)


def transformer_forward(params, source, target, *, src_pad_idx, trg_pad_idx, heads):
    del trg_pad_idx  # unused by the reference masks as well
    N, S_src = source.shape
    assert target.shape == (N, S_src)  # reference broadcasting requires equal lengths
    # (N, 1, S_src) padding-mask row; broadcast over heads/queries in-kernel.
    src_pad_mask = (source != src_pad_idx).astype(jnp.float32).reshape(N, 1, S_src)
    enc = encoder_forward(params["encoder"], source, src_pad_mask, heads)
    return decoder_forward(params["decoder"], target, enc, src_pad_mask, heads)


# ------------------------------ Param init --------------------------------

def _w(k, shape):
    return jax.random.normal(k, shape, jnp.float32) * 0.02


def _attn_params(k, embed_size, heads):
    d = embed_size // heads
    k1, k2, k3, k4 = jax.random.split(k, 4)
    return dict(
        Wv=_w(k1, (d, d)), Wk=_w(k2, (d, d)), Wq=_w(k3, (d, d)),
        Wo=_w(k4, (embed_size, embed_size)),
        bo=jnp.zeros((embed_size,), jnp.float32),
    )


def _block_params(k, embed_size, heads, forward_expansion):
    k1, k2, k3 = jax.random.split(k, 3)
    hid = forward_expansion * embed_size
    return dict(
        attn=_attn_params(k1, embed_size, heads),
        norm1_g=jnp.ones((embed_size,), jnp.float32),
        norm1_b=jnp.zeros((embed_size,), jnp.float32),
        norm2_g=jnp.ones((embed_size,), jnp.float32),
        norm2_b=jnp.zeros((embed_size,), jnp.float32),
        ff_W1=_w(k2, (embed_size, hid)),
        ff_b1=jnp.zeros((hid,), jnp.float32),
        ff_W2=_w(k3, (hid, embed_size)),
        ff_b2=jnp.zeros((embed_size,), jnp.float32),
    )


def _decoder_block_params(k, embed_size, heads, forward_expansion):
    k1, k2 = jax.random.split(k, 2)
    return dict(
        attn=_attn_params(k1, embed_size, heads),
        norm_g=jnp.ones((embed_size,), jnp.float32),
        norm_b=jnp.zeros((embed_size,), jnp.float32),
        block=_block_params(k2, embed_size, heads, forward_expansion),
    )


def init_params(key, src_vocab, trg_vocab, embed_size, heads, num_layers,
                forward_expansion, max_length):
    ke, kd = jax.random.split(key, 2)
    ke_emb, ke_pos, *ke_layers = jax.random.split(ke, 2 + num_layers)
    kd_emb, kd_pos, kd_fc, *kd_layers = jax.random.split(kd, 3 + num_layers)
    encoder = dict(
        word_emb=_w(ke_emb, (src_vocab, embed_size)),
        pos_emb=_w(ke_pos, (max_length, embed_size)),
        layers=[_block_params(k, embed_size, heads, forward_expansion)
                for k in ke_layers],
    )
    decoder = dict(
        word_emb=_w(kd_emb, (trg_vocab, embed_size)),
        pos_emb=_w(kd_pos, (max_length, embed_size)),
        layers=[_decoder_block_params(k, embed_size, heads, forward_expansion)
                for k in kd_layers],
        fc_W=_w(kd_fc, (embed_size, trg_vocab)),
        fc_b=jnp.zeros((trg_vocab,), jnp.float32),
    )
    return dict(encoder=encoder, decoder=decoder)


# ---------------------------------- Main -----------------------------------

if __name__ == "__main__":
    embed_size = 32
    heads = 4
    num_layers = 2
    forward_expansion = 4
    max_length = 100
    src_vocab, trg_vocab = 13, 11
    src_pad_idx, trg_pad_idx = 0, 0
    N, S = 2, 8   # equal src/trg length (required by the reference's broadcasting)

    key = jax.random.PRNGKey(0)
    pkey, skey, tkey = jax.random.split(key, 3)
    params = init_params(pkey, src_vocab, trg_vocab, embed_size, heads,
                         num_layers, forward_expansion, max_length)

    source = jax.random.randint(skey, (N, S), 1, src_vocab).astype(jnp.int32)
    source = source.at[:, -1].set(src_pad_idx)  # exercise the pad mask
    target = jax.random.randint(tkey, (N, S), 1, trg_vocab).astype(jnp.int32)

    fwd = jax.jit(functools.partial(
        transformer_forward,
        src_pad_idx=src_pad_idx, trg_pad_idx=trg_pad_idx, heads=heads))

    out = fwd(params, source, target)
    jax.block_until_ready(out)
    assert out.shape == (N, S, trg_vocab), out.shape
    assert bool(jnp.all(jnp.isfinite(out)))
    print("KERNEL_OK")
</pallas_src>

<mosaic_0001>
module attributes {stable_mosaic.version = 11 : i64} {
  func.func @_encoder_block_kernel(%arg0: i32, %arg1: memref<1x8x32xf32, #tpu.memory_space<vmem>>, %arg2: memref<1x1x8xf32, #tpu.memory_space<vmem>>, %arg3: memref<8x8xbf16, #tpu.memory_space<vmem>>, %arg4: memref<8x8xbf16, #tpu.memory_space<vmem>>, %arg5: memref<8x8xbf16, #tpu.memory_space<vmem>>, %arg6: memref<32x32xbf16, #tpu.memory_space<vmem>>, %arg7: memref<1x32xf32, #tpu.memory_space<vmem>>, %arg8: memref<1x32xf32, #tpu.memory_space<vmem>>, %arg9: memref<1x32xf32, #tpu.memory_space<vmem>>, %arg10: memref<32x128xbf16, #tpu.memory_space<vmem>>, %arg11: memref<1x128xf32, #tpu.memory_space<vmem>>, %arg12: memref<128x32xbf16, #tpu.memory_space<vmem>>, %arg13: memref<1x32xf32, #tpu.memory_space<vmem>>, %arg14: memref<1x32xf32, #tpu.memory_space<vmem>>, %arg15: memref<1x32xf32, #tpu.memory_space<vmem>>, %arg16: memref<1x8x32xf32, #tpu.memory_space<vmem>>) attributes {dimension_semantics = [#tpu.dimension_semantics<parallel>], iteration_bounds = array<i64: 2>, scalar_prefetch = 0 : i64, scratch_operands = 0 : i64, tpu.core_type = #tpu.core_type<tc>, window_params = [{transform_indices = @transform_0, window_bounds = array<i64: 1, 8, 32>}, {transform_indices = @transform_1, window_bounds = array<i64: 1, 1, 8>}, {pipeline_mode = #tpu.pipeline_mode<synchronous>, transform_indices = @transform_2, window_bounds = array<i64: 8, 8>}, {pipeline_mode = #tpu.pipeline_mode<synchronous>, transform_indices = @transform_3, window_bounds = array<i64: 8, 8>}, {pipeline_mode = #tpu.pipeline_mode<synchronous>, transform_indices = @transform_4, window_bounds = array<i64: 8, 8>}, {pipeline_mode = #tpu.pipeline_mode<synchronous>, transform_indices = @transform_5, window_bounds = array<i64: 32, 32>}, {pipeline_mode = #tpu.pipeline_mode<synchronous>, transform_indices = @transform_6, window_bounds = array<i64: 1, 32>}, {pipeline_mode = #tpu.pipeline_mode<synchronous>, transform_indices = @transform_7, window_bounds = array<i64: 1, 32>}, {pipeline_mode = #tpu.pipeline_mode<synchronous>, transform_indices = @transform_8, window_bounds = array<i64: 1, 32>}, {pipeline_mode = #tpu.pipeline_mode<synchronous>, transform_indices = @transform_9, window_bounds = array<i64: 32, 128>}, {pipeline_mode = #tpu.pipeline_mode<synchronous>, transform_indices = @transform_10, window_bounds = array<i64: 1, 128>}, {pipeline_mode = #tpu.pipeline_mode<synchronous>, transform_indices = @transform_11, window_bounds = array<i64: 128, 32>}, {pipeline_mode = #tpu.pipeline_mode<synchronous>, transform_indices = @transform_12, window_bounds = array<i64: 1, 32>}, {pipeline_mode = #tpu.pipeline_mode<synchronous>, transform_indices = @transform_13, window_bounds = array<i64: 1, 32>}, {pipeline_mode = #tpu.pipeline_mode<synchronous>, transform_indices = @transform_14, window_bounds = array<i64: 1, 32>}, {transform_indices = @transform_15, window_bounds = array<i64: 1, 8, 32>}]} {
    %c0 = arith.constant 0 : index
    %c0_0 = arith.constant 0 : index
    %c0_1 = arith.constant 0 : index
    %0 = vector.load %arg1[%c0, %c0_0, %c0_1] : memref<1x8x32xf32, #tpu.memory_space<vmem>>, vector<1x8x32xf32>
    %1 = vector.shape_cast %0 : vector<1x8x32xf32> to vector<8x32xf32>
    %2 = arith.truncf %1 : vector<8x32xf32> to vector<8x32xbf16>
    %c0_2 = arith.constant 0 : index
    %c0_3 = arith.constant 0 : index
    %c0_4 = arith.constant 0 : index
    %3 = vector.load %arg2[%c0_2, %c0_3, %c0_4] : memref<1x1x8xf32, #tpu.memory_space<vmem>>, vector<1x1x8xf32>
    %4 = vector.shape_cast %3 : vector<1x1x8xf32> to vector<1x8xf32>
    %c0_5 = arith.constant 0 : index
    %c0_6 = arith.constant 0 : index
    %5 = vector.load %arg3[%c0_5, %c0_6] : memref<8x8xbf16, #tpu.memory_space<vmem>>, vector<8x8xbf16>
    %c0_7 = arith.constant 0 : index
    %c0_8 = arith.constant 0 : index
    %6 = vector.load %arg4[%c0_7, %c0_8] : memref<8x8xbf16, #tpu.memory_space<vmem>>, vector<8x8xbf16>
    %c0_9 = arith.constant 0 : index
    %c0_10 = arith.constant 0 : index
    %7 = vector.load %arg5[%c0_9, %c0_10] : memref<8x8xbf16, #tpu.memory_space<vmem>>, vector<8x8xbf16>
    %c0_11 = arith.constant 0 : index
    %c0_12 = arith.constant 0 : index
    %8 = vector.load %arg6[%c0_11, %c0_12] : memref<32x32xbf16, #tpu.memory_space<vmem>>, vector<32x32xbf16>
    %c0_13 = arith.constant 0 : index
    %c0_14 = arith.constant 0 : index
    %9 = vector.load %arg7[%c0_13, %c0_14] : memref<1x32xf32, #tpu.memory_space<vmem>>, vector<1x32xf32>
    %cst = arith.constant 0.000000e+00 : f32
    %10 = vector.broadcast %cst : f32 to vector<1x8xf32>
    %11 = arith.cmpf oeq, %4, %10 : vector<1x8xf32>
    %cst_15 = arith.constant 0.000000e+00 : f32
    %12 = vector.broadcast %cst_15 : f32 to vector<8x32xf32>
    %13 = vector.extract_strided_slice %2 {offsets = [0, 0], sizes = [8, 8], strides = [1, 1]} : vector<8x32xbf16> to vector<8x8xbf16>
    %cst_16 = arith.constant dense<0.000000e+00> : vector<8x8xf32>
    %14 = tpu.matmul %13, %5, %cst_16 {dimension_numbers = #tpu.dot_dimension_numbers<[1], [0], [0], [1], [0, 0, 1, 1], [], []>} : vector<8x8xbf16>, vector<8x8xbf16>, vector<8x8xf32> -> vector<8x8xf32>
    %15 = vector.extract_strided_slice %2 {offsets = [0, 0], sizes = [8, 8], strides = [1, 1]} : vector<8x32xbf16> to vector<8x8xbf16>
    %cst_17 = arith.constant dense<0.000000e+00> : vector<8x8xf32>
    %16 = tpu.matmul %15, %6, %cst_17 {dimension_numbers = #tpu.dot_dimension_numbers<[1], [0], [0], [1], [0, 0, 1, 1], [], []>} : vector<8x8xbf16>, vector<8x8xbf16>, vector<8x8xf32> -> vector<8x8xf32>
    %17 = vector.extract_strided_slice %2 {offsets = [0, 0], sizes = [8, 8], strides = [1, 1]} : vector<8x32xbf16> to vector<8x8xbf16>
    %cst_18 = arith.constant dense<0.000000e+00> : vector<8x8xf32>
    %18 = tpu.matmul %17, %7, %cst_18 {dimension_numbers = #tpu.dot_dimension_numbers<[1], [0], [0], [1], [0, 0, 1, 1], [], []>} : vector<8x8xbf16>, vector<8x8xbf16>, vector<8x8xf32> -> vector<8x8xf32>
    %19 = arith.truncf %14 : vector<8x8xf32> to vector<8x8xbf16>
    %20 = arith.truncf %16 : vector<8x8xf32> to vector<8x8xbf16>
    %cst_19 = arith.constant dense<0.000000e+00> : vector<8x8xf32>
    %21 = tpu.matmul %19, %20, %cst_19 {dimension_numbers = #tpu.dot_dimension_numbers<[1], [1], [0], [0], [0, 0, 1, 0], [], []>} : vector<8x8xbf16>, vector<8x8xbf16>, vector<8x8xf32> -> vector<8x8xf32>
    %cst_20 = arith.constant -1.000000e+20 : f32
    %22 = vector.shape_cast %11 : vector<1x8xi1> to vector<1x8xi1>
    %23 = vector.broadcast %22 : vector<1x8xi1> to vector<8x8xi1>
    %24 = vector.broadcast %cst_20 : f32 to vector<8x8xf32>
    %25 = arith.select %23, %24, %21 : vector<8x8xi1>, vector<8x8xf32>
    %cst_21 = arith.constant 0.176776692 : f32
    %26 = vector.broadcast %cst_21 : f32 to vector<8x8xf32>
    %27 = arith.mulf %25, %26 : vector<8x8xf32>
    %cst_22 = arith.constant dense<0xFF800000> : vector<8xf32>
    %28 = vector.multi_reduction <maximumf>, %27, %cst_22 [1] : vector<8x8xf32> to vector<8xf32>
    %29 = vector.shape_cast %28 : vector<8xf32> to vector<8x1xf32>
    %30 = vector.broadcast %29 : vector<8x1xf32> to vector<8x8xf32>
    %31 = arith.subf %27, %30 : vector<8x8xf32>
    %32 = math.exp %31 : vector<8x8xf32>
    %cst_23 = arith.constant dense<0.000000e+00> : vector<8xf32>
    %33 = vector.multi_reduction <add>, %32, %cst_23 [1] : vector<8x8xf32> to vector<8xf32>
    %34 = vector.shape_cast %33 : vector<8xf32> to vector<8x1xf32>
    %35 = vector.broadcast %34 : vector<8x1xf32> to vector<8x8xf32>
    %36 = arith.divf %32, %35 : vector<8x8xf32>
    %37 = arith.truncf %36 : vector<8x8xf32> to vector<8x8xbf16>
    %38 = arith.truncf %18 : vector<8x8xf32> to vector<8x8xbf16>
    %cst_24 = arith.constant dense<0.000000e+00> : vector<8x8xf32>
    %39 = tpu.matmul %37, %38, %cst_24 {dimension_numbers = #tpu.dot_dimension_numbers<[1], [0], [0], [1], [0, 0, 1, 1], [], []>} : vector<8x8xbf16>, vector<8x8xbf16>, vector<8x8xf32> -> vector<8x8xf32>
    %40 = arith.truncf %39 : vector<8x8xf32> to vector<8x8xbf16>
    %41 = vector.extract_strided_slice %8 {offsets = [0, 0], sizes = [8, 32], strides = [1, 1]} : vector<32x32xbf16> to vector<8x32xbf16>
    %cst_25 = arith.constant dense<0.000000e+00> : vector<8x32xf32>
    %42 = tpu.matmul %40, %41, %cst_25 {dimension_numbers = #tpu.dot_dimension_numbers<[1], [0], [0], [1], [0, 0, 1, 1], [], []>} : vector<8x8xbf16>, vector<8x32xbf16>, vector<8x32xf32> -> vector<8x32xf32>
    %43 = arith.addf %12, %42 : vector<8x32xf32>
    %44 = vector.extract_strided_slice %2 {offsets = [0, 8], sizes = [8, 8], strides = [1, 1]} : vector<8x32xbf16> to vector<8x8xbf16>
    %cst_26 = arith.constant dense<0.000000e+00> : vector<8x8xf32>
    %45 = tpu.matmul %44, %5, %cst_26 {dimension_numbers = #tpu.dot_dimension_numbers<[1], [0], [0], [1], [0, 0, 1, 1], [], []>} : vector<8x8xbf16>, vector<8x8xbf16>, vector<8x8xf32> -> vector<8x8xf32>
    %46 = vector.extract_strided_slice %2 {offsets = [0, 8], sizes = [8, 8], strides = [1, 1]} : vector<8x32xbf16> to vector<8x8xbf16>
    %cst_27 = arith.constant dense<0.000000e+00> : vector<8x8xf32>
    %47 = tpu.matmul %46, %6, %cst_27 {dimension_numbers = #tpu.dot_dimension_numbers<[1], [0], [0], [1], [0, 0, 1, 1], [], []>} : vector<8x8xbf16>, vector<8x8xbf16>, vector<8x8xf32> -> vector<8x8xf32>
    %48 = vector.extract_strided_slice %2 {offsets = [0, 8], sizes = [8, 8], strides = [1, 1]} : vector<8x32xbf16> to vector<8x8xbf16>
    %cst_28 = arith.constant dense<0.000000e+00> : vector<8x8xf32>
    %49 = tpu.matmul %48, %7, %cst_28 {dimension_numbers = #tpu.dot_dimension_numbers<[1], [0], [0], [1], [0, 0, 1, 1], [], []>} : vector<8x8xbf16>, vector<8x8xbf16>, vector<8x8xf32> -> vector<8x8xf32>
    %50 = arith.truncf %45 : vector<8x8xf32> to vector<8x8xbf16>
    %51 = arith.truncf %47 : vector<8x8xf32> to vector<8x8xbf16>
    %cst_29 = arith.constant dense<0.000000e+00> : vector<8x8xf32>
    %52 = tpu.matmul %50, %51, %cst_29 {dimension_numbers = #tpu.dot_dimension_numbers<[1], [1], [0], [0], [0, 0, 1, 0], [], []>} : vector<8x8xbf16>, vector<8x8xbf16>, vector<8x8xf32> -> vector<8x8xf32>
    %cst_30 = arith.constant -1.000000e+20 : f32
    %53 = vector.shape_cast %11 : vector<1x8xi1> to vector<1x8xi1>
    %54 = vector.broadcast %53 : vector<1x8xi1> to vector<8x8xi1>
    %55 = vector.broadcast %cst_30 : f32 to vector<8x8xf32>
    %56 = arith.select %54, %55, %52 : vector<8x8xi1>, vector<8x8xf32>
    %cst_31 = arith.constant 0.176776692 : f32
    %57 = vector.broadcast %cst_31 : f32 to vector<8x8xf32>
    %58 = arith.mulf %56, %57 : vector<8x8xf32>
    %cst_32 = arith.constant dense<0xFF800000> : vector<8xf32>
    %59 = vector.multi_reduction <maximumf>, %58, %cst_32 [1] : vector<8x8xf32> to vector<8xf32>
    %60 = vector.shape_cast %59 : vector<8xf32> to vector<8x1xf32>
    %61 = vector.broadcast %60 : vector<8x1xf32> to vector<8x8xf32>
    %62 = arith.subf %58, %61 : vector<8x8xf32>
    %63 = math.exp %62 : vector<8x8xf32>
    %cst_33 = arith.constant dense<0.000000e+00> : vector<8xf32>
    %64 = vector.multi_reduction <add>, %63, %cst_33 [1] : vector<8x8xf32> to vector<8xf32>
    %65 = vector.shape_cast %64 : vector<8xf32> to vector<8x1xf32>
    %66 = vector.broadcast %65 : vector<8x1xf32> to vector<8x8xf32>
    %67 = arith.divf %63, %66 : vector<8x8xf32>
    %68 = arith.truncf %67 : vector<8x8xf32> to vector<8x8xbf16>
    %69 = arith.truncf %49 : vector<8x8xf32> to vector<8x8xbf16>
    %cst_34 = arith.constant dense<0.000000e+00> : vector<8x8xf32>
    %70 = tpu.matmul %68, %69, %cst_34 {dimension_numbers = #tpu.dot_dimension_numbers<[1], [0], [0], [1], [0, 0, 1, 1], [], []>} : vector<8x8xbf16>, vector<8x8xbf16>, vector<8x8xf32> -> vector<8x8xf32>
    %71 = arith.truncf %70 : vector<8x8xf32> to vector<8x8xbf16>
    %72 = vector.extract_strided_slice %8 {offsets = [8, 0], sizes = [8, 32], strides = [1, 1]} : vector<32x32xbf16> to vector<8x32xbf16>
    %cst_35 = arith.constant dense<0.000000e+00> : vector<8x32xf32>
    %73 = tpu.matmul %71, %72, %cst_35 {dimension_numbers = #tpu.dot_dimension_numbers<[1], [0], [0], [1], [0, 0, 1, 1], [], []>} : vector<8x8xbf16>, vector<8x32xbf16>, vector<8x32xf32> -> vector<8x32xf32>
    %74 = arith.addf %43, %73 : vector<8x32xf32>
    %75 = vector.extract_strided_slice %2 {offsets = [0, 16], sizes = [8, 8], strides = [1, 1]} : vector<8x32xbf16> to vector<8x8xbf16>
    %cst_36 = arith.constant dense<0.000000e+00> : vector<8x8xf32>
    %76 = tpu.matmul %75, %5, %cst_36 {dimension_numbers = #tpu.dot_dimension_numbers<[1], [0], [0], [1], [0, 0, 1, 1], [], []>} : vector<8x8xbf16>, vector<8x8xbf16>, vector<8x8xf32> -> vector<8x8xf32>
    %77 = vector.extract_strided_slice %2 {offsets = [0, 16], sizes = [8, 8], strides = [1, 1]} : vector<8x32xbf16> to vector<8x8xbf16>
    %cst_37 = arith.constant dense<0.000000e+00> : vector<8x8xf32>
    %78 = tpu.matmul %77, %6, %cst_37 {dimension_numbers = #tpu.dot_dimension_numbers<[1], [0], [0], [1], [0, 0, 1, 1], [], []>} : vector<8x8xbf16>, vector<8x8xbf16>, vector<8x8xf32> -> vector<8x8xf32>
    %79 = vector.extract_strided_slice %2 {offsets = [0, 16], sizes = [8, 8], strides = [1, 1]} : vector<8x32xbf16> to vector<8x8xbf16>
    %cst_38 = arith.constant dense<0.000000e+00> : vector<8x8xf32>
    %80 = tpu.matmul %79, %7, %cst_38 {dimension_numbers = #tpu.dot_dimension_numbers<[1], [0], [0], [1], [0, 0, 1, 1], [], []>} : vector<8x8xbf16>, vector<8x8xbf16>, vector<8x8xf32> -> vector<8x8xf32>
    %81 = arith.truncf %76 : vector<8x8xf32> to vector<8x8xbf16>
    %82 = arith.truncf %78 : vector<8x8xf32> to vector<8x8xbf16>
    %cst_39 = arith.constant dense<0.000000e+00> : vector<8x8xf32>
    %83 = tpu.matmul %81, %82, %cst_39 {dimension_numbers = #tpu.dot_dimension_numbers<[1], [1], [0], [0], [0, 0, 1, 0], [], []>} : vector<8x8xbf16>, vector<8x8xbf16>, vector<8x8xf32> -> vector<8x8xf32>
    %cst_40 = arith.constant -1.000000e+20 : f32
    %84 = vector.shape_cast %11 : vector<1x8xi1> to vector<1x8xi1>
    %85 = vector.broadcast %84 : vector<1x8xi1> to vector<8x8xi1>
    %86 = vector.broadcast %cst_40 : f32 to vector<8x8xf32>
    %87 = arith.select %85, %86, %83 : vector<8x8xi1>, vector<8x8xf32>
    %cst_41 = arith.constant 0.176776692 : f32
    %88 = vector.broadcast %cst_41 : f32 to vector<8x8xf32>
    %89 = arith.mulf %87, %88 : vector<8x8xf32>
    %cst_42 = arith.constant dense<0xFF800000> : vector<8xf32>
    %90 = vector.multi_reduction <maximumf>, %89, %cst_42 [1] : vector<8x8xf32> to vector<8xf32>
    %91 = vector.shape_cast %90 : vector<8xf32> to vector<8x1xf32>
    %92 = vector.broadcast %91 : vector<8x1xf32> to vector<8x8xf32>
    %93 = arith.subf %89, %92 : vector<8x8xf32>
    %94 = math.exp %93 : vector<8x8xf32>
    %cst_43 = arith.constant dense<0.000000e+00> : vector<8xf32>
    %95 = vector.multi_reduction <add>, %94, %cst_43 [1] : vector<8x8xf32> to vector<8xf32>
    %96 = vector.shape_cast %95 : vector<8xf32> to vector<8x1xf32>
    %97 = vector.broadcast %96 : vector<8x1xf32> to vector<8x8xf32>
    %98 = arith.divf %94, %97 : vector<8x8xf32>
    %99 = arith.truncf %98 : vector<8x8xf32> to vector<8x8xbf16>
    %100 = arith.truncf %80 : vector<8x8xf32> to vector<8x8xbf16>
    %cst_44 = arith.constant dense<0.000000e+00> : vector<8x8xf32>
    %101 = tpu.matmul %99, %100, %cst_44 {dimension_numbers = #tpu.dot_dimension_numbers<[1], [0], [0], [1], [0, 0, 1, 1], [], []>} : vector<8x8xbf16>, vector<8x8xbf16>, vector<8x8xf32> -> vector<8x8xf32>
    %102 = arith.truncf %101 : vector<8x8xf32> to vector<8x8xbf16>
    %103 = vector.extract_strided_slice %8 {offsets = [16, 0], sizes = [8, 32], strides = [1, 1]} : vector<32x32xbf16> to vector<8x32xbf16>
    %cst_45 = arith.constant dense<0.000000e+00> : vector<8x32xf32>
    %104 = tpu.matmul %102, %103, %cst_45 {dimension_numbers = #tpu.dot_dimension_numbers<[1], [0], [0], [1], [0, 0, 1, 1], [], []>} : vector<8x8xbf16>, vector<8x32xbf16>, vector<8x32xf32> -> vector<8x32xf32>
    %105 = arith.addf %74, %104 : vector<8x32xf32>
    %106 = vector.extract_strided_slice %2 {offsets = [0, 24], sizes = [8, 8], strides = [1, 1]} : vector<8x32xbf16> to vector<8x8xbf16>
    %cst_46 = arith.constant dense<0.000000e+00> : vector<8x8xf32>
    %107 = tpu.matmul %106, %5, %cst_46 {dimension_numbers = #tpu.dot_dimension_numbers<[1], [0], [0], [1], [0, 0, 1, 1], [], []>} : vector<8x8xbf16>, vector<8x8xbf16>, vector<8x8xf32> -> vector<8x8xf32>
    %108 = vector.extract_strided_slice %2 {offsets = [0, 24], sizes = [8, 8], strides = [1, 1]} : vector<8x32xbf16> to vector<8x8xbf16>
    %cst_47 = arith.constant dense<0.000000e+00> : vector<8x8xf32>
    %109 = tpu.matmul %108, %6, %cst_47 {dimension_numbers = #tpu.dot_dimension_numbers<[1], [0], [0], [1], [0, 0, 1, 1], [], []>} : vector<8x8xbf16>, vector<8x8xbf16>, vector<8x8xf32> -> vector<8x8xf32>
    %110 = vector.extract_strided_slice %2 {offsets = [0, 24], sizes = [8, 8], strides = [1, 1]} : vector<8x32xbf16> to vector<8x8xbf16>
    %cst_48 = arith.constant dense<0.000000e+00> : vector<8x8xf32>
    %111 = tpu.matmul %110, %7, %cst_48 {dimension_numbers = #tpu.dot_dimension_numbers<[1], [0], [0], [1], [0, 0, 1, 1], [], []>} : vector<8x8xbf16>, vector<8x8xbf16>, vector<8x8xf32> -> vector<8x8xf32>
    %112 = arith.truncf %107 : vector<8x8xf32> to vector<8x8xbf16>
    %113 = arith.truncf %109 : vector<8x8xf32> to vector<8x8xbf16>
    %cst_49 = arith.constant dense<0.000000e+00> : vector<8x8xf32>
    %114 = tpu.matmul %112, %113, %cst_49 {dimension_numbers = #tpu.dot_dimension_numbers<[1], [1], [0], [0], [0, 0, 1, 0], [], []>} : vector<8x8xbf16>, vector<8x8xbf16>, vector<8x8xf32> -> vector<8x8xf32>
    %cst_50 = arith.constant -1.000000e+20 : f32
    %115 = vector.shape_cast %11 : vector<1x8xi1> to vector<1x8xi1>
    %116 = vector.broadcast %115 : vector<1x8xi1> to vector<8x8xi1>
    %117 = vector.broadcast %cst_50 : f32 to vector<8x8xf32>
    %118 = arith.select %116, %117, %114 : vector<8x8xi1>, vector<8x8xf32>
    %cst_51 = arith.constant 0.176776692 : f32
    %119 = vector.broadcast %cst_51 : f32 to vector<8x8xf32>
    %120 = arith.mulf %118, %119 : vector<8x8xf32>
    %cst_52 = arith.constant dense<0xFF800000> : vector<8xf32>
    %121 = vector.multi_reduction <maximumf>, %120, %cst_52 [1] : vector<8x8xf32> to vector<8xf32>
    %122 = vector.shape_cast %121 : vector<8xf32> to vector<8x1xf32>
    %123 = vector.broadcast %122 : vector<8x1xf32> to vector<8x8xf32>
    %124 = arith.subf %120, %123 : vector<8x8xf32>
    %125 = math.exp %124 : vector<8x8xf32>
    %cst_53 = arith.constant dense<0.000000e+00> : vector<8xf32>
    %126 = vector.multi_reduction <add>, %125, %cst_53 [1] : vector<8x8xf32> to vector<8xf32>
    %127 = vector.shape_cast %126 : vector<8xf32> to vector<8x1xf32>
    %128 = vector.broadcast %127 : vector<8x1xf32> to vector<8x8xf32>
    %129 = arith.divf %125, %128 : vector<8x8xf32>
    %130 = arith.truncf %129 : vector<8x8xf32> to vector<8x8xbf16>
    %131 = arith.truncf %111 : vector<8x8xf32> to vector<8x8xbf16>
    %cst_54 = arith.constant dense<0.000000e+00> : vector<8x8xf32>
    %132 = tpu.matmul %130, %131, %cst_54 {dimension_numbers = #tpu.dot_dimension_numbers<[1], [0], [0], [1], [0, 0, 1, 1], [], []>} : vector<8x8xbf16>, vector<8x8xbf16>, vector<8x8xf32> -> vector<8x8xf32>
    %133 = arith.truncf %132 : vector<8x8xf32> to vector<8x8xbf16>
    %134 = vector.extract_strided_slice %8 {offsets = [24, 0], sizes = [8, 32], strides = [1, 1]} : vector<32x32xbf16> to vector<8x32xbf16>
    %cst_55 = arith.constant dense<0.000000e+00> : vector<8x32xf32>
    %135 = tpu.matmul %133, %134, %cst_55 {dimension_numbers = #tpu.dot_dimension_numbers<[1], [0], [0], [1], [0, 0, 1, 1], [], []>} : vector<8x8xbf16>, vector<8x32xbf16>, vector<8x32xf32> -> vector<8x32xf32>
    %136 = arith.addf %105, %135 : vector<8x32xf32>
    %137 = vector.broadcast %9 : vector<1x32xf32> to vector<8x32xf32>
    %138 = arith.addf %136, %137 : vector<8x32xf32>
    %139 = arith.addf %138, %1 : vector<8x32xf32>
    %c0_56 = arith.constant 0 : index
    %c0_57 = arith.constant 0 : index
    %140 = vector.load %arg8[%c0_56, %c0_57] : memref<1x32xf32, #tpu.memory_space<vmem>>, vector<1x32xf32>
    %c0_58 = arith.constant 0 : index
    %c0_59 = arith.constant 0 : index
    %141 = vector.load %arg9[%c0_58, %c0_59] : memref<1x32xf32, #tpu.memory_space<vmem>>, vector<1x32xf32>
    %cst_60 = arith.constant dense<0.000000e+00> : vector<8xf32>
    %142 = vector.multi_reduction <add>, %139, %cst_60 [1] : vector<8x32xf32> to vector<8xf32>
    %143 = vector.shape_cast %142 : vector<8xf32> to vector<8x1xf32>
    %cst_61 = arith.constant 3.200000e+01 : f32
    %144 = vector.broadcast %cst_61 : f32 to vector<8x1xf32>
    %145 = arith.divf %143, %144 : vector<8x1xf32>
    %146 = vector.broadcast %145 : vector<8x1xf32> to vector<8x32xf32>
    %147 = arith.subf %139, %146 : vector<8x32xf32>
    %148 = arith.mulf %147, %147 : vector<8x32xf32>
    %cst_62 = arith.constant dense<0.000000e+00> : vector<8xf32>
    %149 = vector.multi_reduction <add>, %148, %cst_62 [1] : vector<8x32xf32> to vector<8xf32>
    %150 = vector.shape_cast %149 : vector<8xf32> to vector<8x1xf32>
    %cst_63 = arith.constant 3.200000e+01 : f32
    %151 = vector.broadcast %cst_63 : f32 to vector<8x1xf32>
    %152 = arith.divf %150, %151 : vector<8x1xf32>
    %cst_64 = arith.constant 9.99999974E-6 : f32
    %153 = vector.broadcast %cst_64 : f32 to vector<8x1xf32>
    %154 = arith.addf %152, %153 : vector<8x1xf32>
    %155 = math.rsqrt %154 : vector<8x1xf32>
    %156 = vector.broadcast %155 : vector<8x1xf32> to vector<8x32xf32>
    %157 = arith.mulf %147, %156 : vector<8x32xf32>
    %158 = vector.broadcast %140 : vector<1x32xf32> to vector<8x32xf32>
    %159 = arith.mulf %157, %158 : vector<8x32xf32>
    %160 = vector.broadcast %141 : vector<1x32xf32> to vector<8x32xf32>
    %161 = arith.addf %159, %160 : vector<8x32xf32>
    %c0_65 = arith.constant 0 : index
    %c0_66 = arith.constant 0 : index
    %162 = vector.load %arg10[%c0_65, %c0_66] : memref<32x128xbf16, #tpu.memory_space<vmem>>, vector<32x128xbf16>
    %c0_67 = arith.constant 0 : index
    %c0_68 = arith.constant 0 : index
    %163 = vector.load %arg11[%c0_67, %c0_68] : memref<1x128xf32, #tpu.memory_space<vmem>>, vector<1x128xf32>
    %c0_69 = arith.constant 0 : index
    %c0_70 = arith.constant 0 : index
    %164 = vector.load %arg12[%c0_69, %c0_70] : memref<128x32xbf16, #tpu.memory_space<vmem>>, vector<128x32xbf16>
    %c0_71 = arith.constant 0 : index
    %c0_72 = arith.constant 0 : index
    %165 = vector.load %arg13[%c0_71, %c0_72] : memref<1x32xf32, #tpu.memory_space<vmem>>, vector<1x32xf32>
    %166 = arith.truncf %161 : vector<8x32xf32> to vector<8x32xbf16>
    %cst_73 = arith.constant dense<0.000000e+00> : vector<8x128xf32>
    %167 = tpu.matmul %166, %162, %cst_73 {dimension_numbers = #tpu.dot_dimension_numbers<[1], [0], [0], [1], [0, 0, 1, 1], [], []>} : vector<8x32xbf16>, vector<32x128xbf16>, vector<8x128xf32> -> vector<8x128xf32>
    %168 = vector.broadcast %163 : vector<1x128xf32> to vector<8x128xf32>
    %169 = arith.addf %167, %168 : vector<8x128xf32>
    %cst_74 = arith.constant 0.000000e+00 : f32
    %170 = vector.broadcast %cst_74 : f32 to vector<8x128xf32>
    %171 = arith.maximumf %169, %170 : vector<8x128xf32>
    %172 = arith.truncf %171 : vector<8x128xf32> to vector<8x128xbf16>
    %cst_75 = arith.constant dense<0.000000e+00> : vector<8x32xf32>
    %173 = tpu.matmul %172, %164, %cst_75 {dimension_numbers = #tpu.dot_dimension_numbers<[1], [0], [0], [1], [0, 0, 1, 1], [], []>} : vector<8x128xbf16>, vector<128x32xbf16>, vector<8x32xf32> -> vector<8x32xf32>
    %174 = vector.broadcast %165 : vector<1x32xf32> to vector<8x32xf32>
    %175 = arith.addf %173, %174 : vector<8x32xf32>
    %176 = arith.addf %175, %161 : vector<8x32xf32>
    %c0_76 = arith.constant 0 : index
    %c0_77 = arith.constant 0 : index
    %177 = vector.load %arg14[%c0_76, %c0_77] : memref<1x32xf32, #tpu.memory_space<vmem>>, vector<1x32xf32>
    %c0_78 = arith.constant 0 : index
    %c0_79 = arith.constant 0 : index
    %178 = vector.load %arg15[%c0_78, %c0_79] : memref<1x32xf32, #tpu.memory_space<vmem>>, vector<1x32xf32>
    %cst_80 = arith.constant dense<0.000000e+00> : vector<8xf32>
    %179 = vector.multi_reduction <add>, %176, %cst_80 [1] : vector<8x32xf32> to vector<8xf32>
    %180 = vector.shape_cast %179 : vector<8xf32> to vector<8x1xf32>
    %cst_81 = arith.constant 3.200000e+01 : f32
    %181 = vector.broadcast %cst_81 : f32 to vector<8x1xf32>
    %182 = arith.divf %180, %181 : vector<8x1xf32>
    %183 = vector.broadcast %182 : vector<8x1xf32> to vector<8x32xf32>
    %184 = arith.subf %176, %183 : vector<8x32xf32>
    %185 = arith.mulf %184, %184 : vector<8x32xf32>
    %cst_82 = arith.constant dense<0.000000e+00> : vector<8xf32>
    %186 = vector.multi_reduction <add>, %185, %cst_82 [1] : vector<8x32xf32> to vector<8xf32>
    %187 = vector.shape_cast %186 : vector<8xf32> to vector<8x1xf32>
    %cst_83 = arith.constant 3.200000e+01 : f32
    %188 = vector.broadcast %cst_83 : f32 to vector<8x1xf32>
    %189 = arith.divf %187, %188 : vector<8x1xf32>
    %cst_84 = arith.constant 9.99999974E-6 : f32
    %190 = vector.broadcast %cst_84 : f32 to vector<8x1xf32>
    %191 = arith.addf %189, %190 : vector<8x1xf32>
    %192 = math.rsqrt %191 : vector<8x1xf32>
    %193 = vector.broadcast %192 : vector<8x1xf32> to vector<8x32xf32>
    %194 = arith.mulf %184, %193 : vector<8x32xf32>
    %195 = vector.broadcast %177 : vector<1x32xf32> to vector<8x32xf32>
    %196 = arith.mulf %194, %195 : vector<8x32xf32>
    %197 = vector.broadcast %178 : vector<1x32xf32> to vector<8x32xf32>
    %198 = arith.addf %196, %197 : vector<8x32xf32>
    %c0_85 = arith.constant 0 : index
    %c0_86 = arith.constant 0 : index
    %c0_87 = arith.constant 0 : index
    %199 = vector.load %arg16[%c0_85, %c0_86, %c0_87] : memref<1x8x32xf32, #tpu.memory_space<vmem>>, vector<1x8x32xf32>
    %200 = vector.shape_cast %199 : vector<1x8x32xf32> to vector<8x32xf32>
    %201 = vector.shape_cast %198 : vector<8x32xf32> to vector<1x8x32xf32>
    tpu.vector_store %arg16[%c0_85, %c0_86, %c0_87], %201 {strides = array<i32>} : memref<1x8x32xf32, #tpu.memory_space<vmem>>, vector<1x8x32xf32>,
    return
  }
  func.func @transform_0(%arg0: i32) -> (i32, i32, i32) {
    %c0_i32 = arith.constant 0 : i32
    %c0_i32_0 = arith.constant 0 : i32
    %c0_i32_1 = arith.constant 0 : i32
    return %arg0, %c0_i32, %c0_i32_0 : i32, i32, i32
  }
  func.func @transform_1(%arg0: i32) -> (i32, i32, i32) {
    %c0_i32 = arith.constant 0 : i32
    %c0_i32_0 = arith.constant 0 : i32
    %c0_i32_1 = arith.constant 0 : i32
    return %arg0, %c0_i32, %c0_i32_0 : i32, i32, i32
  }
  func.func @transform_2(%arg0: i32) -> (i32, i32) {
    %c0_i32 = arith.constant 0 : i32
    %c0_i32_0 = arith.constant 0 : i32
    %c0_i32_1 = arith.constant 0 : i32
    return %c0_i32, %c0_i32_0 : i32, i32
  }
  func.func @transform_3(%arg0: i32) -> (i32, i32) {
    %c0_i32 = arith.constant 0 : i32
    %c0_i32_0 = arith.constant 0 : i32
    %c0_i32_1 = arith.constant 0 : i32
    return %c0_i32, %c0_i32_0 : i32, i32
  }
  func.func @transform_4(%arg0: i32) -> (i32, i32) {
    %c0_i32 = arith.constant 0 : i32
    %c0_i32_0 = arith.constant 0 : i32
    %c0_i32_1 = arith.constant 0 : i32
    return %c0_i32, %c0_i32_0 : i32, i32
  }
  func.func @transform_5(%arg0: i32) -> (i32, i32) {
    %c0_i32 = arith.constant 0 : i32
    %c0_i32_0 = arith.constant 0 : i32
    %c0_i32_1 = arith.constant 0 : i32
    return %c0_i32, %c0_i32_0 : i32, i32
  }
  func.func @transform_6(%arg0: i32) -> (i32, i32) {
    %c0_i32 = arith.constant 0 : i32
    %c0_i32_0 = arith.constant 0 : i32
    %c0_i32_1 = arith.constant 0 : i32
    return %c0_i32, %c0_i32_0 : i32, i32
  }
  func.func @transform_7(%arg0: i32) -> (i32, i32) {
    %c0_i32 = arith.constant 0 : i32
    %c0_i32_0 = arith.constant 0 : i32
    %c0_i32_1 = arith.constant 0 : i32
    return %c0_i32, %c0_i32_0 : i32, i32
  }
  func.func @transform_8(%arg0: i32) -> (i32, i32) {
    %c0_i32 = arith.constant 0 : i32
    %c0_i32_0 = arith.constant 0 : i32
    %c0_i32_1 = arith.constant 0 : i32
    return %c0_i32, %c0_i32_0 : i32, i32
  }
  func.func @transform_9(%arg0: i32) -> (i32, i32) {
    %c0_i32 = arith.constant 0 : i32
    %c0_i32_0 = arith.constant 0 : i32
    %c0_i32_1 = arith.constant 0 : i32
    return %c0_i32, %c0_i32_0 : i32, i32
  }
  func.func @transform_10(%arg0: i32) -> (i32, i32) {
    %c0_i32 = arith.constant 0 : i32
    %c0_i32_0 = arith.constant 0 : i32
    %c0_i32_1 = arith.constant 0 : i32
    return %c0_i32, %c0_i32_0 : i32, i32
  }
  func.func @transform_11(%arg0: i32) -> (i32, i32) {
    %c0_i32 = arith.constant 0 : i32
    %c0_i32_0 = arith.constant 0 : i32
    %c0_i32_1 = arith.constant 0 : i32
    return %c0_i32, %c0_i32_0 : i32, i32
  }
  func.func @transform_12(%arg0: i32) -> (i32, i32) {
    %c0_i32 = arith.constant 0 : i32
    %c0_i32_0 = arith.constant 0 : i32
    %c0_i32_1 = arith.constant 0 : i32
    return %c0_i32, %c0_i32_0 : i32, i32
  }
  func.func @transform_13(%arg0: i32) -> (i32, i32) {
    %c0_i32 = arith.constant 0 : i32
    %c0_i32_0 = arith.constant 0 : i32
    %c0_i32_1 = arith.constant 0 : i32
    return %c0_i32, %c0_i32_0 : i32, i32
  }
  func.func @transform_14(%arg0: i32) -> (i32, i32) {
    %c0_i32 = arith.constant 0 : i32
    %c0_i32_0 = arith.constant 0 : i32
    %c0_i32_1 = arith.constant 0 : i32
    return %c0_i32, %c0_i32_0 : i32, i32
  }
  func.func @transform_15(%arg0: i32) -> (i32, i32, i32) {
    %c0_i32 = arith.constant 0 : i32
    %c0_i32_0 = arith.constant 0 : i32
    %c0_i32_1 = arith.constant 0 : i32
    return %arg0, %c0_i32, %c0_i32_0 : i32, i32, i32
  }
}

module attributes {stable_mosaic.version = 11 : i64} {
  func.func @_linear_kernel(%arg0: i32, %arg1: i32, %arg2: memref<16x32xf32, #tpu.memory_space<vmem>>, %arg3: memref<32x128xbf16, #tpu.memory_space<vmem>>, %arg4: memref<1x128xf32, #tpu.memory_space<vmem>>, %arg5: memref<16x128xf32, #tpu.memory_space<vmem>>) attributes {dimension_semantics = [#tpu.dimension_semantics<parallel>, #tpu.dimension_semantics<parallel>], iteration_bounds = array<i64: 1, 1>, scalar_prefetch = 0 : i64, scratch_operands = 0 : i64, tpu.core_type = #tpu.core_type<tc>, window_params = [{transform_indices = @transform_0, window_bounds = array<i64: 16, 32>}, {transform_indices = @transform_1, window_bounds = array<i64: 32, 128>}, {transform_indices = @transform_2, window_bounds = array<i64: 1, 128>}, {transform_indices = @transform_3, window_bounds = array<i64: 16, 128>}]} {
    %c0 = arith.constant 0 : index
    %c0_0 = arith.constant 0 : index
    %0 = vector.load %arg2[%c0, %c0_0] : memref<16x32xf32, #tpu.memory_space<vmem>>, vector<16x32xf32>
    %1 = arith.truncf %0 : vector<16x32xf32> to vector<16x32xbf16>
    %c0_1 = arith.constant 0 : index
    %c0_2 = arith.constant 0 : index
    %2 = vector.load %arg3[%c0_1, %c0_2] : memref<32x128xbf16, #tpu.memory_space<vmem>>, vector<32x128xbf16>
    %cst = arith.constant dense<0.000000e+00> : vector<16x128xf32>
    %3 = tpu.matmul %1, %2, %cst {dimension_numbers = #tpu.dot_dimension_numbers<[1], [0], [0], [1], [0, 0, 1, 1], [], []>} : vector<16x32xbf16>, vector<32x128xbf16>, vector<16x128xf32> -> vector<16x128xf32>
    %c0_3 = arith.constant 0 : index
    %c0_4 = arith.constant 0 : index
    %4 = vector.load %arg4[%c0_3, %c0_4] : memref<1x128xf32, #tpu.memory_space<vmem>>, vector<1x128xf32>
    %5 = vector.broadcast %4 : vector<1x128xf32> to vector<16x128xf32>
    %6 = arith.addf %3, %5 : vector<16x128xf32>
    %c0_5 = arith.constant 0 : index
    %c0_6 = arith.constant 0 : index
    %7 = vector.load %arg5[%c0_5, %c0_6] : memref<16x128xf32, #tpu.memory_space<vmem>>, vector<16x128xf32>
    tpu.vector_store %arg5[%c0_5, %c0_6], %6 {strides = array<i32>} : memref<16x128xf32, #tpu.memory_space<vmem>>, vector<16x128xf32>,
    return
  }
  func.func @transform_0(%arg0: i32, %arg1: i32) -> (i32, i32) {
    %c0_i32 = arith.constant 0 : i32
    %c0_i32_0 = arith.constant 0 : i32
    return %arg0, %c0_i32 : i32, i32
  }
  func.func @transform_1(%arg0: i32, %arg1: i32) -> (i32, i32) {
    %c0_i32 = arith.constant 0 : i32
    %c0_i32_0 = arith.constant 0 : i32
    return %c0_i32, %arg1 : i32, i32
  }
  func.func @transform_2(%arg0: i32, %arg1: i32) -> (i32, i32) {
    %c0_i32 = arith.constant 0 : i32
    %c0_i32_0 = arith.constant 0 : i32
    return %c0_i32, %arg1 : i32, i32
  }
  func.func @transform_3(%arg0: i32, %arg1: i32) -> (i32, i32) {
    %c0_i32 = arith.constant 0 : i32
    return %arg0, %arg1 : i32, i32
  }
}

module attributes {stable_mosaic.version = 11 : i64} {
  func.func @_decoder_block_kernel(%arg0: i32, %arg1: memref<1x8x32xf32, #tpu.memory_space<vmem>>, %arg2: memref<1x8x32xf32, #tpu.memory_space<vmem>>, %arg3: memref<1x1x8xf32, #tpu.memory_space<vmem>>, %arg4: memref<8x8xbf16, #tpu.memory_space<vmem>>, %arg5: memref<8x8xbf16, #tpu.memory_space<vmem>>, %arg6: memref<8x8xbf16, #tpu.memory_space<vmem>>, %arg7: memref<32x32xbf16, #tpu.memory_space<vmem>>, %arg8: memref<1x32xf32, #tpu.memory_space<vmem>>, %arg9: memref<1x32xf32, #tpu.memory_space<vmem>>, %arg10: memref<1x32xf32, #tpu.memory_space<vmem>>, %arg11: memref<8x8xbf16, #tpu.memory_space<vmem>>, %arg12: memref<8x8xbf16, #tpu.memory_space<vmem>>, %arg13: memref<8x8xbf16, #tpu.memory_space<vmem>>, %arg14: memref<32x32xbf16, #tpu.memory_space<vmem>>, %arg15: memref<1x32xf32, #tpu.memory_space<vmem>>, %arg16: memref<1x32xf32, #tpu.memory_space<vmem>>, %arg17: memref<1x32xf32, #tpu.memory_space<vmem>>, %arg18: memref<32x128xbf16, #tpu.memory_space<vmem>>, %arg19: memref<1x128xf32, #tpu.memory_space<vmem>>, %arg20: memref<128x32xbf16, #tpu.memory_space<vmem>>, %arg21: memref<1x32xf32, #tpu.memory_space<vmem>>, %arg22: memref<1x32xf32, #tpu.memory_space<vmem>>, %arg23: memref<1x32xf32, #tpu.memory_space<vmem>>, %arg24: memref<1x8x32xf32, #tpu.memory_space<vmem>>) attributes {dimension_semantics = [#tpu.dimension_semantics<parallel>], iteration_bounds = array<i64: 2>, scalar_prefetch = 0 : i64, scratch_operands = 0 : i64, tpu.core_type = #tpu.core_type<tc>, window_params = [{transform_indices = @transform_0, window_bounds = array<i64: 1, 8, 32>}, {transform_indices = @transform_1, window_bounds = array<i64: 1, 8, 32>}, {transform_indices = @transform_2, window_bounds = array<i64: 1, 1, 8>}, {pipeline_mode = #tpu.pipeline_mode<synchronous>, transform_indices = @transform_3, window_bounds = array<i64: 8, 8>}, {pipeline_mode = #tpu.pipeline_mode<synchronous>, transform_indices = @transform_4, window_bounds = array<i64: 8, 8>}, {pipeline_mode = #tpu.pipeline_mode<synchronous>, transform_indices = @transform_5, window_bounds = array<i64: 8, 8>}, {pipeline_mode = #tpu.pipeline_mode<synchronous>, transform_indices = @transform_6, window_bounds = array<i64: 32, 32>}, {pipeline_mode = #tpu.pipeline_mode<synchronous>, transform_indices = @transform_7, window_bounds = array<i64: 1, 32>}, {pipeline_mode = #tpu.pipeline_mode<synchronous>, transform_indices = @transform_8, window_bounds = array<i64: 1, 32>}, {pipeline_mode = #tpu.pipeline_mode<synchronous>, transform_indices = @transform_9, window_bounds = array<i64: 1, 32>}, {pipeline_mode = #tpu.pipeline_mode<synchronous>, transform_indices = @transform_10, window_bounds = array<i64: 8, 8>}, {pipeline_mode = #tpu.pipeline_mode<synchronous>, transform_indices = @transform_11, window_bounds = array<i64: 8, 8>}, {pipeline_mode = #tpu.pipeline_mode<synchronous>, transform_indices = @transform_12, window_bounds = array<i64: 8, 8>}, {pipeline_mode = #tpu.pipeline_mode<synchronous>, transform_indices = @transform_13, window_bounds = array<i64: 32, 32>}, {pipeline_mode = #tpu.pipeline_mode<synchronous>, transform_indices = @transform_14, window_bounds = array<i64: 1, 32>}, {pipeline_mode = #tpu.pipeline_mode<synchronous>, transform_indices = @transform_15, window_bounds = array<i64: 1, 32>}, {pipeline_mode = #tpu.pipeline_mode<synchronous>, transform_indices = @transform_16, window_bounds = array<i64: 1, 32>}, {pipeline_mode = #tpu.pipeline_mode<synchronous>, transform_indices = @transform_17, window_bounds = array<i64: 32, 128>}, {pipeline_mode = #tpu.pipeline_mode<synchronous>, transform_indices = @transform_18, window_bounds = array<i64: 1, 128>}, {pipeline_mode = #tpu.pipeline_mode<synchronous>, transform_indices = @transform_19, window_bounds = array<i64: 128, 32>}, {pipeline_mode = #tpu.pipeline_mode<synchronous>, transform_indices = @transform_20, window_bounds = array<i64: 1, 32>}, {pipeline_mode = #tpu.pipeline_mode<synchronous>, transform_indices = @transform_21, window_bounds = array<i64: 1, 32>}, {pipeline_mode = #tpu.pipeline_mode<synchronous>, transform_indices = @transform_22, window_bounds = array<i64: 1, 32>}, {transform_indices = @transform_23, window_bounds = array<i64: 1, 8, 32>}]} {
    %c0 = arith.constant 0 : index
    %c0_0 = arith.constant 0 : index
    %c0_1 = arith.constant 0 : index
    %0 = vector.load %arg1[%c0, %c0_0, %c0_1] : memref<1x8x32xf32, #tpu.memory_space<vmem>>, vector<1x8x32xf32>
    %1 = vector.shape_cast %0 : vector<1x8x32xf32> to vector<8x32xf32>
    %c0_2 = arith.constant 0 : index
    %c0_3 = arith.constant 0 : index
    %c0_4 = arith.constant 0 : index
    %2 = vector.load %arg2[%c0_2, %c0_3, %c0_4] : memref<1x8x32xf32, #tpu.memory_space<vmem>>, vector<1x8x32xf32>
    %3 = vector.shape_cast %2 : vector<1x8x32xf32> to vector<8x32xf32>
    %c0_5 = arith.constant 0 : index
    %c0_6 = arith.constant 0 : index
    %c0_7 = arith.constant 0 : index
    %4 = vector.load %arg3[%c0_5, %c0_6, %c0_7] : memref<1x1x8xf32, #tpu.memory_space<vmem>>, vector<1x1x8xf32>
    %5 = vector.shape_cast %4 : vector<1x1x8xf32> to vector<1x8xf32>
    %6 = arith.truncf %1 : vector<8x32xf32> to vector<8x32xbf16>
    %c0_8 = arith.constant 0 : index
    %c0_9 = arith.constant 0 : index
    %7 = vector.load %arg4[%c0_8, %c0_9] : memref<8x8xbf16, #tpu.memory_space<vmem>>, vector<8x8xbf16>
    %c0_10 = arith.constant 0 : index
    %c0_11 = arith.constant 0 : index
    %8 = vector.load %arg5[%c0_10, %c0_11] : memref<8x8xbf16, #tpu.memory_space<vmem>>, vector<8x8xbf16>
    %c0_12 = arith.constant 0 : index
    %c0_13 = arith.constant 0 : index
    %9 = vector.load %arg6[%c0_12, %c0_13] : memref<8x8xbf16, #tpu.memory_space<vmem>>, vector<8x8xbf16>
    %c0_14 = arith.constant 0 : index
    %c0_15 = arith.constant 0 : index
    %10 = vector.load %arg7[%c0_14, %c0_15] : memref<32x32xbf16, #tpu.memory_space<vmem>>, vector<32x32xbf16>
    %c0_16 = arith.constant 0 : index
    %c0_17 = arith.constant 0 : index
    %11 = vector.load %arg8[%c0_16, %c0_17] : memref<1x32xf32, #tpu.memory_space<vmem>>, vector<1x32xf32>
    %12 = tpu.iota {dimensions = array<i32: 0>} : vector<8x8xi32>
    %13 = tpu.iota {dimensions = array<i32: 1>} : vector<8x8xi32>
    %14 = arith.cmpi sgt, %13, %12 : vector<8x8xi32>
    %cst = arith.constant 0.000000e+00 : f32
    %15 = vector.broadcast %cst : f32 to vector<8x32xf32>
    %16 = vector.extract_strided_slice %6 {offsets = [0, 0], sizes = [8, 8], strides = [1, 1]} : vector<8x32xbf16> to vector<8x8xbf16>
    %cst_18 = arith.constant dense<0.000000e+00> : vector<8x8xf32>
    %17 = tpu.matmul %16, %7, %cst_18 {dimension_numbers = #tpu.dot_dimension_numbers<[1], [0], [0], [1], [0, 0, 1, 1], [], []>} : vector<8x8xbf16>, vector<8x8xbf16>, vector<8x8xf32> -> vector<8x8xf32>
    %18 = vector.extract_strided_slice %6 {offsets = [0, 0], sizes = [8, 8], strides = [1, 1]} : vector<8x32xbf16> to vector<8x8xbf16>
    %cst_19 = arith.constant dense<0.000000e+00> : vector<8x8xf32>
    %19 = tpu.matmul %18, %8, %cst_19 {dimension_numbers = #tpu.dot_dimension_numbers<[1], [0], [0], [1], [0, 0, 1, 1], [], []>} : vector<8x8xbf16>, vector<8x8xbf16>, vector<8x8xf32> -> vector<8x8xf32>
    %20 = vector.extract_strided_slice %6 {offsets = [0, 0], sizes = [8, 8], strides = [1, 1]} : vector<8x32xbf16> to vector<8x8xbf16>
    %cst_20 = arith.constant dense<0.000000e+00> : vector<8x8xf32>
    %21 = tpu.matmul %20, %9, %cst_20 {dimension_numbers = #tpu.dot_dimension_numbers<[1], [0], [0], [1], [0, 0, 1, 1], [], []>} : vector<8x8xbf16>, vector<8x8xbf16>, vector<8x8xf32> -> vector<8x8xf32>
    %22 = arith.truncf %17 : vector<8x8xf32> to vector<8x8xbf16>
    %23 = arith.truncf %19 : vector<8x8xf32> to vector<8x8xbf16>
    %cst_21 = arith.constant dense<0.000000e+00> : vector<8x8xf32>
    %24 = tpu.matmul %22, %23, %cst_21 {dimension_numbers = #tpu.dot_dimension_numbers<[1], [1], [0], [0], [0, 0, 1, 0], [], []>} : vector<8x8xbf16>, vector<8x8xbf16>, vector<8x8xf32> -> vector<8x8xf32>
    %cst_22 = arith.constant -1.000000e+20 : f32
    %25 = vector.broadcast %cst_22 : f32 to vector<8x8xf32>
    %26 = arith.select %14, %25, %24 : vector<8x8xi1>, vector<8x8xf32>
    %cst_23 = arith.constant 0.176776692 : f32
    %27 = vector.broadcast %cst_23 : f32 to vector<8x8xf32>
    %28 = arith.mulf %26, %27 : vector<8x8xf32>
    %cst_24 = arith.constant dense<0xFF800000> : vector<8xf32>
    %29 = vector.multi_reduction <maximumf>, %28, %cst_24 [1] : vector<8x8xf32> to vector<8xf32>
    %30 = vector.shape_cast %29 : vector<8xf32> to vector<8x1xf32>
    %31 = vector.broadcast %30 : vector<8x1xf32> to vector<8x8xf32>
    %32 = arith.subf %28, %31 : vector<8x8xf32>
    %33 = math.exp %32 : vector<8x8xf32>
    %cst_25 = arith.constant dense<0.000000e+00> : vector<8xf32>
    %34 = vector.multi_reduction <add>, %33, %cst_25 [1] : vector<8x8xf32> to vector<8xf32>
    %35 = vector.shape_cast %34 : vector<8xf32> to vector<8x1xf32>
    %36 = vector.broadcast %35 : vector<8x1xf32> to vector<8x8xf32>
    %37 = arith.divf %33, %36 : vector<8x8xf32>
    %38 = arith.truncf %37 : vector<8x8xf32> to vector<8x8xbf16>
    %39 = arith.truncf %21 : vector<8x8xf32> to vector<8x8xbf16>
    %cst_26 = arith.constant dense<0.000000e+00> : vector<8x8xf32>
    %40 = tpu.matmul %38, %39, %cst_26 {dimension_numbers = #tpu.dot_dimension_numbers<[1], [0], [0], [1], [0, 0, 1, 1], [], []>} : vector<8x8xbf16>, vector<8x8xbf16>, vector<8x8xf32> -> vector<8x8xf32>
    %41 = arith.truncf %40 : vector<8x8xf32> to vector<8x8xbf16>
    %42 = vector.extract_strided_slice %10 {offsets = [0, 0], sizes = [8, 32], strides = [1, 1]} : vector<32x32xbf16> to vector<8x32xbf16>
    %cst_27 = arith.constant dense<0.000000e+00> : vector<8x32xf32>
    %43 = tpu.matmul %41, %42, %cst_27 {dimension_numbers = #tpu.dot_dimension_numbers<[1], [0], [0], [1], [0, 0, 1, 1], [], []>} : vector<8x8xbf16>, vector<8x32xbf16>, vector<8x32xf32> -> vector<8x32xf32>
    %44 = arith.addf %15, %43 : vector<8x32xf32>
    %45 = vector.extract_strided_slice %6 {offsets = [0, 8], sizes = [8, 8], strides = [1, 1]} : vector<8x32xbf16> to vector<8x8xbf16>
    %cst_28 = arith.constant dense<0.000000e+00> : vector<8x8xf32>
    %46 = tpu.matmul %45, %7, %cst_28 {dimension_numbers = #tpu.dot_dimension_numbers<[1], [0], [0], [1], [0, 0, 1, 1], [], []>} : vector<8x8xbf16>, vector<8x8xbf16>, vector<8x8xf32> -> vector<8x8xf32>
    %47 = vector.extract_strided_slice %6 {offsets = [0, 8], sizes = [8, 8], strides = [1, 1]} : vector<8x32xbf16> to vector<8x8xbf16>
    %cst_29 = arith.constant dense<0.000000e+00> : vector<8x8xf32>
    %48 = tpu.matmul %47, %8, %cst_29 {dimension_numbers = #tpu.dot_dimension_numbers<[1], [0], [0], [1], [0, 0, 1, 1], [], []>} : vector<8x8xbf16>, vector<8x8xbf16>, vector<8x8xf32> -> vector<8x8xf32>
    %49 = vector.extract_strided_slice %6 {offsets = [0, 8], sizes = [8, 8], strides = [1, 1]} : vector<8x32xbf16> to vector<8x8xbf16>
    %cst_30 = arith.constant dense<0.000000e+00> : vector<8x8xf32>
    %50 = tpu.matmul %49, %9, %cst_30 {dimension_numbers = #tpu.dot_dimension_numbers<[1], [0], [0], [1], [0, 0, 1, 1], [], []>} : vector<8x8xbf16>, vector<8x8xbf16>, vector<8x8xf32> -> vector<8x8xf32>
    %51 = arith.truncf %46 : vector<8x8xf32> to vector<8x8xbf16>
    %52 = arith.truncf %48 : vector<8x8xf32> to vector<8x8xbf16>
    %cst_31 = arith.constant dense<0.000000e+00> : vector<8x8xf32>
    %53 = tpu.matmul %51, %52, %cst_31 {dimension_numbers = #tpu.dot_dimension_numbers<[1], [1], [0], [0], [0, 0, 1, 0], [], []>} : vector<8x8xbf16>, vector<8x8xbf16>, vector<8x8xf32> -> vector<8x8xf32>
    %cst_32 = arith.constant -1.000000e+20 : f32
    %54 = vector.broadcast %cst_32 : f32 to vector<8x8xf32>
    %55 = arith.select %14, %54, %53 : vector<8x8xi1>, vector<8x8xf32>
    %cst_33 = arith.constant 0.176776692 : f32
    %56 = vector.broadcast %cst_33 : f32 to vector<8x8xf32>
    %57 = arith.mulf %55, %56 : vector<8x8xf32>
    %cst_34 = arith.constant dense<0xFF800000> : vector<8xf32>
    %58 = vector.multi_reduction <maximumf>, %57, %cst_34 [1] : vector<8x8xf32> to vector<8xf32>
    %59 = vector.shape_cast %58 : vector<8xf32> to vector<8x1xf32>
    %60 = vector.broadcast %59 : vector<8x1xf32> to vector<8x8xf32>
    %61 = arith.subf %57, %60 : vector<8x8xf32>
    %62 = math.exp %61 : vector<8x8xf32>
    %cst_35 = arith.constant dense<0.000000e+00> : vector<8xf32>
    %63 = vector.multi_reduction <add>, %62, %cst_35 [1] : vector<8x8xf32> to vector<8xf32>
    %64 = vector.shape_cast %63 : vector<8xf32> to vector<8x1xf32>
    %65 = vector.broadcast %64 : vector<8x1xf32> to vector<8x8xf32>
    %66 = arith.divf %62, %65 : vector<8x8xf32>
    %67 = arith.truncf %66 : vector<8x8xf32> to vector<8x8xbf16>
    %68 = arith.truncf %50 : vector<8x8xf32> to vector<8x8xbf16>
    %cst_36 = arith.constant dense<0.000000e+00> : vector<8x8xf32>
    %69 = tpu.matmul %67, %68, %cst_36 {dimension_numbers = #tpu.dot_dimension_numbers<[1], [0], [0], [1], [0, 0, 1, 1], [], []>} : vector<8x8xbf16>, vector<8x8xbf16>, vector<8x8xf32> -> vector<8x8xf32>
    %70 = arith.truncf %69 : vector<8x8xf32> to vector<8x8xbf16>
    %71 = vector.extract_strided_slice %10 {offsets = [8, 0], sizes = [8, 32], strides = [1, 1]} : vector<32x32xbf16> to vector<8x32xbf16>
    %cst_37 = arith.constant dense<0.000000e+00> : vector<8x32xf32>
    %72 = tpu.matmul %70, %71, %cst_37 {dimension_numbers = #tpu.dot_dimension_numbers<[1], [0], [0], [1], [0, 0, 1, 1], [], []>} : vector<8x8xbf16>, vector<8x32xbf16>, vector<8x32xf32> -> vector<8x32xf32>
    %73 = arith.addf %44, %72 : vector<8x32xf32>
    %74 = vector.extract_strided_slice %6 {offsets = [0, 16], sizes = [8, 8], strides = [1, 1]} : vector<8x32xbf16> to vector<8x8xbf16>
    %cst_38 = arith.constant dense<0.000000e+00> : vector<8x8xf32>
    %75 = tpu.matmul %74, %7, %cst_38 {dimension_numbers = #tpu.dot_dimension_numbers<[1], [0], [0], [1], [0, 0, 1, 1], [], []>} : vector<8x8xbf16>, vector<8x8xbf16>, vector<8x8xf32> -> vector<8x8xf32>
    %76 = vector.extract_strided_slice %6 {offsets = [0, 16], sizes = [8, 8], strides = [1, 1]} : vector<8x32xbf16> to vector<8x8xbf16>
    %cst_39 = arith.constant dense<0.000000e+00> : vector<8x8xf32>
    %77 = tpu.matmul %76, %8, %cst_39 {dimension_numbers = #tpu.dot_dimension_numbers<[1], [0], [0], [1], [0, 0, 1, 1], [], []>} : vector<8x8xbf16>, vector<8x8xbf16>, vector<8x8xf32> -> vector<8x8xf32>
    %78 = vector.extract_strided_slice %6 {offsets = [0, 16], sizes = [8, 8], strides = [1, 1]} : vector<8x32xbf16> to vector<8x8xbf16>
    %cst_40 = arith.constant dense<0.000000e+00> : vector<8x8xf32>
    %79 = tpu.matmul %78, %9, %cst_40 {dimension_numbers = #tpu.dot_dimension_numbers<[1], [0], [0], [1], [0, 0, 1, 1], [], []>} : vector<8x8xbf16>, vector<8x8xbf16>, vector<8x8xf32> -> vector<8x8xf32>
    %80 = arith.truncf %75 : vector<8x8xf32> to vector<8x8xbf16>
    %81 = arith.truncf %77 : vector<8x8xf32> to vector<8x8xbf16>
    %cst_41 = arith.constant dense<0.000000e+00> : vector<8x8xf32>
    %82 = tpu.matmul %80, %81, %cst_41 {dimension_numbers = #tpu.dot_dimension_numbers<[1], [1], [0], [0], [0, 0, 1, 0], [], []>} : vector<8x8xbf16>, vector<8x8xbf16>, vector<8x8xf32> -> vector<8x8xf32>
    %cst_42 = arith.constant -1.000000e+20 : f32
    %83 = vector.broadcast %cst_42 : f32 to vector<8x8xf32>
    %84 = arith.select %14, %83, %82 : vector<8x8xi1>, vector<8x8xf32>
    %cst_43 = arith.constant 0.176776692 : f32
    %85 = vector.broadcast %cst_43 : f32 to vector<8x8xf32>
    %86 = arith.mulf %84, %85 : vector<8x8xf32>
    %cst_44 = arith.constant dense<0xFF800000> : vector<8xf32>
    %87 = vector.multi_reduction <maximumf>, %86, %cst_44 [1] : vector<8x8xf32> to vector<8xf32>
    %88 = vector.shape_cast %87 : vector<8xf32> to vector<8x1xf32>
    %89 = vector.broadcast %88 : vector<8x1xf32> to vector<8x8xf32>
    %90 = arith.subf %86, %89 : vector<8x8xf32>
    %91 = math.exp %90 : vector<8x8xf32>
    %cst_45 = arith.constant dense<0.000000e+00> : vector<8xf32>
    %92 = vector.multi_reduction <add>, %91, %cst_45 [1] : vector<8x8xf32> to vector<8xf32>
    %93 = vector.shape_cast %92 : vector<8xf32> to vector<8x1xf32>
    %94 = vector.broadcast %93 : vector<8x1xf32> to vector<8x8xf32>
    %95 = arith.divf %91, %94 : vector<8x8xf32>
    %96 = arith.truncf %95 : vector<8x8xf32> to vector<8x8xbf16>
    %97 = arith.truncf %79 : vector<8x8xf32> to vector<8x8xbf16>
    %cst_46 = arith.constant dense<0.000000e+00> : vector<8x8xf32>
    %98 = tpu.matmul %96, %97, %cst_46 {dimension_numbers = #tpu.dot_dimension_numbers<[1], [0], [0], [1], [0, 0, 1, 1], [], []>} : vector<8x8xbf16>, vector<8x8xbf16>, vector<8x8xf32> -> vector<8x8xf32>
    %99 = arith.truncf %98 : vector<8x8xf32> to vector<8x8xbf16>
    %100 = vector.extract_strided_slice %10 {offsets = [16, 0], sizes = [8, 32], strides = [1, 1]} : vector<32x32xbf16> to vector<8x32xbf16>
    %cst_47 = arith.constant dense<0.000000e+00> : vector<8x32xf32>
    %101 = tpu.matmul %99, %100, %cst_47 {dimension_numbers = #tpu.dot_dimension_numbers<[1], [0], [0], [1], [0, 0, 1, 1], [], []>} : vector<8x8xbf16>, vector<8x32xbf16>, vector<8x32xf32> -> vector<8x32xf32>
    %102 = arith.addf %73, %101 : vector<8x32xf32>
    %103 = vector.extract_strided_slice %6 {offsets = [0, 24], sizes = [8, 8], strides = [1, 1]} : vector<8x32xbf16> to vector<8x8xbf16>
    %cst_48 = arith.constant dense<0.000000e+00> : vector<8x8xf32>
    %104 = tpu.matmul %103, %7, %cst_48 {dimension_numbers = #tpu.dot_dimension_numbers<[1], [0], [0], [1], [0, 0, 1, 1], [], []>} : vector<8x8xbf16>, vector<8x8xbf16>, vector<8x8xf32> -> vector<8x8xf32>
    %105 = vector.extract_strided_slice %6 {offsets = [0, 24], sizes = [8, 8], strides = [1, 1]} : vector<8x32xbf16> to vector<8x8xbf16>
    %cst_49 = arith.constant dense<0.000000e+00> : vector<8x8xf32>
    %106 = tpu.matmul %105, %8, %cst_49 {dimension_numbers = #tpu.dot_dimension_numbers<[1], [0], [0], [1], [0, 0, 1, 1], [], []>} : vector<8x8xbf16>, vector<8x8xbf16>, vector<8x8xf32> -> vector<8x8xf32>
    %107 = vector.extract_strided_slice %6 {offsets = [0, 24], sizes = [8, 8], strides = [1, 1]} : vector<8x32xbf16> to vector<8x8xbf16>
    %cst_50 = arith.constant dense<0.000000e+00> : vector<8x8xf32>
    %108 = tpu.matmul %107, %9, %cst_50 {dimension_numbers = #tpu.dot_dimension_numbers<[1], [0], [0], [1], [0, 0, 1, 1], [], []>} : vector<8x8xbf16>, vector<8x8xbf16>, vector<8x8xf32> -> vector<8x8xf32>
    %109 = arith.truncf %104 : vector<8x8xf32> to vector<8x8xbf16>
    %110 = arith.truncf %106 : vector<8x8xf32> to vector<8x8xbf16>
    %cst_51 = arith.constant dense<0.000000e+00> : vector<8x8xf32>
    %111 = tpu.matmul %109, %110, %cst_51 {dimension_numbers = #tpu.dot_dimension_numbers<[1], [1], [0], [0], [0, 0, 1, 0], [], []>} : vector<8x8xbf16>, vector<8x8xbf16>, vector<8x8xf32> -> vector<8x8xf32>
    %cst_52 = arith.constant -1.000000e+20 : f32
    %112 = vector.broadcast %cst_52 : f32 to vector<8x8xf32>
    %113 = arith.select %14, %112, %111 : vector<8x8xi1>, vector<8x8xf32>
    %cst_53 = arith.constant 0.176776692 : f32
    %114 = vector.broadcast %cst_53 : f32 to vector<8x8xf32>
    %115 = arith.mulf %113, %114 : vector<8x8xf32>
    %cst_54 = arith.constant dense<0xFF800000> : vector<8xf32>
    %116 = vector.multi_reduction <maximumf>, %115, %cst_54 [1] : vector<8x8xf32> to vector<8xf32>
    %117 = vector.shape_cast %116 : vector<8xf32> to vector<8x1xf32>
    %118 = vector.broadcast %117 : vector<8x1xf32> to vector<8x8xf32>
    %119 = arith.subf %115, %118 : vector<8x8xf32>
    %120 = math.exp %119 : vector<8x8xf32>
    %cst_55 = arith.constant dense<0.000000e+00> : vector<8xf32>
    %121 = vector.multi_reduction <add>, %120, %cst_55 [1] : vector<8x8xf32> to vector<8xf32>
    %122 = vector.shape_cast %121 : vector<8xf32> to vector<8x1xf32>
    %123 = vector.broadcast %122 : vector<8x1xf32> to vector<8x8xf32>
    %124 = arith.divf %120, %123 : vector<8x8xf32>
    %125 = arith.truncf %124 : vector<8x8xf32> to vector<8x8xbf16>
    %126 = arith.truncf %108 : vector<8x8xf32> to vector<8x8xbf16>
    %cst_56 = arith.constant dense<0.000000e+00> : vector<8x8xf32>
    %127 = tpu.matmul %125, %126, %cst_56 {dimension_numbers = #tpu.dot_dimension_numbers<[1], [0], [0], [1], [0, 0, 1, 1], [], []>} : vector<8x8xbf16>, vector<8x8xbf16>, vector<8x8xf32> -> vector<8x8xf32>
    %128 = arith.truncf %127 : vector<8x8xf32> to vector<8x8xbf16>
    %129 = vector.extract_strided_slice %10 {offsets = [24, 0], sizes = [8, 32], strides = [1, 1]} : vector<32x32xbf16> to vector<8x32xbf16>
    %cst_57 = arith.constant dense<0.000000e+00> : vector<8x32xf32>
    %130 = tpu.matmul %128, %129, %cst_57 {dimension_numbers = #tpu.dot_dimension_numbers<[1], [0], [0], [1], [0, 0, 1, 1], [], []>} : vector<8x8xbf16>, vector<8x32xbf16>, vector<8x32xf32> -> vector<8x32xf32>
    %131 = arith.addf %102, %130 : vector<8x32xf32>
    %132 = vector.broadcast %11 : vector<1x32xf32> to vector<8x32xf32>
    %133 = arith.addf %131, %132 : vector<8x32xf32>
    %134 = arith.addf %133, %1 : vector<8x32xf32>
    %c0_58 = arith.constant 0 : index
    %c0_59 = arith.constant 0 : index
    %135 = vector.load %arg9[%c0_58, %c0_59] : memref<1x32xf32, #tpu.memory_space<vmem>>, vector<1x32xf32>
    %c0_60 = arith.constant 0 : index
    %c0_61 = arith.constant 0 : index
    %136 = vector.load %arg10[%c0_60, %c0_61] : memref<1x32xf32, #tpu.memory_space<vmem>>, vector<1x32xf32>
    %cst_62 = arith.constant dense<0.000000e+00> : vector<8xf32>
    %137 = vector.multi_reduction <add>, %134, %cst_62 [1] : vector<8x32xf32> to vector<8xf32>
    %138 = vector.shape_cast %137 : vector<8xf32> to vector<8x1xf32>
    %cst_63 = arith.constant 3.200000e+01 : f32
    %139 = vector.broadcast %cst_63 : f32 to vector<8x1xf32>
    %140 = arith.divf %138, %139 : vector<8x1xf32>
    %141 = vector.broadcast %140 : vector<8x1xf32> to vector<8x32xf32>
    %142 = arith.subf %134, %141 : vector<8x32xf32>
    %143 = arith.mulf %142, %142 : vector<8x32xf32>
    %cst_64 = arith.constant dense<0.000000e+00> : vector<8xf32>
    %144 = vector.multi_reduction <add>, %143, %cst_64 [1] : vector<8x32xf32> to vector<8xf32>
    %145 = vector.shape_cast %144 : vector<8xf32> to vector<8x1xf32>
    %cst_65 = arith.constant 3.200000e+01 : f32
    %146 = vector.broadcast %cst_65 : f32 to vector<8x1xf32>
    %147 = arith.divf %145, %146 : vector<8x1xf32>
    %cst_66 = arith.constant 9.99999974E-6 : f32
    %148 = vector.broadcast %cst_66 : f32 to vector<8x1xf32>
    %149 = arith.addf %147, %148 : vector<8x1xf32>
    %150 = math.rsqrt %149 : vector<8x1xf32>
    %151 = vector.broadcast %150 : vector<8x1xf32> to vector<8x32xf32>
    %152 = arith.mulf %142, %151 : vector<8x32xf32>
    %153 = vector.broadcast %135 : vector<1x32xf32> to vector<8x32xf32>
    %154 = arith.mulf %152, %153 : vector<8x32xf32>
    %155 = vector.broadcast %136 : vector<1x32xf32> to vector<8x32xf32>
    %156 = arith.addf %154, %155 : vector<8x32xf32>
    %157 = arith.truncf %3 : vector<8x32xf32> to vector<8x32xbf16>
    %158 = arith.truncf %156 : vector<8x32xf32> to vector<8x32xbf16>
    %c0_67 = arith.constant 0 : index
    %c0_68 = arith.constant 0 : index
    %159 = vector.load %arg11[%c0_67, %c0_68] : memref<8x8xbf16, #tpu.memory_space<vmem>>, vector<8x8xbf16>
    %c0_69 = arith.constant 0 : index
    %c0_70 = arith.constant 0 : index
    %160 = vector.load %arg12[%c0_69, %c0_70] : memref<8x8xbf16, #tpu.memory_space<vmem>>, vector<8x8xbf16>
    %c0_71 = arith.constant 0 : index
    %c0_72 = arith.constant 0 : index
    %161 = vector.load %arg13[%c0_71, %c0_72] : memref<8x8xbf16, #tpu.memory_space<vmem>>, vector<8x8xbf16>
    %c0_73 = arith.constant 0 : index
    %c0_74 = arith.constant 0 : index
    %162 = vector.load %arg14[%c0_73, %c0_74] : memref<32x32xbf16, #tpu.memory_space<vmem>>, vector<32x32xbf16>
    %c0_75 = arith.constant 0 : index
    %c0_76 = arith.constant 0 : index
    %163 = vector.load %arg15[%c0_75, %c0_76] : memref<1x32xf32, #tpu.memory_space<vmem>>, vector<1x32xf32>
    %cst_77 = arith.constant 0.000000e+00 : f32
    %164 = vector.broadcast %cst_77 : f32 to vector<1x8xf32>
    %165 = arith.cmpf oeq, %5, %164 : vector<1x8xf32>
    %cst_78 = arith.constant 0.000000e+00 : f32
    %166 = vector.broadcast %cst_78 : f32 to vector<8x32xf32>
    %167 = vector.extract_strided_slice %157 {offsets = [0, 0], sizes = [8, 8], strides = [1, 1]} : vector<8x32xbf16> to vector<8x8xbf16>
    %cst_79 = arith.constant dense<0.000000e+00> : vector<8x8xf32>
    %168 = tpu.matmul %167, %159, %cst_79 {dimension_numbers = #tpu.dot_dimension_numbers<[1], [0], [0], [1], [0, 0, 1, 1], [], []>} : vector<8x8xbf16>, vector<8x8xbf16>, vector<8x8xf32> -> vector<8x8xf32>
    %169 = vector.extract_strided_slice %158 {offsets = [0, 0], sizes = [8, 8], strides = [1, 1]} : vector<8x32xbf16> to vector<8x8xbf16>
    %cst_80 = arith.constant dense<0.000000e+00> : vector<8x8xf32>
    %170 = tpu.matmul %169, %160, %cst_80 {dimension_numbers = #tpu.dot_dimension_numbers<[1], [0], [0], [1], [0, 0, 1, 1], [], []>} : vector<8x8xbf16>, vector<8x8xbf16>, vector<8x8xf32> -> vector<8x8xf32>
    %171 = vector.extract_strided_slice %157 {offsets = [0, 0], sizes = [8, 8], strides = [1, 1]} : vector<8x32xbf16> to vector<8x8xbf16>
    %cst_81 = arith.constant dense<0.000000e+00> : vector<8x8xf32>
    %172 = tpu.matmul %171, %161, %cst_81 {dimension_numbers = #tpu.dot_dimension_numbers<[1], [0], [0], [1], [0, 0, 1, 1], [], []>} : vector<8x8xbf16>, vector<8x8xbf16>, vector<8x8xf32> -> vector<8x8xf32>
    %173 = arith.truncf %168 : vector<8x8xf32> to vector<8x8xbf16>
    %174 = arith.truncf %170 : vector<8x8xf32> to vector<8x8xbf16>
    %cst_82 = arith.constant dense<0.000000e+00> : vector<8x8xf32>
    %175 = tpu.matmul %173, %174, %cst_82 {dimension_numbers = #tpu.dot_dimension_numbers<[1], [1], [0], [0], [0, 0, 1, 0], [], []>} : vector<8x8xbf16>, vector<8x8xbf16>, vector<8x8xf32> -> vector<8x8xf32>
    %cst_83 = arith.constant -1.000000e+20 : f32
    %176 = vector.shape_cast %165 : vector<1x8xi1> to vector<1x8xi1>
    %177 = vector.broadcast %176 : vector<1x8xi1> to vector<8x8xi1>
    %178 = vector.broadcast %cst_83 : f32 to vector<8x8xf32>
    %179 = arith.select %177, %178, %175 : vector<8x8xi1>, vector<8x8xf32>
    %cst_84 = arith.constant 0.176776692 : f32
    %180 = vector.broadcast %cst_84 : f32 to vector<8x8xf32>
    %181 = arith.mulf %179, %180 : vector<8x8xf32>
    %cst_85 = arith.constant dense<0xFF800000> : vector<8xf32>
    %182 = vector.multi_reduction <maximumf>, %181, %cst_85 [1] : vector<8x8xf32> to vector<8xf32>
    %183 = vector.shape_cast %182 : vector<8xf32> to vector<8x1xf32>
    %184 = vector.broadcast %183 : vector<8x1xf32> to vector<8x8xf32>
    %185 = arith.subf %181, %184 : vector<8x8xf32>
    %186 = math.exp %185 : vector<8x8xf32>
    %cst_86 = arith.constant dense<0.000000e+00> : vector<8xf32>
    %187 = vector.multi_reduction <add>, %186, %cst_86 [1] : vector<8x8xf32> to vector<8xf32>
    %188 = vector.shape_cast %187 : vector<8xf32> to vector<8x1xf32>
    %189 = vector.broadcast %188 : vector<8x1xf32> to vector<8x8xf32>
    %190 = arith.divf %186, %189 : vector<8x8xf32>
    %191 = arith.truncf %190 : vector<8x8xf32> to vector<8x8xbf16>
    %192 = arith.truncf %172 : vector<8x8xf32> to vector<8x8xbf16>
    %cst_87 = arith.constant dense<0.000000e+00> : vector<8x8xf32>
    %193 = tpu.matmul %191, %192, %cst_87 {dimension_numbers = #tpu.dot_dimension_numbers<[1], [0], [0], [1], [0, 0, 1, 1], [], []>} : vector<8x8xbf16>, vector<8x8xbf16>, vector<8x8xf32> -> vector<8x8xf32>
    %194 = arith.truncf %193 : vector<8x8xf32> to vector<8x8xbf16>
    %195 = vector.extract_strided_slice %162 {offsets = [0, 0], sizes = [8, 32], strides = [1, 1]} : vector<32x32xbf16> to vector<8x32xbf16>
    %cst_88 = arith.constant dense<0.000000e+00> : vector<8x32xf32>
    %196 = tpu.matmul %194, %195, %cst_88 {dimension_numbers = #tpu.dot_dimension_numbers<[1], [0], [0], [1], [0, 0, 1, 1], [], []>} : vector<8x8xbf16>, vector<8x32xbf16>, vector<8x32xf32> -> vector<8x32xf32>
    %197 = arith.addf %166, %196 : vector<8x32xf32>
    %198 = vector.extract_strided_slice %157 {offsets = [0, 8], sizes = [8, 8], strides = [1, 1]} : vector<8x32xbf16> to vector<8x8xbf16>
    %cst_89 = arith.constant dense<0.000000e+00> : vector<8x8xf32>
    %199 = tpu.matmul %198, %159, %cst_89 {dimension_numbers = #tpu.dot_dimension_numbers<[1], [0], [0], [1], [0, 0, 1, 1], [], []>} : vector<8x8xbf16>, vector<8x8xbf16>, vector<8x8xf32> -> vector<8x8xf32>
    %200 = vector.extract_strided_slice %158 {offsets = [0, 8], sizes = [8, 8], strides = [1, 1]} : vector<8x32xbf16> to vector<8x8xbf16>
    %cst_90 = arith.constant dense<0.000000e+00> : vector<8x8xf32>
    %201 = tpu.matmul %200, %160, %cst_90 {dimension_numbers = #tpu.dot_dimension_numbers<[1], [0], [0], [1], [0, 0, 1, 1], [], []>} : vector<8x8xbf16>, vector<8x8xbf16>, vector<8x8xf32> -> vector<8x8xf32>
    %202 = vector.extract_strided_slice %157 {offsets = [0, 8], sizes = [8, 8], strides = [1, 1]} : vector<8x32xbf16> to vector<8x8xbf16>
    %cst_91 = arith.constant dense<0.000000e+00> : vector<8x8xf32>
    %203 = tpu.matmul %202, %161, %cst_91 {dimension_numbers = #tpu.dot_dimension_numbers<[1], [0], [0], [1], [0, 0, 1, 1], [], []>} : vector<8x8xbf16>, vector<8x8xbf16>, vector<8x8xf32> -> vector<8x8xf32>
    %204 = arith.truncf %199 : vector<8x8xf32> to vector<8x8xbf16>
    %205 = arith.truncf %201 : vector<8x8xf32> to vector<8x8xbf16>
    %cst_92 = arith.constant dense<0.000000e+00> : vector<8x8xf32>
    %206 = tpu.matmul %204, %205, %cst_92 {dimension_numbers = #tpu.dot_dimension_numbers<[1], [1], [0], [0], [0, 0, 1, 0], [], []>} : vector<8x8xbf16>, vector<8x8xbf16>, vector<8x8xf32> -> vector<8x8xf32>
    %cst_93 = arith.constant -1.000000e+20 : f32
    %207 = vector.shape_cast %165 : vector<1x8xi1> to vector<1x8xi1>
    %208 = vector.broadcast %207 : vector<1x8xi1> to vector<8x8xi1>
    %209 = vector.broadcast %cst_93 : f32 to vector<8x8xf32>
    %210 = arith.select %208, %209, %206 : vector<8x8xi1>, vector<8x8xf32>
    %cst_94 = arith.constant 0.176776692 : f32
    %211 = vector.broadcast %cst_94 : f32 to vector<8x8xf32>
    %212 = arith.mulf %210, %211 : vector<8x8xf32>
    %cst_95 = arith.constant dense<0xFF800000> : vector<8xf32>
    %213 = vector.multi_reduction <maximumf>, %212, %cst_95 [1] : vector<8x8xf32> to vector<8xf32>
    %214 = vector.shape_cast %213 : vector<8xf32> to vector<8x1xf32>
    %215 = vector.broadcast %214 : vector<8x1xf32> to vector<8x8xf32>
    %216 = arith.subf %212, %215 : vector<8x8xf32>
    %217 = math.exp %216 : vector<8x8xf32>
    %cst_96 = arith.constant dense<0.000000e+00> : vector<8xf32>
    %218 = vector.multi_reduction <add>, %217, %cst_96 [1] : vector<8x8xf32> to vector<8xf32>
    %219 = vector.shape_cast %218 : vector<8xf32> to vector<8x1xf32>
    %220 = vector.broadcast %219 : vector<8x1xf32> to vector<8x8xf32>
    %221 = arith.divf %217, %220 : vector<8x8xf32>
    %222 = arith.truncf %221 : vector<8x8xf32> to vector<8x8xbf16>
    %223 = arith.truncf %203 : vector<8x8xf32> to vector<8x8xbf16>
    %cst_97 = arith.constant dense<0.000000e+00> : vector<8x8xf32>
    %224 = tpu.matmul %222, %223, %cst_97 {dimension_numbers = #tpu.dot_dimension_numbers<[1], [0], [0], [1], [0, 0, 1, 1], [], []>} : vector<8x8xbf16>, vector<8x8xbf16>, vector<8x8xf32> -> vector<8x8xf32>
    %225 = arith.truncf %224 : vector<8x8xf32> to vector<8x8xbf16>
    %226 = vector.extract_strided_slice %162 {offsets = [8, 0], sizes = [8, 32], strides = [1, 1]} : vector<32x32xbf16> to vector<8x32xbf16>
    %cst_98 = arith.constant dense<0.000000e+00> : vector<8x32xf32>
    %227 = tpu.matmul %225, %226, %cst_98 {dimension_numbers = #tpu.dot_dimension_numbers<[1], [0], [0], [1], [0, 0, 1, 1], [], []>} : vector<8x8xbf16>, vector<8x32xbf16>, vector<8x32xf32> -> vector<8x32xf32>
    %228 = arith.addf %197, %227 : vector<8x32xf32>
    %229 = vector.extract_strided_slice %157 {offsets = [0, 16], sizes = [8, 8], strides = [1, 1]} : vector<8x32xbf16> to vector<8x8xbf16>
    %cst_99 = arith.constant dense<0.000000e+00> : vector<8x8xf32>
    %230 = tpu.matmul %229, %159, %cst_99 {dimension_numbers = #tpu.dot_dimension_numbers<[1], [0], [0], [1], [0, 0, 1, 1], [], []>} : vector<8x8xbf16>, vector<8x8xbf16>, vector<8x8xf32> -> vector<8x8xf32>
    %231 = vector.extract_strided_slice %158 {offsets = [0, 16], sizes = [8, 8], strides = [1, 1]} : vector<8x32xbf16> to vector<8x8xbf16>
    %cst_100 = arith.constant dense<0.000000e+00> : vector<8x8xf32>
    %232 = tpu.matmul %231, %160, %cst_100 {dimension_numbers = #tpu.dot_dimension_numbers<[1], [0], [0], [1], [0, 0, 1, 1], [], []>} : vector<8x8xbf16>, vector<8x8xbf16>, vector<8x8xf32> -> vector<8x8xf32>
    %233 = vector.extract_strided_slice %157 {offsets = [0, 16], sizes = [8, 8], strides = [1, 1]} : vector<8x32xbf16> to vector<8x8xbf16>
    %cst_101 = arith.constant dense<0.000000e+00> : vector<8x8xf32>
    %234 = tpu.matmul %233, %161, %cst_101 {dimension_numbers = #tpu.dot_dimension_numbers<[1], [0], [0], [1], [0, 0, 1, 1], [], []>} : vector<8x8xbf16>, vector<8x8xbf16>, vector<8x8xf32> -> vector<8x8xf32>
    %235 = arith.truncf %230 : vector<8x8xf32> to vector<8x8xbf16>
    %236 = arith.truncf %232 : vector<8x8xf32> to vector<8x8xbf16>
    %cst_102 = arith.constant dense<0.000000e+00> : vector<8x8xf32>
    %237 = tpu.matmul %235, %236, %cst_102 {dimension_numbers = #tpu.dot_dimension_numbers<[1], [1], [0], [0], [0, 0, 1, 0], [], []>} : vector<8x8xbf16>, vector<8x8xbf16>, vector<8x8xf32> -> vector<8x8xf32>
    %cst_103 = arith.constant -1.000000e+20 : f32
    %238 = vector.shape_cast %165 : vector<1x8xi1> to vector<1x8xi1>
    %239 = vector.broadcast %238 : vector<1x8xi1> to vector<8x8xi1>
    %240 = vector.broadcast %cst_103 : f32 to vector<8x8xf32>
    %241 = arith.select %239, %240, %237 : vector<8x8xi1>, vector<8x8xf32>
    %cst_104 = arith.constant 0.176776692 : f32
    %242 = vector.broadcast %cst_104 : f32 to vector<8x8xf32>
    %243 = arith.mulf %241, %242 : vector<8x8xf32>
    %cst_105 = arith.constant dense<0xFF800000> : vector<8xf32>
    %244 = vector.multi_reduction <maximumf>, %243, %cst_105 [1] : vector<8x8xf32> to vector<8xf32>
    %245 = vector.shape_cast %244 : vector<8xf32> to vector<8x1xf32>
    %246 = vector.broadcast %245 : vector<8x1xf32> to vector<8x8xf32>
    %247 = arith.subf %243, %246 : vector<8x8xf32>
    %248 = math.exp %247 : vector<8x8xf32>
    %cst_106 = arith.constant dense<0.000000e+00> : vector<8xf32>
    %249 = vector.multi_reduction <add>, %248, %cst_106 [1] : vector<8x8xf32> to vector<8xf32>
    %250 = vector.shape_cast %249 : vector<8xf32> to vector<8x1xf32>
    %251 = vector.broadcast %250 : vector<8x1xf32> to vector<8x8xf32>
    %252 = arith.divf %248, %251 : vector<8x8xf32>
    %253 = arith.truncf %252 : vector<8x8xf32> to vector<8x8xbf16>
    %254 = arith.truncf %234 : vector<8x8xf32> to vector<8x8xbf16>
    %cst_107 = arith.constant dense<0.000000e+00> : vector<8x8xf32>
    %255 = tpu.matmul %253, %254, %cst_107 {dimension_numbers = #tpu.dot_dimension_numbers<[1], [0], [0], [1], [0, 0, 1, 1], [], []>} : vector<8x8xbf16>, vector<8x8xbf16>, vector<8x8xf32> -> vector<8x8xf32>
    %256 = arith.truncf %255 : vector<8x8xf32> to vector<8x8xbf16>
    %257 = vector.extract_strided_slice %162 {offsets = [16, 0], sizes = [8, 32], strides = [1, 1]} : vector<32x32xbf16> to vector<8x32xbf16>
    %cst_108 = arith.constant dense<0.000000e+00> : vector<8x32xf32>
    %258 = tpu.matmul %256, %257, %cst_108 {dimension_numbers = #tpu.dot_dimension_numbers<[1], [0], [0], [1], [0, 0, 1, 1], [], []>} : vector<8x8xbf16>, vector<8x32xbf16>, vector<8x32xf32> -> vector<8x32xf32>
    %259 = arith.addf %228, %258 : vector<8x32xf32>
    %260 = vector.extract_strided_slice %157 {offsets = [0, 24], sizes = [8, 8], strides = [1, 1]} : vector<8x32xbf16> to vector<8x8xbf16>
    %cst_109 = arith.constant dense<0.000000e+00> : vector<8x8xf32>
    %261 = tpu.matmul %260, %159, %cst_109 {dimension_numbers = #tpu.dot_dimension_numbers<[1], [0], [0], [1], [0, 0, 1, 1], [], []>} : vector<8x8xbf16>, vector<8x8xbf16>, vector<8x8xf32> -> vector<8x8xf32>
    %262 = vector.extract_strided_slice %158 {offsets = [0, 24], sizes = [8, 8], strides = [1, 1]} : vector<8x32xbf16> to vector<8x8xbf16>
    %cst_110 = arith.constant dense<0.000000e+00> : vector<8x8xf32>
    %263 = tpu.matmul %262, %160, %cst_110 {dimension_numbers = #tpu.dot_dimension_numbers<[1], [0], [0], [1], [0, 0, 1, 1], [], []>} : vector<8x8xbf16>, vector<8x8xbf16>, vector<8x8xf32> -> vector<8x8xf32>
    %264 = vector.extract_strided_slice %157 {offsets = [0, 24], sizes = [8, 8], strides = [1, 1]} : vector<8x32xbf16> to vector<8x8xbf16>
    %cst_111 = arith.constant dense<0.000000e+00> : vector<8x8xf32>
    %265 = tpu.matmul %264, %161, %cst_111 {dimension_numbers = #tpu.dot_dimension_numbers<[1], [0], [0], [1], [0, 0, 1, 1], [], []>} : vector<8x8xbf16>, vector<8x8xbf16>, vector<8x8xf32> -> vector<8x8xf32>
    %266 = arith.truncf %261 : vector<8x8xf32> to vector<8x8xbf16>
    %267 = arith.truncf %263 : vector<8x8xf32> to vector<8x8xbf16>
    %cst_112 = arith.constant dense<0.000000e+00> : vector<8x8xf32>
    %268 = tpu.matmul %266, %267, %cst_112 {dimension_numbers = #tpu.dot_dimension_numbers<[1], [1], [0], [0], [0, 0, 1, 0], [], []>} : vector<8x8xbf16>, vector<8x8xbf16>, vector<8x8xf32> -> vector<8x8xf32>
    %cst_113 = arith.constant -1.000000e+20 : f32
    %269 = vector.shape_cast %165 : vector<1x8xi1> to vector<1x8xi1>
    %270 = vector.broadcast %269 : vector<1x8xi1> to vector<8x8xi1>
    %271 = vector.broadcast %cst_113 : f32 to vector<8x8xf32>
    %272 = arith.select %270, %271, %268 : vector<8x8xi1>, vector<8x8xf32>
    %cst_114 = arith.constant 0.176776692 : f32
    %273 = vector.broadcast %cst_114 : f32 to vector<8x8xf32>
    %274 = arith.mulf %272, %273 : vector<8x8xf32>
    %cst_115 = arith.constant dense<0xFF800000> : vector<8xf32>
    %275 = vector.multi_reduction <maximumf>, %274, %cst_115 [1] : vector<8x8xf32> to vector<8xf32>
    %276 = vector.shape_cast %275 : vector<8xf32> to vector<8x1xf32>
    %277 = vector.broadcast %276 : vector<8x1xf32> to vector<8x8xf32>
    %278 = arith.subf %274, %277 : vector<8x8xf32>
    %279 = math.exp %278 : vector<8x8xf32>
    %cst_116 = arith.constant dense<0.000000e+00> : vector<8xf32>
    %280 = vector.multi_reduction <add>, %279, %cst_116 [1] : vector<8x8xf32> to vector<8xf32>
    %281 = vector.shape_cast %280 : vector<8xf32> to vector<8x1xf32>
    %282 = vector.broadcast %281 : vector<8x1xf32> to vector<8x8xf32>
    %283 = arith.divf %279, %282 : vector<8x8xf32>
    %284 = arith.truncf %283 : vector<8x8xf32> to vector<8x8xbf16>
    %285 = arith.truncf %265 : vector<8x8xf32> to vector<8x8xbf16>
    %cst_117 = arith.constant dense<0.000000e+00> : vector<8x8xf32>
    %286 = tpu.matmul %284, %285, %cst_117 {dimension_numbers = #tpu.dot_dimension_numbers<[1], [0], [0], [1], [0, 0, 1, 1], [], []>} : vector<8x8xbf16>, vector<8x8xbf16>, vector<8x8xf32> -> vector<8x8xf32>
    %287 = arith.truncf %286 : vector<8x8xf32> to vector<8x8xbf16>
    %288 = vector.extract_strided_slice %162 {offsets = [24, 0], sizes = [8, 32], strides = [1, 1]} : vector<32x32xbf16> to vector<8x32xbf16>
    %cst_118 = arith.constant dense<0.000000e+00> : vector<8x32xf32>
    %289 = tpu.matmul %287, %288, %cst_118 {dimension_numbers = #tpu.dot_dimension_numbers<[1], [0], [0], [1], [0, 0, 1, 1], [], []>} : vector<8x8xbf16>, vector<8x32xbf16>, vector<8x32xf32> -> vector<8x32xf32>
    %290 = arith.addf %259, %289 : vector<8x32xf32>
    %291 = vector.broadcast %163 : vector<1x32xf32> to vector<8x32xf32>
    %292 = arith.addf %290, %291 : vector<8x32xf32>
    %293 = arith.addf %292, %156 : vector<8x32xf32>
    %c0_119 = arith.constant 0 : index
    %c0_120 = arith.constant 0 : index
    %294 = vector.load %arg16[%c0_119, %c0_120] : memref<1x32xf32, #tpu.memory_space<vmem>>, vector<1x32xf32>
    %c0_121 = arith.constant 0 : index
    %c0_122 = arith.constant 0 : index
    %295 = vector.load %arg17[%c0_121, %c0_122] : memref<1x32xf32, #tpu.memory_space<vmem>>, vector<1x32xf32>
    %cst_123 = arith.constant dense<0.000000e+00> : vector<8xf32>
    %296 = vector.multi_reduction <add>, %293, %cst_123 [1] : vector<8x32xf32> to vector<8xf32>
    %297 = vector.shape_cast %296 : vector<8xf32> to vector<8x1xf32>
    %cst_124 = arith.constant 3.200000e+01 : f32
    %298 = vector.broadcast %cst_124 : f32 to vector<8x1xf32>
    %299 = arith.divf %297, %298 : vector<8x1xf32>
    %300 = vector.broadcast %299 : vector<8x1xf32> to vector<8x32xf32>
    %301 = arith.subf %293, %300 : vector<8x32xf32>
    %302 = arith.mulf %301, %301 : vector<8x32xf32>
    %cst_125 = arith.constant dense<0.000000e+00> : vector<8xf32>
    %303 = vector.multi_reduction <add>, %302, %cst_125 [1] : vector<8x32xf32> to vector<8xf32>
    %304 = vector.shape_cast %303 : vector<8xf32> to vector<8x1xf32>
    %cst_126 = arith.constant 3.200000e+01 : f32
    %305 = vector.broadcast %cst_126 : f32 to vector<8x1xf32>
    %306 = arith.divf %304, %305 : vector<8x1xf32>
    %cst_127 = arith.constant 9.99999974E-6 : f32
    %307 = vector.broadcast %cst_127 : f32 to vector<8x1xf32>
    %308 = arith.addf %306, %307 : vector<8x1xf32>
    %309 = math.rsqrt %308 : vector<8x1xf32>
    %310 = vector.broadcast %309 : vector<8x1xf32> to vector<8x32xf32>
    %311 = arith.mulf %301, %310 : vector<8x32xf32>
    %312 = vector.broadcast %294 : vector<1x32xf32> to vector<8x32xf32>
    %313 = arith.mulf %311, %312 : vector<8x32xf32>
    %314 = vector.broadcast %295 : vector<1x32xf32> to vector<8x32xf32>
    %315 = arith.addf %313, %314 : vector<8x32xf32>
    %c0_128 = arith.constant 0 : index
    %c0_129 = arith.constant 0 : index
    %316 = vector.load %arg18[%c0_128, %c0_129] : memref<32x128xbf16, #tpu.memory_space<vmem>>, vector<32x128xbf16>
    %c0_130 = arith.constant 0 : index
    %c0_131 = arith.constant 0 : index
    %317 = vector.load %arg19[%c0_130, %c0_131] : memref<1x128xf32, #tpu.memory_space<vmem>>, vector<1x128xf32>
    %c0_132 = arith.constant 0 : index
    %c0_133 = arith.constant 0 : index
    %318 = vector.load %arg20[%c0_132, %c0_133] : memref<128x32xbf16, #tpu.memory_space<vmem>>, vector<128x32xbf16>
    %c0_134 = arith.constant 0 : index
    %c0_135 = arith.constant 0 : index
    %319 = vector.load %arg21[%c0_134, %c0_135] : memref<1x32xf32, #tpu.memory_space<vmem>>, vector<1x32xf32>
    %320 = arith.truncf %315 : vector<8x32xf32> to vector<8x32xbf16>
    %cst_136 = arith.constant dense<0.000000e+00> : vector<8x128xf32>
    %321 = tpu.matmul %320, %316, %cst_136 {dimension_numbers = #tpu.dot_dimension_numbers<[1], [0], [0], [1], [0, 0, 1, 1], [], []>} : vector<8x32xbf16>, vector<32x128xbf16>, vector<8x128xf32> -> vector<8x128xf32>
    %322 = vector.broadcast %317 : vector<1x128xf32> to vector<8x128xf32>
    %323 = arith.addf %321, %322 : vector<8x128xf32>
    %cst_137 = arith.constant 0.000000e+00 : f32
    %324 = vector.broadcast %cst_137 : f32 to vector<8x128xf32>
    %325 = arith.maximumf %323, %324 : vector<8x128xf32>
    %326 = arith.truncf %325 : vector<8x128xf32> to vector<8x128xbf16>
    %cst_138 = arith.constant dense<0.000000e+00> : vector<8x32xf32>
    %327 = tpu.matmul %326, %318, %cst_138 {dimension_numbers = #tpu.dot_dimension_numbers<[1], [0], [0], [1], [0, 0, 1, 1], [], []>} : vector<8x128xbf16>, vector<128x32xbf16>, vector<8x32xf32> -> vector<8x32xf32>
    %328 = vector.broadcast %319 : vector<1x32xf32> to vector<8x32xf32>
    %329 = arith.addf %327, %328 : vector<8x32xf32>
    %330 = arith.addf %329, %315 : vector<8x32xf32>
    %c0_139 = arith.constant 0 : index
    %c0_140 = arith.constant 0 : index
    %331 = vector.load %arg22[%c0_139, %c0_140] : memref<1x32xf32, #tpu.memory_space<vmem>>, vector<1x32xf32>
    %c0_141 = arith.constant 0 : index
    %c0_142 = arith.constant 0 : index
    %332 = vector.load %arg23[%c0_141, %c0_142] : memref<1x32xf32, #tpu.memory_space<vmem>>, vector<1x32xf32>
    %cst_143 = arith.constant dense<0.000000e+00> : vector<8xf32>
    %333 = vector.multi_reduction <add>, %330, %cst_143 [1] : vector<8x32xf32> to vector<8xf32>
    %334 = vector.shape_cast %333 : vector<8xf32> to vector<8x1xf32>
    %cst_144 = arith.constant 3.200000e+01 : f32
    %335 = vector.broadcast %cst_144 : f32 to vector<8x1xf32>
    %336 = arith.divf %334, %335 : vector<8x1xf32>
    %337 = vector.broadcast %336 : vector<8x1xf32> to vector<8x32xf32>
    %338 = arith.subf %330, %337 : vector<8x32xf32>
    %339 = arith.mulf %338, %338 : vector<8x32xf32>
    %cst_145 = arith.constant dense<0.000000e+00> : vector<8xf32>
    %340 = vector.multi_reduction <add>, %339, %cst_145 [1] : vector<8x32xf32> to vector<8xf32>
    %341 = vector.shape_cast %340 : vector<8xf32> to vector<8x1xf32>
    %cst_146 = arith.constant 3.200000e+01 : f32
    %342 = vector.broadcast %cst_146 : f32 to vector<8x1xf32>
    %343 = arith.divf %341, %342 : vector<8x1xf32>
    %cst_147 = arith.constant 9.99999974E-6 : f32
    %344 = vector.broadcast %cst_147 : f32 to vector<8x1xf32>
    %345 = arith.addf %343, %344 : vector<8x1xf32>
    %346 = math.rsqrt %345 : vector<8x1xf32>
    %347 = vector.broadcast %346 : vector<8x1xf32> to vector<8x32xf32>
    %348 = arith.mulf %338, %347 : vector<8x32xf32>
    %349 = vector.broadcast %331 : vector<1x32xf32> to vector<8x32xf32>
    %350 = arith.mulf %348, %349 : vector<8x32xf32>
    %351 = vector.broadcast %332 : vector<1x32xf32> to vector<8x32xf32>
    %352 = arith.addf %350, %351 : vector<8x32xf32>
    %c0_148 = arith.constant 0 : index
    %c0_149 = arith.constant 0 : index
    %c0_150 = arith.constant 0 : index
    %353 = vector.load %arg24[%c0_148, %c0_149, %c0_150] : memref<1x8x32xf32, #tpu.memory_space<vmem>>, vector<1x8x32xf32>
    %354 = vector.shape_cast %353 : vector<1x8x32xf32> to vector<8x32xf32>
    %355 = vector.shape_cast %352 : vector<8x32xf32> to vector<1x8x32xf32>
    tpu.vector_store %arg24[%c0_148, %c0_149, %c0_150], %355 {strides = array<i32>} : memref<1x8x32xf32, #tpu.memory_space<vmem>>, vector<1x8x32xf32>,
    return
  }
  func.func @transform_0(%arg0: i32) -> (i32, i32, i32) {
    %c0_i32 = arith.constant 0 : i32
    %c0_i32_0 = arith.constant 0 : i32
    %c0_i32_1 = arith.constant 0 : i32
    return %arg0, %c0_i32, %c0_i32_0 : i32, i32, i32
  }
  func.func @transform_1(%arg0: i32) -> (i32, i32, i32) {
    %c0_i32 = arith.constant 0 : i32
    %c0_i32_0 = arith.constant 0 : i32
    %c0_i32_1 = arith.constant 0 : i32
    return %arg0, %c0_i32, %c0_i32_0 : i32, i32, i32
  }
  func.func @transform_2(%arg0: i32) -> (i32, i32, i32) {
    %c0_i32 = arith.constant 0 : i32
    %c0_i32_0 = arith.constant 0 : i32
    %c0_i32_1 = arith.constant 0 : i32
    return %arg0, %c0_i32, %c0_i32_0 : i32, i32, i32
  }
  func.func @transform_3(%arg0: i32) -> (i32, i32) {
    %c0_i32 = arith.constant 0 : i32
    %c0_i32_0 = arith.constant 0 : i32
    %c0_i32_1 = arith.constant 0 : i32
    return %c0_i32, %c0_i32_0 : i32, i32
  }
  func.func @transform_4(%arg0: i32) -> (i32, i32) {
    %c0_i32 = arith.constant 0 : i32
    %c0_i32_0 = arith.constant 0 : i32
    %c0_i32_1 = arith.constant 0 : i32
    return %c0_i32, %c0_i32_0 : i32, i32
  }
  func.func @transform_5(%arg0: i32) -> (i32, i32) {
    %c0_i32 = arith.constant 0 : i32
    %c0_i32_0 = arith.constant 0 : i32
    %c0_i32_1 = arith.constant 0 : i32
    return %c0_i32, %c0_i32_0 : i32, i32
  }
  func.func @transform_6(%arg0: i32) -> (i32, i32) {
    %c0_i32 = arith.constant 0 : i32
    %c0_i32_0 = arith.constant 0 : i32
    %c0_i32_1 = arith.constant 0 : i32
    return %c0_i32, %c0_i32_0 : i32, i32
  }
  func.func @transform_7(%arg0: i32) -> (i32, i32) {
    %c0_i32 = arith.constant 0 : i32
    %c0_i32_0 = arith.constant 0 : i32
    %c0_i32_1 = arith.constant 0 : i32
    return %c0_i32, %c0_i32_0 : i32, i32
  }
  func.func @transform_8(%arg0: i32) -> (i32, i32) {
    %c0_i32 = arith.constant 0 : i32
    %c0_i32_0 = arith.constant 0 : i32
    %c0_i32_1 = arith.constant 0 : i32
    return %c0_i32, %c0_i32_0 : i32, i32
  }
  func.func @transform_9(%arg0: i32) -> (i32, i32) {
    %c0_i32 = arith.constant 0 : i32
    %c0_i32_0 = arith.constant 0 : i32
    %c0_i32_1 = arith.constant 0 : i32
    return %c0_i32, %c0_i32_0 : i32, i32
  }
  func.func @transform_10(%arg0: i32) -> (i32, i32) {
    %c0_i32 = arith.constant 0 : i32
    %c0_i32_0 = arith.constant 0 : i32
    %c0_i32_1 = arith.constant 0 : i32
    return %c0_i32, %c0_i32_0 : i32, i32
  }
  func.func @transform_11(%arg0: i32) -> (i32, i32) {
    %c0_i32 = arith.constant 0 : i32
    %c0_i32_0 = arith.constant 0 : i32
    %c0_i32_1 = arith.constant 0 : i32
    return %c0_i32, %c0_i32_0 : i32, i32
  }
  func.func @transform_12(%arg0: i32) -> (i32, i32) {
    %c0_i32 = arith.constant 0 : i32
    %c0_i32_0 = arith.constant 0 : i32
    %c0_i32_1 = arith.constant 0 : i32
    return %c0_i32, %c0_i32_0 : i32, i32
  }
  func.func @transform_13(%arg0: i32) -> (i32, i32) {
    %c0_i32 = arith.constant 0 : i32
    %c0_i32_0 = arith.constant 0 : i32
    %c0_i32_1 = arith.constant 0 : i32
    return %c0_i32, %c0_i32_0 : i32, i32
  }
  func.func @transform_14(%arg0: i32) -> (i32, i32) {
    %c0_i32 = arith.constant 0 : i32
    %c0_i32_0 = arith.constant 0 : i32
    %c0_i32_1 = arith.constant 0 : i32
    return %c0_i32, %c0_i32_0 : i32, i32
  }
  func.func @transform_15(%arg0: i32) -> (i32, i32) {
    %c0_i32 = arith.constant 0 : i32
    %c0_i32_0 = arith.constant 0 : i32
    %c0_i32_1 = arith.constant 0 : i32
    return %c0_i32, %c0_i32_0 : i32, i32
  }
  func.func @transform_16(%arg0: i32) -> (i32, i32) {
    %c0_i32 = arith.constant 0 : i32
    %c0_i32_0 = arith.constant 0 : i32
    %c0_i32_1 = arith.constant 0 : i32
    return %c0_i32, %c0_i32_0 : i32, i32
  }
  func.func @transform_17(%arg0: i32) -> (i32, i32) {
    %c0_i32 = arith.constant 0 : i32
    %c0_i32_0 = arith.constant 0 : i32
    %c0_i32_1 = arith.constant 0 : i32
    return %c0_i32, %c0_i32_0 : i32, i32
  }
  func.func @transform_18(%arg0: i32) -> (i32, i32) {
    %c0_i32 = arith.constant 0 : i32
    %c0_i32_0 = arith.constant 0 : i32
    %c0_i32_1 = arith.constant 0 : i32
    return %c0_i32, %c0_i32_0 : i32, i32
  }
  func.func @transform_19(%arg0: i32) -> (i32, i32) {
    %c0_i32 = arith.constant 0 : i32
    %c0_i32_0 = arith.constant 0 : i32
    %c0_i32_1 = arith.constant 0 : i32
    return %c0_i32, %c0_i32_0 : i32, i32
  }
  func.func @transform_20(%arg0: i32) -> (i32, i32) {
    %c0_i32 = arith.constant 0 : i32
    %c0_i32_0 = arith.constant 0 : i32
    %c0_i32_1 = arith.constant 0 : i32
    return %c0_i32, %c0_i32_0 : i32, i32
  }
  func.func @transform_21(%arg0: i32) -> (i32, i32) {
    %c0_i32 = arith.constant 0 : i32
    %c0_i32_0 = arith.constant 0 : i32
    %c0_i32_1 = arith.constant 0 : i32
    return %c0_i32, %c0_i32_0 : i32, i32
  }
  func.func @transform_22(%arg0: i32) -> (i32, i32) {
    %c0_i32 = arith.constant 0 : i32
    %c0_i32_0 = arith.constant 0 : i32
    %c0_i32_1 = arith.constant 0 : i32
    return %c0_i32, %c0_i32_0 : i32, i32
  }
  func.func @transform_23(%arg0: i32) -> (i32, i32, i32) {
    %c0_i32 = arith.constant 0 : i32
    %c0_i32_0 = arith.constant 0 : i32
    %c0_i32_1 = arith.constant 0 : i32
    return %arg0, %c0_i32, %c0_i32_0 : i32, i32, i32
  }
}

</mosaic_0001>

<bundles_post_ra>
// kernel: transformer_forward.9
= control target key start
LH: loop header
LB: loop body
LE: loop exit
PB: predicated region body
PF: predicated region fallthrough
CT: control target
= control target key end

     0   :  { %v111_v0 = vmov 0.0   ;;  %vm112_vm0 = vmmov 0   ;;  %vm41_vm1 = vcmask 261120   ;;  %s154_s1 = inlined_call_operand.vmem [shape: bf16[32,128], index: 1, kind: input, shape index: {}]   ;;  %s155_s0 = inlined_call_operand.vmem [shape: f32[16,32], index: 0, kind: input, shape index: {}]   ;;  %s156_s2 = inlined_call_operand.vmem [shape: f32[1,128], index: 2, kind: input, shape index: {}]   ;;  %s157_s3 = inlined_call_operand.vmem [shape: f32[16,128], index: 3, kind: output, shape index: {}]  }
   0x1   :  { %99 = vmatprep.subr.bf16.mxu0 %v111_v0  ;;  %v109_v1 = vld [vmem:[%s154_s1] sm:$0xff]   ;;  %103 = vmatprep.mubr.msk.bf16.mxu0 %vm112_vm0, %v111_v0  ;;  %v110_v2 = vld [vmem:[%s154_s1 + $0x8] sm:$0xff]  }
   0x2   :  { %100 = vmatpush3.bf16.msra.mxu0 %v109_v1  ;;  %v15_v3 = vld [vmem:[%s155_s0] sm:$0xff]  ;;  %v16_v4 = vld [vmem:[%s155_s0 + $0x8] sm:$0xff] }
   0x3   :  { %101 = vmatprep.subr.bf16.mxu0 %v111_v0  ;;  %v17_v5 = vpack.c.bf16 %v16_v4, %v15_v3  ;;  %v92_v6 = vld [vmem:[%s156_s2] ss:$0 sm:$0xff] }
   0x6   :  { %102 = vmatpush3.bf16.msra.mxu0 %v110_v2 }
   0x9   :  { %104 = vmatmul.mubr.msk.bf16.vlgmr.msra.gmra.mrb[0].mxu0 %vm41_vm1, %v17_v5 }
  0xdc   :  { %v79_v7 = vpop.f32.mrb[0].mxu0 }
  0xdd   :  { %v80_v8 = vadd.f32 %v92_v6, %v79_v7  ;;  %v105_v9 = vpop.f32.mrb[1].mxu0 }
  0xde   :  { %v82_v10 = vpop.f32.mrb[2].mxu0 }
  0xdf   :  { %86 = vst [vmem:[%s157_s3] sm:$0xff] %v80_v8  ;;  %v83_v11 = vadd.f32 %v92_v6, %v82_v10  ;;  %v106_v12 = vpop.f32.mrb[3].mxu0 }
  0xe1   :  { %87 = vst [vmem:[%s157_s3 + $0x8] sm:$0xff] %v83_v11 }

// kernel: transformer_forward.5
= control target key start
LH: loop header
LB: loop body
LE: loop exit
PB: predicated region body
PF: predicated region fallthrough
CT: control target
= control target key end

     0   :  { %s2392_s18 = smov 0   ;;  %s2676_s0 = inlined_call_operand.vmem [shape: f32[2,8,32], index: 0, kind: input, shape index: {}]   ;;  %s2677_s1 = inlined_call_operand.vmem [shape: f32[2,1,8], index: 1, kind: input, shape index: {}]   ;;  %s2678_s2 = inlined_call_operand.vmem [shape: bf16[8,8], index: 2, kind: input, shape index: {}]   ;;  %s2679_s3 = inlined_call_operand.vmem [shape: bf16[8,8], index: 3, kind: input, shape index: {}]   ;;  %s2680_s4 = inlined_call_operand.vmem [shape: bf16[8,8], index: 4, kind: input, shape index: {}]   ;;  %s2681_s5 = inlined_call_operand.vmem [shape: bf16[32,32], index: 5, kind: input, shape index: {}]   ;;  %s2682_s6 = inlined_call_operand.vmem [shape: f32[1,32], index: 6, kind: input, shape index: {}]   ;;  %s2683_s7 = inlined_call_operand.vmem [shape: f32[1,32], index: 7, kind: input, shape index: {}]   ;;  %s2684_s8 = inlined_call_operand.vmem [shape: f32[1,32], index: 8, kind: input, shape index: {}]   ;;  %s2685_s9 = inlined_call_operand.vmem [shape: bf16[32,128], index: 9, kind: input, shape index: {}]   ;;  %s2686_s10 = inlined_call_operand.vmem [shape: f32[1,128], index: 10, kind: input, shape index: {}]   ;;  %s2687_s11 = inlined_call_operand.vmem [shape: bf16[128,32], index: 11, kind: input, shape index: {}]   ;;  %s2688_s12 = inlined_call_operand.vmem [shape: f32[1,32], index: 12, kind: input, shape index: {}]   ;;  %s2689_s13 = inlined_call_operand.vmem [shape: f32[1,32], index: 13, kind: input, shape index: {}]   ;;  %s2690_s14 = inlined_call_operand.vmem [shape: f32[1,32], index: 14, kind: input, shape index: {}]   ;;  %s2691_s15 = inlined_call_operand.vmem [shape: f32[2,8,32], index: 15, kind: output, shape index: {}]  }
   0x1 LB: > { %s1971_s19 = sadd.s32 4294967295, %s2304_s18   ;;  %p1975_p0 = scmp.ge.s32.totalorder %s2304_s18, 1  ;;  %s2304_s18 = sphi %s2392_s18, %s25_s18  }
   0x2   : > { %p444_p1 = scmp.lt.s32.totalorder %s2304_s18, 3 }
   0x4   : > { %p445_p2 = pnand %p1975_p0, %p444_p1 }
   0x5   : > { %v509_v0 = vld [vmem:[%s2679_s3] sm:$0xf] (!%p445_p2)  ;;  %vm521_vm0 = vcmask (!%p445_p2), 1043456   ;;  %p493_p3 = scmp.lt.s32.totalorder (!%p445_p2), %s1971_s19, 1  ;;  %v2306_v1 = vmov (!%p445_p2), 0.0   ;;  %vm2307_vm1 = vmmov (!%p445_p2), 0   ;;  %v700_v26 = vlaneseq (!%p445_p2) }
   0x6   : > { %448 = sbr.rel (%p445_p2) target bundleno = 4970 (0x136a), region = 80  ;;  %2088 = vmatprep.subr.bf16.mxu1 (!%p445_p2), %v2306_v1  ;;  %v2405_v2 = vsel (!%p445_p2), %vm521_vm0, %v509_v0, 0  ;;  %2090 = vmatprep.mubr.msk.bf16.mxu1 (!%p445_p2), %vm2307_vm1, %v2306_v1  ;;  %v508_v3 = vld [vmem:[%s2678_s2] sm:$0xf] (!%p445_p2)  ;;  %vm517_vm2 = vcmask (!%p445_p2), 64512   ;;  %v2308_v30 = vmov (!%p445_p2), 0  }
   0x7   : > { %2089 = vmatpush3.bf16.msra.mxu1 (!%p445_p2), %v2405_v2  ;;  %2082 = vmatprep.subr.bf16.mxu0 (!%p445_p2), %v2306_v1  ;;  %v2417_v4 = vsel (!%p445_p2), %vm521_vm0, %v508_v3, 0  ;;  %v510_v5 = vld [vmem:[%s2680_s4] sm:$0xf] (!%p445_p2)  ;;  %v701_v28 = vshrl.u32 (!%p445_p2), %v700_v26, 7  ;;  %s2309_s20 = smov (!%p445_p2), 120   ;;  %s2310_s23 = smov (!%p445_p2), 112  }
   0x8   : > { %2083 = vmatpush3.bf16.msra.mxu0 (!%p445_p2), %v2417_v4  ;;  %2084 = vmatprep.mubr.msk.bf16.mxu0 (!%p445_p2), %vm2307_vm1, %v2306_v1  ;;  %v2436_v7 = vsel (!%p445_p2), %vm521_vm0, %v510_v5, 0  ;;  %vm1669_vm5 = vcmask (!%p445_p2), 261120  }
   0x9   : > { %2094 = vmatprep.subr.bf16.mxu0 (!%p445_p2), %v2306_v1  ;;  %2112 = vmatprep.subr.bf16.mxu1 (!%p445_p2), %v2306_v1  ;;  %v702_v29 = vsub.s32 (!%p445_p2), 0, %v701_v28 }
   0xd   : > { %s2693_s19 = smov (!%p493_p3, %s1971_s19), 1 }
   0xe   : > { %s1976_s26 = sshll.u32 %s2693_s19, 3  ;;  %s499_s17 = scalar_lea.vmem %s2677_s1, %s2693_s19 }
   0xf   : > { %s496_s29 = scalar_lea.vmem %s2676_s0, %s1976_s26  ;;  %v507_v27 = vld [vmem:[%s499_s17] sm:$0x1]  ;;  %s503_s17 = scalar_lea.vmem %s2691_s15, %s1976_s26 }
  0x10   : > { %v2433_v6 = vld [vmem:[%s496_s29] sm:$0xff]  ;;  %vm516_vm3 = vcmp.eq.f32.partialorder %v507_v27, 0.0  ;;  %s2311_s29 = smov 104  }
  0x11   : > { %v2440_v8 = vpack.c.bf16 %v2433_v6, %v2433_v6  ;;  %v699_v31 = vsel %vm516_vm3, 1, %v2308_v30 }
  0x12   : > { %v2469_v32 = vrot.slane %v699_v31, %v702_v29  ;;  %v511_v29 = vld [vmem:[%s2681_s5] sm:$0xf] }
  0x13   : > { %2091 = vmatmul.mubr.msk.bf16.vlgmr.msra.gmra.mrb[0].mxu1 %vm517_vm2, %v2440_v8  ;;  %2085 = vmatmul.mubr.msk.bf16.vlgmr.msra.gmra.mrb[0].mxu0 %vm517_vm2, %v2440_v8 }
  0x14   : > { %2095 = vmatpush3.bf16.msra.mxu0 %v2436_v7  ;;  %2096 = vmatprep.mubr.msk.bf16.mxu0 %vm2307_vm1, %v2306_v1  ;;  %vm704_vm4 = vcmp.eq.s32.totalorder %v2469_v32, 1  ;;  %v514_v32 = vld [vmem:[%s2681_s5 + $0xc] sm:$0xf] }
  0x15   : > { %2100 = vmatprep.subr.bf16.mxu0 %v2306_v1  ;;  %2113 = vmatpush3.bf16.msra.mxu1 %v2417_v4 }
  0x16   : > { %2114 = vmatprep.mubr.msk.bf16.mxu1 %vm2307_vm1, %v2306_v1  ;;  %2124 = vmatprep.subr.bf16.mxu1 %v2306_v1 }
  0x17   : > { %768 = vrot.lane.b32.xlu1 %v2440_v8, %s2309_s20 }
  0x1b   : > { %2097 = vmatmul.mubr.msk.bf16.vlgmr.msra.gmra.mrb[4].mxu0 %vm517_vm2, %v2440_v8 }
  0x1c   : > { %2102 = vmatprep.mubr.msk.bf16.mxu0 %vm2307_vm1, %v2306_v1 }
  0x89   : > { %v769_v45 = vpop.permute.xlu1 %768 }
  0x8a   : > { %2115 = vmatmul.mubr.msk.bf16.vlgmr.msra.gmra.mrb[4].mxu1 %vm517_vm2, %v769_v45 }
  0x8b   : > { %2125 = vmatpush3.bf16.msra.mxu1 %v2436_v7  ;;  %2126 = vmatprep.mubr.msk.bf16.mxu1 %vm2307_vm1, %v2306_v1 }
  0x8c   : > { %2136 = vmatprep.subr.bf16.mxu1 %v2306_v1 }
  0x92   : > { %2127 = vmatmul.mubr.msk.bf16.vlgmr.msra.gmra.mrb[8].mxu1 %vm517_vm2, %v769_v45 }
  0x93   : > { %2138 = vmatprep.mubr.msk.bf16.mxu1 %vm2307_vm1, %v2306_v1 }
  0xe6   : > { %v602_v9 = vpop.f32.mrb[0].mxu1  ;;  %v559_v10 = vpop.f32.mrb[0].mxu0 }
  0xe7   : > { %v652_v11 = vpack.c.bf16 %v602_v9, %v602_v9  ;;  %v2092_v12 = vpop.f32.mrb[1].mxu1  ;;  %v2086_v13 = vpop.f32.mrb[1].mxu0  ;;  %v651_v19 = vpack.c.bf16 %v559_v10, %v559_v10 }
  0xe8   : > { %v605_v14 = vpop.f32.mrb[2].mxu1  ;;  %v562_v15 = vpop.f32.mrb[2].mxu0 }
  0xe9   : > { %v657_v16 = vsel %vm517_vm2, %v652_v11, 0  ;;  %v2093_v17 = vpop.f32.mrb[3].mxu1  ;;  %v2087_v18 = vpop.f32.mrb[3].mxu0 }
  0xea   : > { %2101 = vmatpush3.bf16.xpose.msra.mxu0 %v657_v16 }
  0xeb   : > { %2106 = vmatprep.subr.bf16.mxu0 %v2306_v1 }
  0xee   : > { %v645_v20 = vpop.f32.mrb[4].mxu0 }
  0xef   : > { %v719_v21 = vpack.c.bf16 %v645_v20, %v645_v20  ;;  %v2098_v22 = vpop.f32.mrb[5].mxu0 }
  0xf0   : > { %v648_v23 = vpop.f32.mrb[6].mxu0 }
  0xf1   : > { %2103 = vmatmul.mubr.msk.bf16.vlgmr.msra.gmra.mrb[8].mxu0 %vm517_vm2, %v651_v19  ;;  %v724_v24 = vsel %vm521_vm0, %v719_v21, 0  ;;  %v2099_v25 = vpop.f32.mrb[7].mxu0 }
  0xf2   : > { %2107 = vmatpush3.bf16.msra.mxu0 %v724_v24  ;;  %2108 = vmatprep.mubr.msk.bf16.mxu0 %vm2307_vm1, %v2306_v1  ;;  %v512_v25 = vld [vmem:[%s2681_s5 + $0x4] sm:$0xf] }
  0xf3   : > { %2118 = vmatprep.subr.bf16.mxu0 %v2306_v1  ;;  %v1007_v26 = vsel %vm521_vm0, %v512_v25, 0 }
 0x15d   : > { %v807_v50 = vpop.f32.mrb[4].mxu1 }
 0x15e   : > { %v2116_v51 = vpop.f32.mrb[5].mxu1  ;;  %v893_v12 = vpack.c.bf16 %v807_v50, %v807_v50 }
 0x15f   : > { %v810_v52 = vpop.f32.mrb[6].mxu1 }
 0x160   : > { %v2117_v53 = vpop.f32.mrb[7].mxu1 }
 0x165   : > { %v887_v54 = vpop.f32.mrb[8].mxu1 }
 0x166   : > { %v955_v55 = vpack.c.bf16 %v887_v54, %v887_v54  ;;  %v2128_v56 = vpop.f32.mrb[9].mxu1 }
 0x167   : > { %v890_v57 = vpop.f32.mrb[10].mxu1 }
 0x168   : > { %v960_v58 = vsel %vm521_vm0, %v955_v55, 0  ;;  %v2129_v59 = vpop.f32.mrb[11].mxu1 }
 0x169   : > { %2137 = vmatpush3.bf16.msra.mxu1 %v960_v58 }
 0x16a   : > { %2148 = vmatprep.subr.bf16.mxu1 %v2306_v1 }
 0x1c4   : > { %v693_v33 = vpop.f32.mrb[8].mxu0 }
 0x1c5   : > { %v705_v34 = vsel %vm704_vm4, -1e+20, %v693_v33  ;;  %v2104_v35 = vpop.f32.mrb[9].mxu0  ;;  %v1053_v33 = vsel %vm521_vm0, %v511_v29, 0 }
 0x1c6   : > { %v706_v36 = vmul.f32 0.17677669, %v705_v34  ;;  %v696_v37 = vpop.f32.mrb[10].mxu0 }
 0x1c7   : > { %v2105_v38 = vpop.f32.mrb[11].mxu0 }
 0x1c8   : > { %v707_v39 = vsel %vm517_vm2, %v706_v36, -inf }
 0x1c9   : > { %708 = vmax.xlane.f32.xlu0 %v707_v39 }
 0x256   : > { %v709_v40 = vpop.xlane.xlu0 %708 }
 0x257   : > { %v710_v41 = vsub.f32 %v706_v36, %v709_v40 }
 0x259   : > { %v711_v42 = vmul.f32 1.442695, %v710_v41 }
 0x25b   : > { %2278 = vpow2.f32 %v711_v42 }
 0x265   : > { %v2279_v43 = vpop.eup %2278 }
 0x266   : > { %v713_v44 = vsel %vm517_vm2, %v2279_v43, 0.0 }
 0x267   : > { %714 = vadd.xlane.f32.xlu0 %v713_v44 }
 0x2f4   : > { %v715_v46 = vpop.xlane.xlu0 %714 }
 0x2f5   : > { %2280 = vrcp.f32 %v715_v46 }
 0x2ff   : > { %v2281_v47 = vpop.eup %2280 }
 0x300   : > { %v717_v48 = vmul.f32 %v2281_v47, %v2279_v43 }
 0x302   : > { %v718_v49 = vpack.c.bf16 %v717_v48, %v717_v48 }
 0x304   : > { %2109 = vmatmul.mubr.msk.bf16.vlgmr.msra.gmra.mrb[12].mxu0 %vm517_vm2, %v718_v49 }
 0x305   : > { %2119 = vmatpush3.bf16.msra.mxu0 %v2405_v2  ;;  %2120 = vmatprep.mubr.msk.bf16.mxu0 %vm2307_vm1, %v2306_v1 }
 0x306   : > { %2130 = vmatprep.subr.bf16.mxu0 %v2306_v1 }
 0x30c   : > { %2121 = vmatmul.mubr.msk.bf16.vlgmr.msra.gmra.mrb[16].mxu0 %vm517_vm2, %v769_v45 }
 0x30d   : > { %2132 = vmatprep.mubr.msk.bf16.mxu0 %vm2307_vm1, %v2306_v1 }
 0x3d7   : > { %v760_v60 = vpop.f32.mrb[12].mxu0 }
 0x3d8   : > { %v2110_v61 = vpop.f32.mrb[13].mxu0  ;;  %v766_v34 = vpack.c.bf16 %v760_v60, %v760_v60 }
 0x3d9   : > { %v763_v62 = vpop.f32.mrb[14].mxu0 }
 0x3da   : > { %v2111_v63 = vpop.f32.mrb[15].mxu0 }
 0x3df   : > { %v847_v0 = vpop.f32.mrb[16].mxu0 }
 0x3e0   : > { %v894_v3 = vpack.c.bf16 %v847_v0, %v847_v0  ;;  %v2122_v5 = vpop.f32.mrb[17].mxu0 }
 0x3e1   : > { %v850_v9 = vpop.f32.mrb[18].mxu0 }
 0x3e2   : > { %v899_v10 = vsel %vm517_vm2, %v894_v3, 0  ;;  %v2123_v11 = vpop.f32.mrb[19].mxu0 }
 0x3e3   : > { %2131 = vmatpush3.bf16.xpose.msra.mxu0 %v899_v10 }
 0x3e4   : > { %2142 = vmatprep.subr.bf16.mxu0 %v2306_v1 }
 0x3ea   : > { %2133 = vmatmul.mubr.msk.bf16.vlgmr.msra.gmra.mrb[20].mxu0 %vm517_vm2, %v893_v12 }
 0x3eb   : > { %2144 = vmatprep.mubr.msk.bf16.mxu0 %vm2307_vm1, %v2306_v1  ;;  %2143 = vmatpush3.bf16.msra.mxu0 %v1007_v26 }
 0x3ec   : > { %2154 = vmatprep.subr.bf16.mxu0 %v2306_v1 }
 0x4bd   : > { %v935_v13 = vpop.f32.mrb[20].mxu0 }
 0x4be   : > { %v941_v14 = vsel %vm704_vm4, -1e+20, %v935_v13  ;;  %v2134_v15 = vpop.f32.mrb[21].mxu0 }
 0x4bf   : > { %v942_v16 = vmul.f32 0.17677669, %v941_v14  ;;  %v938_v17 = vpop.f32.mrb[22].mxu0 }
 0x4c0   : > { %v2135_v18 = vpop.f32.mrb[23].mxu0 }
 0x4c1   : > { %v943_v19 = vsel %vm517_vm2, %v942_v16, -inf }
 0x4c2   : > { %944 = vmax.xlane.f32.xlu1 %v943_v19 }
 0x54f   : > { %v945_v20 = vpop.xlane.xlu1 %944 }
 0x550   : > { %v946_v21 = vsub.f32 %v942_v16, %v945_v20 }
 0x552   : > { %v947_v22 = vmul.f32 1.442695, %v946_v21  ;;  %v513_v21 = vld [vmem:[%s2681_s5 + $0x8] sm:$0xf] }
 0x554   : > { %2282 = vpow2.f32 %v947_v22  ;;  %v1334_v22 = vsel %vm521_vm0, %v513_v21, 0 }
 0x55e   : > { %v2283_v23 = vpop.eup %2282 }
 0x55f   : > { %v949_v24 = vsel %vm517_vm2, %v2283_v23, 0.0 }
 0x560   : > { %950 = vadd.xlane.f32.xlu0 %v949_v24 }
 0x576   : > { %1095 = vrot.lane.b32.xlu0 %v2440_v8, %s2310_s23 }
 0x5ed   : > { %v951_v27 = vpop.xlane.xlu0 %950 }
 0x5ee   : > { %2284 = vrcp.f32 %v951_v27 }
 0x5f1   : > { %v1096_v35 = vpop.permute.xlu0 %1095 }
 0x5f8   : > { %v2285_v28 = vpop.eup %2284 }
 0x5f9   : > { %v953_v30 = vmul.f32 %v2285_v28, %v2283_v23 }
 0x5fb   : > { %v954_v31 = vpack.c.bf16 %v953_v30, %v953_v30 }
 0x5fd   : > { %2139 = vmatmul.mubr.msk.bf16.vlgmr.msra.gmra.mrb[12].mxu1 %vm517_vm2, %v954_v31 }
 0x5fe   : > { %2149 = vmatpush3.bf16.msra.mxu1 %v1053_v33  ;;  %2150 = vmatprep.mubr.msk.bf16.mxu1 %vm2307_vm1, %v2306_v1 }
 0x5ff   : > { %2160 = vmatprep.subr.bf16.mxu1 %v2306_v1 }
 0x605   : > { %2151 = vmatmul.mubr.msk.bf16.vlgmr.msra.gmra.mrb[16].mxu1 %vm517_vm2, %v766_v34 }
 0x606   : > { %2161 = vmatpush3.bf16.msra.mxu1 %v2405_v2  ;;  %2162 = vmatprep.mubr.msk.bf16.mxu1 %vm2307_vm1, %v2306_v1 }
 0x607   : > { %2172 = vmatprep.subr.bf16.mxu1 %v2306_v1 }
 0x60d   : > { %2163 = vmatmul.mubr.msk.bf16.vlgmr.msra.gmra.mrb[20].mxu1 %vm517_vm2, %v1096_v35 }
 0x60e   : > { %2174 = vmatprep.mubr.msk.bf16.mxu1 %vm2307_vm1, %v2306_v1 }
 0x6d0   : > { %v996_v36 = vpop.f32.mrb[12].mxu1 }
 0x6d1   : > { %v1002_v37 = vpack.c.bf16 %v996_v36, %v996_v36  ;;  %v2140_v38 = vpop.f32.mrb[13].mxu1 }
 0x6d2   : > { %v999_v39 = vpop.f32.mrb[14].mxu1 }
 0x6d3   : > { %v2141_v40 = vpop.f32.mrb[15].mxu1  ;;  %2145 = vmatmul.mubr.msk.bf16.vlgmr.msra.gmra.mrb[24].mxu0 %vm517_vm2, %v1002_v37 }
 0x6d4   : > { %2155 = vmatpush3.bf16.msra.mxu0 %v2417_v4  ;;  %2156 = vmatprep.mubr.msk.bf16.mxu0 %vm2307_vm1, %v2306_v1 }
 0x6d5   : > { %2166 = vmatprep.subr.bf16.mxu0 %v2306_v1 }
 0x6d8   : > { %v1089_v41 = vpop.f32.mrb[16].mxu1 }
 0x6d9   : > { %v2152_v42 = vpop.f32.mrb[17].mxu1 }
 0x6da   : > { %v1092_v43 = vpop.f32.mrb[18].mxu1 }
 0x6db   : > { %v2153_v44 = vpop.f32.mrb[19].mxu1  ;;  %2157 = vmatmul.mubr.msk.bf16.vlgmr.msra.gmra.mrb[28].mxu0 %vm517_vm2, %v1096_v35 }
 0x6dc   : > { %2167 = vmatpush3.bf16.msra.mxu0 %v2436_v7  ;;  %2168 = vmatprep.mubr.msk.bf16.mxu0 %vm2307_vm1, %v2306_v1 }
 0x6dd   : > { %2178 = vmatprep.subr.bf16.mxu0 %v2306_v1 }
 0x6e0   : > { %v1174_v45 = vpop.f32.mrb[20].mxu1 }
 0x6e1   : > { %v1221_v46 = vpack.c.bf16 %v1174_v45, %v1174_v45  ;;  %v2164_v47 = vpop.f32.mrb[21].mxu1 }
 0x6e2   : > { %v1177_v48 = vpop.f32.mrb[22].mxu1 }
 0x6e3   : > { %2169 = vmatmul.mubr.msk.bf16.vlgmr.msra.gmra.mrb[32].mxu0 %vm517_vm2, %v1096_v35  ;;  %v1226_v49 = vsel %vm517_vm2, %v1221_v46, 0  ;;  %v2165_v50 = vpop.f32.mrb[23].mxu1 }
 0x6e4   : > { %2173 = vmatpush3.bf16.xpose.msra.mxu1 %v1226_v49  ;;  %2180 = vmatprep.mubr.msk.bf16.mxu0 %vm2307_vm1, %v2306_v1 }
 0x6e5   : > { %2184 = vmatprep.subr.bf16.mxu1 %v2306_v1 }
 0x7a6   : > { %v1043_v51 = vpop.f32.mrb[24].mxu0 }
 0x7a7   : > { %v2541_v52 = vadd.f32 %v1089_v41, %v1043_v51  ;;  %v2146_v53 = vpop.f32.mrb[25].mxu0 }
 0x7a8   : > { %v1046_v54 = vpop.f32.mrb[26].mxu0 }
 0x7a9   : > { %v2147_v55 = vpop.f32.mrb[27].mxu0 }
 0x7ae   : > { %v1134_v56 = vpop.f32.mrb[28].mxu0 }
 0x7af   : > { %v1220_v57 = vpack.c.bf16 %v1134_v56, %v1134_v56  ;;  %v2158_v58 = vpop.f32.mrb[29].mxu0 }
 0x7b0   : > { %v1137_v59 = vpop.f32.mrb[30].mxu0 }
 0x7b1   : > { %v2159_v60 = vpop.f32.mrb[31].mxu0  ;;  %2175 = vmatmul.mubr.msk.bf16.vlgmr.msra.gmra.mrb[24].mxu1 %vm517_vm2, %v1220_v57 }
 0x7b2   : > { %2186 = vmatprep.mubr.msk.bf16.mxu1 %vm2307_vm1, %v2306_v1  ;;  %2185 = vmatpush3.bf16.msra.mxu1 %v1334_v22 }
 0x7b3   : > { %2196 = vmatprep.subr.bf16.mxu1 %v2306_v1 }
 0x7b6   : > { %v1214_v61 = vpop.f32.mrb[32].mxu0 }
 0x7b7   : > { %v1282_v62 = vpack.c.bf16 %v1214_v61, %v1214_v61  ;;  %v2170_v63 = vpop.f32.mrb[33].mxu0 }
 0x7b8   : > { %v1217_v0 = vpop.f32.mrb[34].mxu0 }
 0x7b9   : > { %v1287_v3 = vsel %vm521_vm0, %v1282_v62, 0  ;;  %v2171_v5 = vpop.f32.mrb[35].mxu0  ;;  %v1616_v0 = vsel %vm521_vm0, %v514_v32, 0 }
 0x7ba   : > { %2179 = vmatpush3.bf16.msra.mxu0 %v1287_v3 }
 0x7bb   : > { %2190 = vmatprep.subr.bf16.mxu0 %v2306_v1 }
 0x884   : > { %v1262_v9 = vpop.f32.mrb[24].mxu1 }
 0x885   : > { %v1268_v10 = vsel %vm704_vm4, -1e+20, %v1262_v9  ;;  %v2176_v11 = vpop.f32.mrb[25].mxu1 }
 0x886   : > { %v1269_v12 = vmul.f32 0.17677669, %v1268_v10  ;;  %v1265_v13 = vpop.f32.mrb[26].mxu1 }
 0x887   : > { %v2177_v14 = vpop.f32.mrb[27].mxu1 }
 0x888   : > { %v1270_v15 = vsel %vm517_vm2, %v1269_v12, -inf }
 0x889   : > { %1271 = vmax.xlane.f32.xlu0 %v1270_v15 }
 0x916   : > { %v1272_v16 = vpop.xlane.xlu0 %1271 }
 0x917   : > { %v1273_v17 = vsub.f32 %v1269_v12, %v1272_v16  ;;  %v2002_v16 = vld [vmem:[%s2682_s6] ss:$0 sm:$0xff] }
 0x919   : > { %v1274_v18 = vmul.f32 1.442695, %v1273_v17 }
 0x91b   : > { %2286 = vpow2.f32 %v1274_v18 }
 0x925   : > { %v2287_v19 = vpop.eup %2286 }
 0x926   : > { %v1276_v20 = vsel %vm517_vm2, %v2287_v19, 0.0 }
 0x927   : > { %1277 = vadd.xlane.f32.xlu1 %v1276_v20 }
 0x938   : > { %1377 = vrot.lane.b32.xlu1 %v2440_v8, %s2311_s29 }
 0x9b4   : > { %v1278_v23 = vpop.xlane.xlu1 %1277 }
 0x9b5   : > { %2288 = vrcp.f32 %v1278_v23 }
 0x9b8   : > { %v1378_v8 = vpop.permute.xlu1 %1377 }
 0x9bf   : > { %v2289_v24 = vpop.eup %2288 }
 0x9c0   : > { %v1280_v25 = vmul.f32 %v2289_v24, %v2287_v19 }
 0x9c2   : > { %v1281_v26 = vpack.c.bf16 %v1280_v25, %v1280_v25 }
 0x9c4   : > { %2181 = vmatmul.mubr.msk.bf16.vlgmr.msra.gmra.mrb[36].mxu0 %vm517_vm2, %v1281_v26 }
 0x9c5   : > { %2191 = vmatpush3.bf16.msra.mxu0 %v2417_v4  ;;  %2192 = vmatprep.mubr.msk.bf16.mxu0 %vm2307_vm1, %v2306_v1 }
 0x9c6   : > { %2202 = vmatprep.subr.bf16.mxu0 %v2306_v1 }
 0x9cc   : > { %2193 = vmatmul.mubr.msk.bf16.vlgmr.msra.gmra.mrb[40].mxu0 %vm517_vm2, %v1378_v8 }
 0x9cd   : > { %2203 = vmatpush3.bf16.msra.mxu0 %v2436_v7  ;;  %2204 = vmatprep.mubr.msk.bf16.mxu0 %vm2307_vm1, %v2306_v1 }
 0x9ce   : > { %2214 = vmatprep.subr.bf16.mxu0 %v2306_v1 }
 0x9d4   : > { %2205 = vmatmul.mubr.msk.bf16.vlgmr.msra.gmra.mrb[44].mxu0 %vm517_vm2, %v1378_v8 }
 0x9d5   : > { %2216 = vmatprep.mubr.msk.bf16.mxu0 %vm2307_vm1, %v2306_v1 }
 0xa97   : > { %v1323_v4 = vpop.f32.mrb[36].mxu0 }
 0xa98   : > { %v1329_v27 = vpack.c.bf16 %v1323_v4, %v1323_v4  ;;  %v2182_v28 = vpop.f32.mrb[37].mxu0 }
 0xa99   : > { %v1326_v29 = vpop.f32.mrb[38].mxu0  ;;  %v2268_v28 = vld [vmem:[%s2685_s9] sm:$0xff]  }
 0xa9a   : > { %v2183_v30 = vpop.f32.mrb[39].mxu0  ;;  %2187 = vmatmul.mubr.msk.bf16.vlgmr.msra.gmra.mrb[28].mxu1 %vm517_vm2, %v1329_v27  ;;  %v2270_v29 = vld [vmem:[%s2687_s11] sm:$0xff]  }
 0xa9b   : > { %2197 = vmatpush3.bf16.msra.mxu1 %v2405_v2  ;;  %2198 = vmatprep.mubr.msk.bf16.mxu1 %vm2307_vm1, %v2306_v1  ;;  %v2271_v30 = vld [vmem:[%s2687_s11 + $0x8] sm:$0xff]  }
 0xa9c   : > { %2208 = vmatprep.subr.bf16.mxu1 %v2306_v1 }
 0xa9f   : > { %v1416_v7 = vpop.f32.mrb[40].mxu0 }
 0xaa0   : > { %v2194_v31 = vpop.f32.mrb[41].mxu0  ;;  %v1502_v51 = vpack.c.bf16 %v1416_v7, %v1416_v7  ;;  %v2272_v7 = vld [vmem:[%s2687_s11 + $0x10] sm:$0xff]  }
 0xaa1   : > { %v1419_v33 = vpop.f32.mrb[42].mxu0  ;;  %v2273_v31 = vld [vmem:[%s2687_s11 + $0x18] sm:$0xff]  }
 0xaa2   : > { %2199 = vmatmul.mubr.msk.bf16.vlgmr.msra.gmra.mrb[32].mxu1 %vm517_vm2, %v1378_v8  ;;  %v2195_v34 = vpop.f32.mrb[43].mxu0  ;;  %v2274_v33 = vld [vmem:[%s2687_s11 + $0x20] sm:$0xff]  }
 0xaa3   : > { %2210 = vmatprep.mubr.msk.bf16.mxu1 %vm2307_vm1, %v2306_v1  ;;  %v2275_v34 = vld [vmem:[%s2687_s11 + $0x28] sm:$0xff]  }
 0xaa7   : > { %v1496_v35 = vpop.f32.mrb[44].mxu0 }
 0xaa8   : > { %v1564_v36 = vpack.c.bf16 %v1496_v35, %v1496_v35  ;;  %v2206_v37 = vpop.f32.mrb[45].mxu0 }
 0xaa9   : > { %v1499_v38 = vpop.f32.mrb[46].mxu0 }
 0xaaa   : > { %v1569_v2 = vsel %vm521_vm0, %v1564_v36, 0  ;;  %v2207_v39 = vpop.f32.mrb[47].mxu0 }
 0xaab   : > { %2215 = vmatpush3.bf16.msra.mxu0 %v1569_v2  ;;  %v2003_v2 = vld [vmem:[%s2683_s7] ss:$0 sm:$0xff] }
 0xaac   : > { %2226 = vmatprep.subr.bf16.mxu0 %v2306_v1 }
 0xb6d   : > { %v1370_v40 = vpop.f32.mrb[28].mxu1 }
 0xb6e   : > { %v1376_v41 = vadd.f32 %v1370_v40, %v2541_v52  ;;  %v2188_v42 = vpop.f32.mrb[29].mxu1  ;;  %v2004_v40 = vld [vmem:[%s2684_s8] ss:$0 sm:$0xff] }
 0xb6f   : > { %v1373_v43 = vpop.f32.mrb[30].mxu1 }
 0xb70   : > { %v2189_v44 = vpop.f32.mrb[31].mxu1 }
 0xb71   : > { %v2276_v44 = vld [vmem:[%s2687_s11 + $0x30] sm:$0xff]  }
 0xb75   : > { %v1456_v45 = vpop.f32.mrb[32].mxu1 }
 0xb76   : > { %v1503_v46 = vpack.c.bf16 %v1456_v45, %v1456_v45  ;;  %v2200_v47 = vpop.f32.mrb[33].mxu1  ;;  %v2277_v45 = vld [vmem:[%s2687_s11 + $0x38] sm:$0xff]  }
 0xb77   : > { %v1459_v48 = vpop.f32.mrb[34].mxu1 }
 0xb78   : > { %v1508_v49 = vsel %vm517_vm2, %v1503_v46, 0  ;;  %v2201_v50 = vpop.f32.mrb[35].mxu1  ;;  %v2005_v46 = vld [vmem:[%s2686_s10] ss:$0 sm:$0xff] }
 0xb79   : > { %2209 = vmatpush3.bf16.xpose.msra.mxu1 %v1508_v49 }
 0xb7a   : > { %2220 = vmatprep.subr.bf16.mxu1 %v2306_v1 }
 0xb80   : > { %2211 = vmatmul.mubr.msk.bf16.vlgmr.msra.gmra.mrb[36].mxu1 %vm517_vm2, %v1502_v51 }
 0xb81   : > { %2222 = vmatprep.mubr.msk.bf16.mxu1 %vm2307_vm1, %v2306_v1  ;;  %2221 = vmatpush3.bf16.msra.mxu1 %v1616_v0 }
 0xb82   : > { %2234 = vmatprep.subr.bf16.mxu1 %v2306_v1 }
 0xc53   : > { %v1544_v52 = vpop.f32.mrb[36].mxu1 }
 0xc54   : > { %v1550_v53 = vsel %vm704_vm4, -1e+20, %v1544_v52  ;;  %v2212_v54 = vpop.f32.mrb[37].mxu1 }
 0xc55   : > { %v1551_v55 = vmul.f32 0.17677669, %v1550_v53  ;;  %v1547_v56 = vpop.f32.mrb[38].mxu1 }
 0xc56   : > { %v2213_v57 = vpop.f32.mrb[39].mxu1 }
 0xc57   : > { %v1552_v58 = vsel %vm517_vm2, %v1551_v55, -inf }
 0xc58   : > { %1553 = vmax.xlane.f32.xlu1 %v1552_v58 }
 0xce5   : > { %v1554_v59 = vpop.xlane.xlu1 %1553 }
 0xce6   : > { %v1555_v60 = vsub.f32 %v1551_v55, %v1554_v59 }
 0xce8   : > { %v1556_v61 = vmul.f32 1.442695, %v1555_v60 }
 0xcea   : > { %2290 = vpow2.f32 %v1556_v61 }
 0xcf4   : > { %v2291_v62 = vpop.eup %2290 }
 0xcf5   : > { %v1558_v63 = vsel %vm517_vm2, %v2291_v62, 0.0 }
 0xcf6   : > { %1559 = vadd.xlane.f32.xlu0 %v1558_v63 }
 0xd83   : > { %v1560_v3 = vpop.xlane.xlu0 %1559 }
 0xd84   : > { %2292 = vrcp.f32 %v1560_v3 }
 0xd8e   : > { %v2293_v5 = vpop.eup %2292 }
 0xd8f   : > { %v1562_v9 = vmul.f32 %v2293_v5, %v2291_v62 }
 0xd91   : > { %v1563_v10 = vpack.c.bf16 %v1562_v9, %v1562_v9 }
 0xd93   : > { %2217 = vmatmul.mubr.msk.bf16.vlgmr.msra.gmra.mrb[48].mxu0 %vm517_vm2, %v1563_v10 }
 0xd94   : > { %2230 = vmatprep.mubr.msk.bf16.mxu0 %vm2307_vm1, %v2306_v1  ;;  %2227 = vmatpush3.bf16.msra.mxu0 %v2268_v28 }
 0xd95   : > { %2228 = vmatprep.subr.bf16.mxu0 %v2306_v1 }
 0xe66   : > { %v1605_v11 = vpop.f32.mrb[48].mxu0 }
 0xe67   : > { %v1611_v12 = vpack.c.bf16 %v1605_v11, %v1605_v11  ;;  %v2218_v13 = vpop.f32.mrb[49].mxu0  ;;  %v2018_v11 = vld [vmem:[%s2689_s13] ss:$0 sm:$0xff] }
 0xe68   : > { %v1608_v14 = vpop.f32.mrb[50].mxu0  ;;  %v2019_v13 = vld [vmem:[%s2690_s14] ss:$0 sm:$0xff] }
 0xe69   : > { %v2219_v15 = vpop.f32.mrb[51].mxu0  ;;  %2223 = vmatmul.mubr.msk.bf16.vlgmr.msra.gmra.mrb[40].mxu1 %vm517_vm2, %v1611_v12 }
 0xe6a   : > { %2250 = vmatprep.mubr.msk.bf16.mxu1 %vm2307_vm1, %v2306_v1  ;;  %2235 = vmatpush3.bf16.msra.mxu1 %v2270_v29 }
 0xe6b   : > { %2236 = vmatprep.subr.bf16.mxu1 %v2306_v1 }
 0xe6e   : > { %2237 = vmatpush3.bf16.msra.mxu1 %v2271_v30 }
 0xe6f   : > { %2238 = vmatprep.subr.bf16.mxu1 %v2306_v1 }
 0xe72   : > { %2239 = vmatpush3.bf16.msra.mxu1 %v2272_v7 }
 0xe73   : > { %2240 = vmatprep.subr.bf16.mxu1 %v2306_v1 }
 0xe76   : > { %2241 = vmatpush3.bf16.msra.mxu1 %v2273_v31 }
 0xe77   : > { %2242 = vmatprep.subr.bf16.mxu1 %v2306_v1 }
 0xe7a   : > { %2243 = vmatpush3.bf16.msra.mxu1 %v2274_v33 }
 0xe7b   : > { %2244 = vmatprep.subr.bf16.mxu1 %v2306_v1 }
 0xe7e   : > { %2245 = vmatpush3.bf16.msra.mxu1 %v2275_v34 }
 0xe7f   : > { %2246 = vmatprep.subr.bf16.mxu1 %v2306_v1 }
 0xe82   : > { %2247 = vmatpush3.bf16.msra.mxu1 %v2276_v44 }
 0xe83   : > { %2248 = vmatprep.subr.bf16.mxu1 %v2306_v1  ;;  %v2009_v1 = vld [vmem:[%s2688_s12] ss:$0 sm:$0xff] }
 0xe86   : > { %2249 = vmatpush3.bf16.msra.mxu1 %v2277_v45 }
 0xf3c   : > { %v1652_v17 = vpop.f32.mrb[40].mxu1 }
 0xf3d   : > { %v1658_v18 = vadd.f32 %v1652_v17, %v1376_v41  ;;  %v2224_v19 = vpop.f32.mrb[41].mxu1 }
 0xf3e   : > { %v1655_v20 = vpop.f32.mrb[42].mxu1 }
 0xf3f   : > { %v1665_v21 = vadd.f32 %v2002_v16, %v1658_v18  ;;  %v2225_v22 = vpop.f32.mrb[43].mxu1 }
 0xf41   : > { %v1666_v23 = vadd.f32 %v1665_v21, %v2433_v6  ;;  %v2269_v6 = vld [vmem:[%s2685_s9 + $0x8] sm:$0xff]  }
 0xf42   : > { %2229 = vmatpush3.bf16.msra.mxu0 %v2269_v6 }
 0xf43   : > { %v1670_v24 = vsel %vm1669_vm5, %v1666_v23, 0.0 }
 0xf44   : > { %1671 = vadd.xlane.f32.xlu0 %v1670_v24 }
 0xfd1   : > { %v1672_v25 = vpop.xlane.xlu0 %1671 }
 0xfd2   : > { %v1674_v26 = vmul.f32 0.03125, %v1672_v25 }
 0xfd4   : > { %v1675_v8 = vsub.f32 %v1666_v23, %v1674_v26 }
 0xfd6   : > { %v1676_v4 = vmul.f32 %v1675_v8, %v1675_v8 }
 0xfd8   : > { %v1677_v27 = vsel %vm1669_vm5, %v1676_v4, 0.0 }
 0xfd9   : > { %1678 = vadd.xlane.f32.xlu0 %v1677_v27 }
0x1066   : > { %v1679_v35 = vpop.xlane.xlu0 %1678 }
0x1067   : > { %v1680_v36 = vmul.f32 0.03125, %v1679_v35 }
0x1069   : > { %v1681_v37 = vadd.f32 1e-05, %v1680_v36 }
0x106b   : > { %2294 = vrsqrt.f32 %v1681_v37 }
0x1075   : > { %v2295_v38 = vpop.eup %2294 }
0x1076   : > { %v1683_v39 = vmul.f32 %v2295_v38, %v1675_v8 }
0x1078   : > { %v1690_v41 = vmul.f32 %v2003_v2, %v1683_v39 }
0x107a   : > { %v1697_v42 = vadd.f32 %v2004_v40, %v1690_v41 }
0x107c   : > { %v1720_v43 = vpack.c.bf16 %v1697_v42, %v1697_v42 }
0x107e   : > { %2231 = vmatmul.mubr.msk.bf16.vlgmr.msra.gmra.mrb[52].mxu0 %vm1669_vm5, %v1720_v43 }
0x1151   : > { %v1776_v47 = vpop.f32.mrb[52].mxu0 }
0x1152   : > { %v1777_v48 = vadd.f32 %v2005_v46, %v1776_v47  ;;  %v2232_v49 = vpop.f32.mrb[53].mxu0 }
0x1153   : > { %v1779_v50 = vpop.f32.mrb[54].mxu0 }
0x1154   : > { %v1782_v51 = vmax.f32 %v1777_v48, 0.0  ;;  %v2233_v52 = vpop.f32.mrb[55].mxu0 }
0x1156   : > { %v1783_v53 = vpack.c.bf16 %v1782_v51, %v1782_v51 }
0x1158   : > { %2251 = vmatmul.mubr.bf16.vlgmr.msra.gmra.mrb[44].mxu1 %v1783_v53 }
0x122b   : > { %v1872_v54 = vpop.f32.mrb[44].mxu1 }
0x122c   : > { %v1873_v55 = vadd.f32 %v2009_v1, %v1872_v54  ;;  %v2252_v56 = vpop.f32.mrb[45].mxu1 }
0x122d   : > { %v1875_v57 = vpop.f32.mrb[46].mxu1 }
0x122e   : > { %v2253_v58 = vpop.f32.mrb[47].mxu1  ;;  %v1878_v59 = vadd.f32 %v1873_v55, %v1697_v42 }
0x1230   : > { %v1881_v60 = vsel %vm1669_vm5, %v1878_v59, 0.0 }
0x1231   : > { %1882 = vadd.xlane.f32.xlu0 %v1881_v60 }
0x12be   : > { %v1883_v61 = vpop.xlane.xlu0 %1882 }
0x12bf   : > { %v1884_v62 = vmul.f32 0.03125, %v1883_v61 }
0x12c1   : > { %v1885_v63 = vsub.f32 %v1878_v59, %v1884_v62 }
0x12c3   : > { %v1886_v32 = vmul.f32 %v1885_v63, %v1885_v63 }
0x12c5   : > { %v1887_v0 = vsel %vm1669_vm5, %v1886_v32, 0.0 }
0x12c6   : > { %1888 = vadd.xlane.f32.xlu0 %v1887_v0 }
0x1353   : > { %v1889_v3 = vpop.xlane.xlu0 %1888 }
0x1354   : > { %v1890_v5 = vmul.f32 0.03125, %v1889_v3 }
0x1356   : > { %v1891_v9 = vadd.f32 1e-05, %v1890_v5 }
0x1358   : > { %2296 = vrsqrt.f32 %v1891_v9 }
0x1362   : > { %v2297_v10 = vpop.eup %2296 }
0x1363   : > { %v1893_v12 = vmul.f32 %v2297_v10, %v1885_v63 }
0x1365   : > { %v1900_v14 = vmul.f32 %v2018_v11, %v1893_v12 }
0x1367   : > { %v1907_v15 = vadd.f32 %v2019_v13, %v1900_v14 }
0x1369   : > { %1908 = vst.msk [vmem:[%s503_s17] sm:$0xff] %vm1669_vm5, %v1907_v15 }
0x136a PF: > { %s25_s18 = sadd.s32 1, %s2304_s18  }
0x136b   : > { %p22_p4 = scmp.ge.s32.totalorder %s25_s18, 4  }
0x136d   :  { %24 = sbr.rel (!%p22_p4) target bundleno = 1 (0x1), region = 113 }

// kernel: transformer_forward.7
= control target key start
LH: loop header
LB: loop body
LE: loop exit
PB: predicated region body
PF: predicated region fallthrough
CT: control target
= control target key end

     0   :  { %s4627_s0 = inlined_call_operand.vmem [shape: f32[2,8,32], index: 0, kind: input, shape index: {}]   ;;  %s4628_s1 = inlined_call_operand.vmem [shape: f32[2,8,32], index: 1, kind: input, shape index: {}]   ;;  %s4629_s2 = inlined_call_operand.vmem [shape: f32[2,1,8], index: 2, kind: input, shape index: {}]   ;;  %s4630_s3 = inlined_call_operand.vmem [shape: bf16[8,8], index: 3, kind: input, shape index: {}]   ;;  %s4631_s4 = inlined_call_operand.vmem [shape: bf16[8,8], index: 4, kind: input, shape index: {}]   ;;  %s4632_s5 = inlined_call_operand.vmem [shape: bf16[8,8], index: 5, kind: input, shape index: {}]   ;;  %s4633_s6 = inlined_call_operand.vmem [shape: bf16[32,32], index: 6, kind: input, shape index: {}]   ;;  %s4634_s7 = inlined_call_operand.vmem [shape: f32[1,32], index: 7, kind: input, shape index: {}]   ;;  %s4635_s8 = inlined_call_operand.vmem [shape: f32[1,32], index: 8, kind: input, shape index: {}]   ;;  %s4636_s9 = inlined_call_operand.vmem [shape: f32[1,32], index: 9, kind: input, shape index: {}]   ;;  %s4637_s10 = inlined_call_operand.vmem [shape: bf16[8,8], index: 10, kind: input, shape index: {}]   ;;  %s4638_s11 = inlined_call_operand.vmem [shape: bf16[8,8], index: 11, kind: input, shape index: {}]   ;;  %s4639_s12 = inlined_call_operand.vmem [shape: bf16[8,8], index: 12, kind: input, shape index: {}]   ;;  %s4640_s13 = inlined_call_operand.vmem [shape: bf16[32,32], index: 13, kind: input, shape index: {}]   ;;  %s4641_s14 = inlined_call_operand.vmem [shape: f32[1,32], index: 14, kind: input, shape index: {}]   ;;  %s4642_s15 = inlined_call_operand.vmem [shape: f32[1,32], index: 15, kind: input, shape index: {}]   ;;  %s4643_s16 = inlined_call_operand.vmem [shape: f32[1,32], index: 16, kind: input, shape index: {}]   ;;  %s4644_s17 = inlined_call_operand.vmem [shape: bf16[32,128], index: 17, kind: input, shape index: {}]   ;;  %s4645_s18 = inlined_call_operand.vmem [shape: f32[1,128], index: 18, kind: input, shape index: {}]   ;;  %s4646_s19 = inlined_call_operand.vmem [shape: bf16[128,32], index: 19, kind: input, shape index: {}]   ;;  %s4647_s20 = inlined_call_operand.vmem [shape: f32[1,32], index: 20, kind: input, shape index: {}]   ;;  %s4648_s21 = inlined_call_operand.vmem [shape: f32[1,32], index: 21, kind: input, shape index: {}]   ;;  %s4649_s22 = inlined_call_operand.vmem [shape: f32[1,32], index: 22, kind: input, shape index: {}]   ;;  %s4650_s23 = inlined_call_operand.vmem [shape: f32[2,8,32], index: 23, kind: output, shape index: {}]  }
   0x1   :  { %4652 = sst [smem:[#allocation2_spill]] %s4627_s0 }
   0x2   :  { %4653 = sst [smem:[#allocation3_spill]] %s4628_s1 }
   0x3   :  { %4654 = sst [smem:[#allocation4_spill]] %s4629_s2 }
   0x4   :  { %4655 = sst [smem:[#allocation5_spill]] %s4630_s3 }
   0x5   :  { %4656 = sst [smem:[#allocation6_spill]] %s4631_s4  ;;  %s4121_s4 = smov 0  }
   0x6   :  { %4657 = sst [smem:[#allocation7_spill]] %s4632_s5 }
   0x7   :  { %4658 = sst [smem:[#allocation8_spill]] %s4633_s6 }
   0x8   :  { %4659 = sst [smem:[#allocation9_spill]] %s4634_s7 }
   0x9 LB: > { %s3422_s30 = sadd.s32 4294967295, %s3993_s4   ;;  %p3426_p0 = scmp.ge.s32.totalorder %s3993_s4, 1  ;;  %s3993_s4 = sphi %s4121_s4, %s33_s4  }
   0xa   : > { %p653_p1 = scmp.lt.s32.totalorder %s3993_s4, 3 }
   0xc   : > { %p654_p2 = pnand %p3426_p0, %p653_p1 }
   0xd   : > { %s4660_s5 = sld [smem:[#allocation6_spill]] (!%p654_p2)  ;;  %vm759_vm0 = vcmask (!%p654_p2), 1043456   ;;  %p722_p3 = scmp.lt.s32.totalorder (!%p654_p2), %s3422_s30, 1  ;;  %v3995_v1 = vmov (!%p654_p2), 0.0   ;;  %vm3996_vm1 = vmmov (!%p654_p2), 0   ;;  %vm755_vm2 = vcmask (!%p654_p2), 64512  }
   0xe   : > { %657 = sbr.rel (%p654_p2) target bundleno = 9181 (0x23dd), region = 112  ;;  %3615 = vmatprep.subr.bf16.mxu1 (!%p654_p2), %v3995_v1  ;;  %3617 = vmatprep.mubr.msk.bf16.mxu1 (!%p654_p2), %vm3996_vm1, %v3995_v1  ;;  %s4661_s2 = sld [smem:[#allocation5_spill]] (!%p654_p2)  ;;  %v750_v26 = vlaneseq (!%p654_p2)  ;;  %vm1901_vm4 = vcmask (!%p654_p2), 261120  }
   0xf   : > { %3609 = vmatprep.subr.bf16.mxu0 (!%p654_p2), %v3995_v1  ;;  %s4662_s7 = sld [smem:[#allocation7_spill]] (!%p654_p2)  ;;  %3611 = vmatprep.mubr.msk.bf16.mxu0 (!%p654_p2), %vm3996_vm1, %v3995_v1  ;;  %s4663_s0 = sld [smem:[#allocation2_spill]] (!%p654_p2) }
  0x10   : > { %v4195_v27 = vshrl.u32 (!%p654_p2), %v750_v26, 7  ;;  %v4197_v28 = vand.u32 (!%p654_p2), 127, %v750_v26  ;;  %s3997_s25 = smov (!%p654_p2), 120   ;;  %s4664_s26 = sld [smem:[#allocation8_spill]] (!%p654_p2) }
  0x11   : > { %s3999_s3 = smov (!%p654_p2), 104   ;;  %s4665_s6 = sld [smem:[#allocation9_spill]] (!%p654_p2) }
  0x12   : > { %vm754_vm3 = vcmp.gt.s32.totalorder (!%p654_p2), %v4197_v28, %v4195_v27  ;;  %s4666_s1 = sld [smem:[#allocation3_spill]] (!%p654_p2)  ;;  %s4667_s27 = sld [smem:[#allocation4_spill]] (!%p654_p2) }
  0x13   : > { %v743_v0 = vld [vmem:[%s4660_s5] sm:$0xf] (!%p654_p2) }
  0x14   : > { %v4134_v2 = vsel (!%p654_p2), %vm759_vm0, %v743_v0, 0  ;;  %v742_v3 = vld [vmem:[%s4661_s2] sm:$0xf] (!%p654_p2)  ;;  %s3998_s2 = smov (!%p654_p2), 112  }
  0x15   : > { %3616 = vmatpush3.bf16.msra.mxu1 %v4134_v2  ;;  %s4669_s30 = smov (!%p722_p3, %s3422_s30), 1  ;;  %v4146_v4 = vsel %vm759_vm0, %v742_v3, 0  ;;  %v744_v5 = vld [vmem:[%s4662_s7] sm:$0xf] }
  0x16   : > { %3610 = vmatpush3.bf16.msra.mxu0 %v4146_v4  ;;  %s4155_s28 = sshll.u32 %s4669_s30, 3  ;;  %3639 = vmatprep.subr.bf16.mxu1 %v3995_v1  ;;  %v4166_v7 = vsel %vm759_vm0, %v744_v5, 0  ;;  %v748_v28 = vld [vmem:[%s4664_s26 + $0xc] sm:$0xf] }
  0x17   : > { %3621 = vmatprep.subr.bf16.mxu0 %v3995_v1  ;;  %s725_s24 = scalar_lea.vmem %s4663_s0, %s4155_s28 }
  0x18   : > { %v4163_v6 = vld [vmem:[%s725_s24] sm:$0xff]  ;;  %s732_s7 = scalar_lea.vmem %s4667_s27, %s4669_s30 }
  0x19   : > { %v4170_v8 = vpack.c.bf16 %v4163_v6, %v4163_v6 }
  0x1b   : > { %3618 = vmatmul.mubr.msk.bf16.vlgmr.msra.gmra.mrb[0].mxu1 %vm755_vm2, %v4170_v8  ;;  %3612 = vmatmul.mubr.msk.bf16.vlgmr.msra.gmra.mrb[0].mxu0 %vm755_vm2, %v4170_v8 }
  0x1c   : > { %3622 = vmatpush3.bf16.msra.mxu0 %v4166_v7  ;;  %3623 = vmatprep.mubr.msk.bf16.mxu0 %vm3996_vm1, %v3995_v1 }
  0x1d   : > { %3627 = vmatprep.subr.bf16.mxu0 %v3995_v1  ;;  %3640 = vmatpush3.bf16.msra.mxu1 %v4146_v4 }
  0x1e   : > { %3641 = vmatprep.mubr.msk.bf16.mxu1 %vm3996_vm1, %v3995_v1  ;;  %3651 = vmatprep.subr.bf16.mxu1 %v3995_v1 }
  0x1f   : > { %1000 = vrot.lane.b32.xlu1 %v4170_v8, %s3997_s25 }
  0x23   : > { %3624 = vmatmul.mubr.msk.bf16.vlgmr.msra.gmra.mrb[4].mxu0 %vm755_vm2, %v4170_v8 }
  0x24   : > { %3629 = vmatprep.mubr.msk.bf16.mxu0 %vm3996_vm1, %v3995_v1 }
  0x91   : > { %v1001_v41 = vpop.permute.xlu1 %1000 }
  0x92   : > { %3642 = vmatmul.mubr.msk.bf16.vlgmr.msra.gmra.mrb[4].mxu1 %vm755_vm2, %v1001_v41 }
  0x93   : > { %3652 = vmatpush3.bf16.msra.mxu1 %v4166_v7  ;;  %3653 = vmatprep.mubr.msk.bf16.mxu1 %vm3996_vm1, %v3995_v1 }
  0x94   : > { %3663 = vmatprep.subr.bf16.mxu1 %v3995_v1 }
  0x9a   : > { %3654 = vmatmul.mubr.msk.bf16.vlgmr.msra.gmra.mrb[8].mxu1 %vm755_vm2, %v1001_v41 }
  0x9b   : > { %3665 = vmatprep.mubr.msk.bf16.mxu1 %vm3996_vm1, %v3995_v1 }
  0xee   : > { %v840_v9 = vpop.f32.mrb[0].mxu1  ;;  %v797_v10 = vpop.f32.mrb[0].mxu0 }
  0xef   : > { %v890_v11 = vpack.c.bf16 %v840_v9, %v840_v9  ;;  %v3619_v12 = vpop.f32.mrb[1].mxu1  ;;  %v3613_v13 = vpop.f32.mrb[1].mxu0  ;;  %v889_v19 = vpack.c.bf16 %v797_v10, %v797_v10 }
  0xf0   : > { %v843_v14 = vpop.f32.mrb[2].mxu1  ;;  %v800_v15 = vpop.f32.mrb[2].mxu0 }
  0xf1   : > { %v895_v16 = vsel %vm755_vm2, %v890_v11, 0  ;;  %v3620_v17 = vpop.f32.mrb[3].mxu1  ;;  %v3614_v18 = vpop.f32.mrb[3].mxu0 }
  0xf2   : > { %3628 = vmatpush3.bf16.xpose.msra.mxu0 %v895_v16 }
  0xf3   : > { %3633 = vmatprep.subr.bf16.mxu0 %v3995_v1 }
  0xf6   : > { %v883_v20 = vpop.f32.mrb[4].mxu0 }
  0xf7   : > { %v951_v21 = vpack.c.bf16 %v883_v20, %v883_v20  ;;  %v3625_v22 = vpop.f32.mrb[5].mxu0 }
  0xf8   : > { %v886_v23 = vpop.f32.mrb[6].mxu0 }
  0xf9   : > { %3630 = vmatmul.mubr.msk.bf16.vlgmr.msra.gmra.mrb[8].mxu0 %vm755_vm2, %v889_v19  ;;  %v956_v24 = vsel %vm759_vm0, %v951_v21, 0  ;;  %v3626_v25 = vpop.f32.mrb[7].mxu0  ;;  %v746_v21 = vld [vmem:[%s4664_s26 + $0x4] sm:$0xf] }
  0xfa   : > { %3634 = vmatpush3.bf16.msra.mxu0 %v956_v24  ;;  %3635 = vmatprep.mubr.msk.bf16.mxu0 %vm3996_vm1, %v3995_v1  ;;  %v1239_v22 = vsel %vm759_vm0, %v746_v21, 0  ;;  %v745_v25 = vld [vmem:[%s4664_s26] sm:$0xf] }
  0xfb   : > { %3645 = vmatprep.subr.bf16.mxu0 %v3995_v1 }
 0x165   : > { %v1039_v46 = vpop.f32.mrb[4].mxu1 }
 0x166   : > { %v3643_v47 = vpop.f32.mrb[5].mxu1  ;;  %v1125_v5 = vpack.c.bf16 %v1039_v46, %v1039_v46 }
 0x167   : > { %v1042_v48 = vpop.f32.mrb[6].mxu1 }
 0x168   : > { %v3644_v49 = vpop.f32.mrb[7].mxu1 }
 0x16d   : > { %v1119_v50 = vpop.f32.mrb[8].mxu1 }
 0x16e   : > { %v1187_v51 = vpack.c.bf16 %v1119_v50, %v1119_v50  ;;  %v3655_v52 = vpop.f32.mrb[9].mxu1 }
 0x16f   : > { %v1122_v53 = vpop.f32.mrb[10].mxu1 }
 0x170   : > { %v1192_v54 = vsel %vm759_vm0, %v1187_v51, 0  ;;  %v3656_v55 = vpop.f32.mrb[11].mxu1 }
 0x171   : > { %3664 = vmatpush3.bf16.msra.mxu1 %v1192_v54 }
 0x172   : > { %3675 = vmatprep.subr.bf16.mxu1 %v3995_v1 }
 0x1cc   : > { %v931_v29 = vpop.f32.mrb[8].mxu0 }
 0x1cd   : > { %v937_v30 = vsel %vm754_vm3, -1e+20, %v931_v29  ;;  %v3631_v31 = vpop.f32.mrb[9].mxu0 }
 0x1ce   : > { %v938_v32 = vmul.f32 0.17677669, %v937_v30  ;;  %v934_v33 = vpop.f32.mrb[10].mxu0  ;;  %v1285_v30 = vsel %vm759_vm0, %v745_v25, 0 }
 0x1cf   : > { %v3632_v34 = vpop.f32.mrb[11].mxu0 }
 0x1d0   : > { %v939_v35 = vsel %vm755_vm2, %v938_v32, -inf }
 0x1d1   : > { %940 = vmax.xlane.f32.xlu0 %v939_v35 }
 0x25e   : > { %v941_v36 = vpop.xlane.xlu0 %940 }
 0x25f   : > { %v942_v37 = vsub.f32 %v938_v32, %v941_v36 }
 0x261   : > { %v943_v38 = vmul.f32 1.442695, %v942_v37 }
 0x263   : > { %3949 = vpow2.f32 %v943_v38 }
 0x26d   : > { %v3950_v39 = vpop.eup %3949 }
 0x26e   : > { %v945_v40 = vsel %vm755_vm2, %v3950_v39, 0.0 }
 0x26f   : > { %946 = vadd.xlane.f32.xlu0 %v945_v40 }
 0x2fc   : > { %v947_v42 = vpop.xlane.xlu0 %946 }
 0x2fd   : > { %3951 = vrcp.f32 %v947_v42 }
 0x307   : > { %v3952_v43 = vpop.eup %3951 }
 0x308   : > { %v949_v44 = vmul.f32 %v3952_v43, %v3950_v39 }
 0x30a   : > { %v950_v45 = vpack.c.bf16 %v949_v44, %v949_v44 }
 0x30c   : > { %3636 = vmatmul.mubr.msk.bf16.vlgmr.msra.gmra.mrb[12].mxu0 %vm755_vm2, %v950_v45 }
 0x30d   : > { %3646 = vmatpush3.bf16.msra.mxu0 %v4134_v2  ;;  %3647 = vmatprep.mubr.msk.bf16.mxu0 %vm3996_vm1, %v3995_v1 }
 0x30e   : > { %3657 = vmatprep.subr.bf16.mxu0 %v3995_v1 }
 0x314   : > { %3648 = vmatmul.mubr.msk.bf16.vlgmr.msra.gmra.mrb[16].mxu0 %vm755_vm2, %v1001_v41 }
 0x315   : > { %3659 = vmatprep.mubr.msk.bf16.mxu0 %vm3996_vm1, %v3995_v1 }
 0x3df   : > { %v992_v56 = vpop.f32.mrb[12].mxu0 }
 0x3e0   : > { %v3637_v57 = vpop.f32.mrb[13].mxu0  ;;  %v998_v31 = vpack.c.bf16 %v992_v56, %v992_v56 }
 0x3e1   : > { %v995_v58 = vpop.f32.mrb[14].mxu0 }
 0x3e2   : > { %v3638_v59 = vpop.f32.mrb[15].mxu0 }
 0x3e7   : > { %v1079_v60 = vpop.f32.mrb[16].mxu0 }
 0x3e8   : > { %v1126_v61 = vpack.c.bf16 %v1079_v60, %v1079_v60  ;;  %v3649_v62 = vpop.f32.mrb[17].mxu0 }
 0x3e9   : > { %v1082_v63 = vpop.f32.mrb[18].mxu0 }
 0x3ea   : > { %v1131_v0 = vsel %vm755_vm2, %v1126_v61, 0  ;;  %v3650_v3 = vpop.f32.mrb[19].mxu0 }
 0x3eb   : > { %3658 = vmatpush3.bf16.xpose.msra.mxu0 %v1131_v0 }
 0x3ec   : > { %3669 = vmatprep.subr.bf16.mxu0 %v3995_v1 }
 0x3f2   : > { %3660 = vmatmul.mubr.msk.bf16.vlgmr.msra.gmra.mrb[20].mxu0 %vm755_vm2, %v1125_v5 }
 0x3f3   : > { %3671 = vmatprep.mubr.msk.bf16.mxu0 %vm3996_vm1, %v3995_v1  ;;  %3670 = vmatpush3.bf16.msra.mxu0 %v1239_v22 }
 0x3f4   : > { %3681 = vmatprep.subr.bf16.mxu0 %v3995_v1 }
 0x4c5   : > { %v1167_v9 = vpop.f32.mrb[20].mxu0 }
 0x4c6   : > { %v1173_v10 = vsel %vm754_vm3, -1e+20, %v1167_v9  ;;  %v3661_v11 = vpop.f32.mrb[21].mxu0 }
 0x4c7   : > { %v1174_v12 = vmul.f32 0.17677669, %v1173_v10  ;;  %v1170_v13 = vpop.f32.mrb[22].mxu0 }
 0x4c8   : > { %v3662_v14 = vpop.f32.mrb[23].mxu0 }
 0x4c9   : > { %v1175_v15 = vsel %vm755_vm2, %v1174_v12, -inf }
 0x4ca   : > { %1176 = vmax.xlane.f32.xlu1 %v1175_v15 }
 0x557   : > { %v1177_v16 = vpop.xlane.xlu1 %1176 }
 0x558   : > { %v1178_v17 = vsub.f32 %v1174_v12, %v1177_v16 }
 0x55a   : > { %v1179_v18 = vmul.f32 1.442695, %v1178_v17 }
 0x55c   : > { %3953 = vpow2.f32 %v1179_v18  ;;  %v747_v18 = vld [vmem:[%s4664_s26 + $0x8] sm:$0xf] }
 0x566   : > { %v3954_v19 = vpop.eup %3953 }
 0x567   : > { %v1181_v20 = vsel %vm755_vm2, %v3954_v19, 0.0 }
 0x568   : > { %1182 = vadd.xlane.f32.xlu0 %v1181_v20 }
 0x57e   : > { %1327 = vrot.lane.b32.xlu0 %v4170_v8, %s3998_s2 }
 0x5f5   : > { %v1183_v23 = vpop.xlane.xlu0 %1182 }
 0x5f6   : > { %3955 = vrcp.f32 %v1183_v23 }
 0x5f9   : > { %v1328_v32 = vpop.permute.xlu0 %1327 }
 0x600   : > { %v3956_v24 = vpop.eup %3955 }
 0x601   : > { %v1185_v26 = vmul.f32 %v3956_v24, %v3954_v19  ;;  %v1566_v19 = vsel %vm759_vm0, %v747_v18, 0 }
 0x603   : > { %v1186_v29 = vpack.c.bf16 %v1185_v26, %v1185_v26 }
 0x605   : > { %3666 = vmatmul.mubr.msk.bf16.vlgmr.msra.gmra.mrb[12].mxu1 %vm755_vm2, %v1186_v29 }
 0x606   : > { %3676 = vmatpush3.bf16.msra.mxu1 %v1285_v30  ;;  %3677 = vmatprep.mubr.msk.bf16.mxu1 %vm3996_vm1, %v3995_v1 }
 0x607   : > { %3687 = vmatprep.subr.bf16.mxu1 %v3995_v1 }
 0x60d   : > { %3678 = vmatmul.mubr.msk.bf16.vlgmr.msra.gmra.mrb[16].mxu1 %vm755_vm2, %v998_v31 }
 0x60e   : > { %3688 = vmatpush3.bf16.msra.mxu1 %v4134_v2  ;;  %3689 = vmatprep.mubr.msk.bf16.mxu1 %vm3996_vm1, %v3995_v1 }
 0x60f   : > { %3699 = vmatprep.subr.bf16.mxu1 %v3995_v1 }
 0x615   : > { %3690 = vmatmul.mubr.msk.bf16.vlgmr.msra.gmra.mrb[20].mxu1 %vm755_vm2, %v1328_v32 }
 0x616   : > { %3701 = vmatprep.mubr.msk.bf16.mxu1 %vm3996_vm1, %v3995_v1 }
 0x6d8   : > { %v1228_v33 = vpop.f32.mrb[12].mxu1 }
 0x6d9   : > { %v1234_v34 = vpack.c.bf16 %v1228_v33, %v1228_v33  ;;  %v3667_v35 = vpop.f32.mrb[13].mxu1 }
 0x6da   : > { %v1231_v36 = vpop.f32.mrb[14].mxu1 }
 0x6db   : > { %v3668_v37 = vpop.f32.mrb[15].mxu1  ;;  %3672 = vmatmul.mubr.msk.bf16.vlgmr.msra.gmra.mrb[24].mxu0 %vm755_vm2, %v1234_v34 }
 0x6dc   : > { %3682 = vmatpush3.bf16.msra.mxu0 %v4146_v4  ;;  %3683 = vmatprep.mubr.msk.bf16.mxu0 %vm3996_vm1, %v3995_v1 }
 0x6dd   : > { %3693 = vmatprep.subr.bf16.mxu0 %v3995_v1 }
 0x6e0   : > { %v1321_v38 = vpop.f32.mrb[16].mxu1 }
 0x6e1   : > { %v3679_v39 = vpop.f32.mrb[17].mxu1 }
 0x6e2   : > { %v1324_v40 = vpop.f32.mrb[18].mxu1 }
 0x6e3   : > { %v3680_v41 = vpop.f32.mrb[19].mxu1  ;;  %3684 = vmatmul.mubr.msk.bf16.vlgmr.msra.gmra.mrb[28].mxu0 %vm755_vm2, %v1328_v32 }
 0x6e4   : > { %3694 = vmatpush3.bf16.msra.mxu0 %v4166_v7  ;;  %3695 = vmatprep.mubr.msk.bf16.mxu0 %vm3996_vm1, %v3995_v1 }
 0x6e5   : > { %3705 = vmatprep.subr.bf16.mxu0 %v3995_v1 }
 0x6e8   : > { %v1406_v42 = vpop.f32.mrb[20].mxu1 }
 0x6e9   : > { %v1453_v43 = vpack.c.bf16 %v1406_v42, %v1406_v42  ;;  %v3691_v44 = vpop.f32.mrb[21].mxu1 }
 0x6ea   : > { %v1409_v45 = vpop.f32.mrb[22].mxu1 }
 0x6eb   : > { %3696 = vmatmul.mubr.msk.bf16.vlgmr.msra.gmra.mrb[32].mxu0 %vm755_vm2, %v1328_v32  ;;  %v1458_v46 = vsel %vm755_vm2, %v1453_v43, 0  ;;  %v3692_v47 = vpop.f32.mrb[23].mxu1 }
 0x6ec   : > { %3700 = vmatpush3.bf16.xpose.msra.mxu1 %v1458_v46  ;;  %3707 = vmatprep.mubr.msk.bf16.mxu0 %vm3996_vm1, %v3995_v1 }
 0x6ed   : > { %3711 = vmatprep.subr.bf16.mxu1 %v3995_v1 }
 0x7ae   : > { %v1275_v48 = vpop.f32.mrb[24].mxu0 }
 0x7af   : > { %v4274_v49 = vadd.f32 %v1321_v38, %v1275_v48  ;;  %v3673_v50 = vpop.f32.mrb[25].mxu0 }
 0x7b0   : > { %v1278_v51 = vpop.f32.mrb[26].mxu0 }
 0x7b1   : > { %v3674_v52 = vpop.f32.mrb[27].mxu0 }
 0x7b6   : > { %v1366_v53 = vpop.f32.mrb[28].mxu0 }
 0x7b7   : > { %v1452_v54 = vpack.c.bf16 %v1366_v53, %v1366_v53  ;;  %v3685_v55 = vpop.f32.mrb[29].mxu0 }
 0x7b8   : > { %v1369_v56 = vpop.f32.mrb[30].mxu0 }
 0x7b9   : > { %v3686_v57 = vpop.f32.mrb[31].mxu0  ;;  %3702 = vmatmul.mubr.msk.bf16.vlgmr.msra.gmra.mrb[24].mxu1 %vm755_vm2, %v1452_v54 }
 0x7ba   : > { %3713 = vmatprep.mubr.msk.bf16.mxu1 %vm3996_vm1, %v3995_v1  ;;  %3712 = vmatpush3.bf16.msra.mxu1 %v1566_v19 }
 0x7bb   : > { %3723 = vmatprep.subr.bf16.mxu1 %v3995_v1 }
 0x7be   : > { %v1446_v58 = vpop.f32.mrb[32].mxu0 }
 0x7bf   : > { %v1514_v59 = vpack.c.bf16 %v1446_v58, %v1446_v58  ;;  %v3697_v60 = vpop.f32.mrb[33].mxu0 }
 0x7c0   : > { %v1449_v61 = vpop.f32.mrb[34].mxu0 }
 0x7c1   : > { %v1519_v62 = vsel %vm759_vm0, %v1514_v59, 0  ;;  %v3698_v63 = vpop.f32.mrb[35].mxu0 }
 0x7c2   : > { %3706 = vmatpush3.bf16.msra.mxu0 %v1519_v62  ;;  %v1848_v62 = vsel %vm759_vm0, %v748_v28, 0 }
 0x7c3   : > { %3717 = vmatprep.subr.bf16.mxu0 %v3995_v1 }
 0x88c   : > { %v1494_v0 = vpop.f32.mrb[24].mxu1 }
 0x88d   : > { %v1500_v3 = vsel %vm754_vm3, -1e+20, %v1494_v0  ;;  %v3703_v5 = vpop.f32.mrb[25].mxu1 }
 0x88e   : > { %v1501_v9 = vmul.f32 0.17677669, %v1500_v3  ;;  %v1497_v10 = vpop.f32.mrb[26].mxu1 }
 0x88f   : > { %v3704_v11 = vpop.f32.mrb[27].mxu1 }
 0x890   : > { %v1502_v12 = vsel %vm755_vm2, %v1501_v9, -inf }
 0x891   : > { %1503 = vmax.xlane.f32.xlu0 %v1502_v12 }
 0x91e   : > { %v1504_v13 = vpop.xlane.xlu0 %1503 }
 0x91f   : > { %v1505_v14 = vsub.f32 %v1501_v9, %v1504_v13 }
 0x921   : > { %v1506_v15 = vmul.f32 1.442695, %v1505_v14  ;;  %v3454_v14 = vld [vmem:[%s4665_s6] ss:$0 sm:$0xff]  ;;  %s729_s6 = scalar_lea.vmem %s4666_s1, %s4155_s28  ;;  %s736_s1 = scalar_lea.vmem %s4650_s23, %s4155_s28 }
 0x923   : > { %3957 = vpow2.f32 %v1506_v15 }
 0x92d   : > { %v3958_v16 = vpop.eup %3957 }
 0x92e   : > { %v1508_v17 = vsel %vm755_vm2, %v3958_v16, 0.0 }
 0x92f   : > { %1509 = vadd.xlane.f32.xlu1 %v1508_v17 }
 0x940   : > { %1609 = vrot.lane.b32.xlu1 %v4170_v8, %s3999_s3 }
 0x9bc   : > { %v1510_v20 = vpop.xlane.xlu1 %1509 }
 0x9bd   : > { %3959 = vrcp.f32 %v1510_v20 }
 0x9c0   : > { %v1610_v8 = vpop.permute.xlu1 %1609 }
 0x9c7   : > { %v3960_v21 = vpop.eup %3959 }
 0x9c8   : > { %v1512_v22 = vmul.f32 %v3960_v21, %v3958_v16 }
 0x9ca   : > { %v1513_v23 = vpack.c.bf16 %v1512_v22, %v1512_v22 }
 0x9cc   : > { %3708 = vmatmul.mubr.msk.bf16.vlgmr.msra.gmra.mrb[36].mxu0 %vm755_vm2, %v1513_v23 }
 0x9cd   : > { %3718 = vmatpush3.bf16.msra.mxu0 %v4146_v4  ;;  %3719 = vmatprep.mubr.msk.bf16.mxu0 %vm3996_vm1, %v3995_v1 }
 0x9ce   : > { %3729 = vmatprep.subr.bf16.mxu0 %v3995_v1 }
 0x9d4   : > { %3720 = vmatmul.mubr.msk.bf16.vlgmr.msra.gmra.mrb[40].mxu0 %vm755_vm2, %v1610_v8 }
 0x9d5   : > { %3730 = vmatpush3.bf16.msra.mxu0 %v4166_v7  ;;  %3731 = vmatprep.mubr.msk.bf16.mxu0 %vm3996_vm1, %v3995_v1 }
 0x9d6   : > { %3741 = vmatprep.subr.bf16.mxu0 %v3995_v1 }
 0x9dc   : > { %3732 = vmatmul.mubr.msk.bf16.vlgmr.msra.gmra.mrb[44].mxu0 %vm755_vm2, %v1610_v8 }
 0x9dd   : > { %3743 = vmatprep.mubr.msk.bf16.mxu0 %vm3996_vm1, %v3995_v1 }
 0xa9f   : > { %v1555_v4 = vpop.f32.mrb[36].mxu0 }
 0xaa0   : > { %v1561_v24 = vpack.c.bf16 %v1555_v4, %v1555_v4  ;;  %v3709_v25 = vpop.f32.mrb[37].mxu0 }
 0xaa1   : > { %v1558_v26 = vpop.f32.mrb[38].mxu0 }
 0xaa2   : > { %v3710_v29 = vpop.f32.mrb[39].mxu0  ;;  %3714 = vmatmul.mubr.msk.bf16.vlgmr.msra.gmra.mrb[28].mxu1 %vm755_vm2, %v1561_v24  ;;  %v1933_v26 = vld [vmem:[%s4638_s11] sm:$0xf] }
 0xaa3   : > { %3724 = vmatpush3.bf16.msra.mxu1 %v4134_v2  ;;  %3725 = vmatprep.mubr.msk.bf16.mxu1 %vm3996_vm1, %v3995_v1  ;;  %v4348_v29 = vsel %vm759_vm0, %v1933_v26, 0 }
 0xaa4   : > { %3735 = vmatprep.subr.bf16.mxu1 %v3995_v1 }
 0xaa7   : > { %v1648_v7 = vpop.f32.mrb[40].mxu0 }
 0xaa8   : > { %v3721_v30 = vpop.f32.mrb[41].mxu0  ;;  %v1734_v50 = vpack.c.bf16 %v1648_v7, %v1648_v7 }
 0xaa9   : > { %v1651_v31 = vpop.f32.mrb[42].mxu0  ;;  %v739_v30 = vld [vmem:[%s729_s6] sm:$0xff] }
 0xaaa   : > { %3726 = vmatmul.mubr.msk.bf16.vlgmr.msra.gmra.mrb[32].mxu1 %vm755_vm2, %v1610_v8  ;;  %v3722_v32 = vpop.f32.mrb[43].mxu0  ;;  %v4363_v31 = vpack.c.bf16 %v739_v30, %v739_v30 }
 0xaab   : > { %3737 = vmatprep.mubr.msk.bf16.mxu1 %vm3996_vm1, %v3995_v1 }
 0xaaf   : > { %v1728_v33 = vpop.f32.mrb[44].mxu0 }
 0xab0   : > { %v1796_v34 = vpack.c.bf16 %v1728_v33, %v1728_v33  ;;  %v3733_v35 = vpop.f32.mrb[45].mxu0 }
 0xab1   : > { %v1731_v36 = vpop.f32.mrb[46].mxu0 }
 0xab2   : > { %v1801_v2 = vsel %vm759_vm0, %v1796_v34, 0  ;;  %v3734_v37 = vpop.f32.mrb[47].mxu0  ;;  %v3455_v36 = vld [vmem:[%s4635_s8] ss:$0 sm:$0xff] }
 0xab3   : > { %3742 = vmatpush3.bf16.msra.mxu0 %v1801_v2  ;;  %v3456_v37 = vld [vmem:[%s4636_s9] ss:$0 sm:$0xff] }
 0xab4   : > { %3753 = vmatprep.subr.bf16.mxu0 %v3995_v1 }
 0xb75   : > { %v1602_v38 = vpop.f32.mrb[28].mxu1 }
 0xb76   : > { %v1608_v39 = vadd.f32 %v1602_v38, %v4274_v49  ;;  %v3715_v40 = vpop.f32.mrb[29].mxu1 }
 0xb77   : > { %v1605_v41 = vpop.f32.mrb[30].mxu1 }
 0xb78   : > { %v3716_v42 = vpop.f32.mrb[31].mxu1 }
 0xb7d   : > { %v1688_v43 = vpop.f32.mrb[32].mxu1 }
 0xb7e   : > { %v1735_v44 = vpack.c.bf16 %v1688_v43, %v1688_v43  ;;  %v3727_v45 = vpop.f32.mrb[33].mxu1 }
 0xb7f   : > { %v1691_v46 = vpop.f32.mrb[34].mxu1 }
 0xb80   : > { %v1740_v47 = vsel %vm755_vm2, %v1735_v44, 0  ;;  %v3728_v48 = vpop.f32.mrb[35].mxu1 }
 0xb81   : > { %3736 = vmatpush3.bf16.xpose.msra.mxu1 %v1740_v47 }
 0xb82   : > { %3747 = vmatprep.subr.bf16.mxu1 %v3995_v1 }
 0xb88   : > { %3738 = vmatmul.mubr.msk.bf16.vlgmr.msra.gmra.mrb[36].mxu1 %vm755_vm2, %v1734_v50 }
 0xb89   : > { %3749 = vmatprep.mubr.msk.bf16.mxu1 %vm3996_vm1, %v3995_v1  ;;  %3748 = vmatpush3.bf16.msra.mxu1 %v1848_v62 }
 0xb8a   : > { %3759 = vmatprep.subr.bf16.mxu1 %v3995_v1 }
 0xc5b   : > { %v1776_v49 = vpop.f32.mrb[36].mxu1 }
 0xc5c   : > { %v1782_v51 = vsel %vm754_vm3, -1e+20, %v1776_v49  ;;  %v3739_v52 = vpop.f32.mrb[37].mxu1 }
 0xc5d   : > { %v1783_v53 = vmul.f32 0.17677669, %v1782_v51  ;;  %v1779_v54 = vpop.f32.mrb[38].mxu1  ;;  %v1934_v52 = vld [vmem:[%s4639_s12] sm:$0xf] }
 0xc5e   : > { %v3740_v55 = vpop.f32.mrb[39].mxu1  ;;  %v740_v54 = vld [vmem:[%s732_s7] sm:$0x1] }
 0xc5f   : > { %v1784_v56 = vsel %vm755_vm2, %v1783_v53, -inf  ;;  %vm1940_vm5 = vcmp.eq.f32.partialorder %v740_v54, 0.0  ;;  %v2127_v55 = vsub.s32 0, %v4195_v27 }
 0xc60   : > { %1785 = vmax.xlane.f32.xlu1 %v1784_v56  ;;  %v4000_v56 = vmov 0  }
 0xc71   : > { %2193 = vrot.lane.b32.xlu1 %v4363_v31, %s3997_s25 }
 0xced   : > { %v1786_v57 = vpop.xlane.xlu1 %1785 }
 0xcee   : > { %v1787_v58 = vsub.f32 %v1783_v53, %v1786_v57  ;;  %v4399_v53 = vsel %vm759_vm0, %v1934_v52, 0  ;;  %v2124_v57 = vsel %vm1940_vm5, 1, %v4000_v56 }
 0xcf0   : > { %v1788_v59 = vmul.f32 1.442695, %v1787_v58  ;;  %v4412_v58 = vrot.slane %v2124_v57, %v2127_v55 }
 0xcf2   : > { %3961 = vpow2.f32 %v1788_v59  ;;  %vm2129_vm6 = vcmp.eq.s32.totalorder %v4412_v58, 1  ;;  %v1938_v58 = vld [vmem:[%s4640_s13 + $0xc] sm:$0xf] }
 0xcfc   : > { %v3962_v60 = vpop.eup %3961 }
 0xcfd   : > { %v1790_v61 = vsel %vm755_vm2, %v3962_v60, 0.0 }
 0xcfe   : > { %1791 = vadd.xlane.f32.xlu0 %v1790_v61 }
 0xd8b   : > { %v1792_v63 = vpop.xlane.xlu0 %1791 }
 0xd8c   : > { %3963 = vrcp.f32 %v1792_v63 }
 0xd96   : > { %v3964_v0 = vpop.eup %3963 }
 0xd97   : > { %v1794_v3 = vmul.f32 %v3964_v0, %v3962_v60 }
 0xd99   : > { %v1795_v5 = vpack.c.bf16 %v1794_v3, %v1794_v3 }
 0xd9b   : > { %3744 = vmatmul.mubr.msk.bf16.vlgmr.msra.gmra.mrb[48].mxu0 %vm755_vm2, %v1795_v5 }
 0xd9c   : > { %3755 = vmatprep.mubr.msk.bf16.mxu0 %vm3996_vm1, %v3995_v1 }
 0xe6e   : > { %v1837_v9 = vpop.f32.mrb[48].mxu0 }
 0xe6f   : > { %v1843_v10 = vpack.c.bf16 %v1837_v9, %v1837_v9  ;;  %v3745_v11 = vpop.f32.mrb[49].mxu0 }
 0xe70   : > { %v1840_v12 = vpop.f32.mrb[50].mxu0 }
 0xe71   : > { %v3746_v13 = vpop.f32.mrb[51].mxu0  ;;  %3750 = vmatmul.mubr.msk.bf16.vlgmr.msra.gmra.mrb[40].mxu1 %vm755_vm2, %v1843_v10 }
 0xe72   : > { %3761 = vmatprep.mubr.msk.bf16.mxu1 %vm3996_vm1, %v3995_v1  ;;  %3760 = vmatpush3.bf16.msra.mxu1 %v4348_v29 }
 0xe73   : > { %3771 = vmatprep.subr.bf16.mxu1 %v3995_v1 }
 0xf44   : > { %v1884_v15 = vpop.f32.mrb[40].mxu1 }
 0xf45   : > { %v1890_v16 = vadd.f32 %v1884_v15, %v1608_v39  ;;  %v3751_v17 = vpop.f32.mrb[41].mxu1 }
 0xf46   : > { %v1887_v18 = vpop.f32.mrb[42].mxu1  ;;  %v2194_v17 = vpop.permute.xlu1 %2193 }
 0xf47   : > { %v1897_v19 = vadd.f32 %v3454_v14, %v1890_v16  ;;  %v3752_v20 = vpop.f32.mrb[43].mxu1 }
 0xf49   : > { %v1898_v21 = vadd.f32 %v1897_v19, %v4163_v6  ;;  %v1932_v6 = vld [vmem:[%s4637_s10] sm:$0xf] }
 0xf4a   : > { %v4360_v7 = vsel %vm759_vm0, %v1932_v6, 0 }
 0xf4b   : > { %v1902_v22 = vsel %vm1901_vm4, %v1898_v21, 0.0  ;;  %3754 = vmatpush3.bf16.msra.mxu0 %v4360_v7 }
 0xf4c   : > { %1903 = vadd.xlane.f32.xlu0 %v1902_v22  ;;  %3765 = vmatprep.subr.bf16.mxu0 %v3995_v1 }
 0xf4e   : > { %3756 = vmatmul.mubr.msk.bf16.vlgmr.msra.gmra.mrb[52].mxu0 %vm755_vm2, %v4363_v31 }
 0xf4f   : > { %3767 = vmatprep.mubr.msk.bf16.mxu0 %vm3996_vm1, %v3995_v1  ;;  %3766 = vmatpush3.bf16.msra.mxu0 %v4399_v53 }
 0xf50   : > { %3777 = vmatprep.subr.bf16.mxu0 %v3995_v1 }
 0xf56   : > { %3768 = vmatmul.mubr.msk.bf16.vlgmr.msra.gmra.mrb[56].mxu0 %vm755_vm2, %v4363_v31 }
 0xf57   : > { %3779 = vmatprep.mubr.msk.bf16.mxu0 %vm3996_vm1, %v3995_v1 }
 0xfd9   : > { %v1904_v23 = vpop.xlane.xlu0 %1903 }
 0xfda   : > { %v1906_v8 = vmul.f32 0.03125, %v1904_v23 }
 0xfdc   : > { %v1907_v4 = vsub.f32 %v1898_v21, %v1906_v8 }
 0xfde   : > { %v1908_v24 = vmul.f32 %v1907_v4, %v1907_v4 }
 0xfe0   : > { %v1909_v25 = vsel %vm1901_vm4, %v1908_v24, 0.0 }
 0xfe1   : > { %1910 = vadd.xlane.f32.xlu0 %v1909_v25 }
0x1021   : > { %v1981_v41 = vpop.f32.mrb[52].mxu0 }
0x1022   : > { %v3757_v42 = vpop.f32.mrb[53].mxu0  ;;  %v2076_v51 = vpack.c.bf16 %v1981_v41, %v1981_v41 }
0x1023   : > { %v1984_v43 = vpop.f32.mrb[54].mxu0 }
0x1024   : > { %v3758_v44 = vpop.f32.mrb[55].mxu0 }
0x1029   : > { %v2070_v11 = vpop.f32.mrb[56].mxu0 }
0x102a   : > { %v3769_v12 = vpop.f32.mrb[57].mxu0  ;;  %v2144_v15 = vpack.c.bf16 %v2070_v11, %v2070_v11 }
0x102b   : > { %v2073_v13 = vpop.f32.mrb[58].mxu0 }
0x102c   : > { %v3770_v14 = vpop.f32.mrb[59].mxu0  ;;  %v2149_v16 = vsel %vm759_vm0, %v2144_v15, 0 }
0x102d   : > { %3778 = vmatpush3.bf16.msra.mxu0 %v2149_v16 }
0x102e   : > { %3789 = vmatprep.subr.bf16.mxu0 %v3995_v1 }
0x106e   : > { %v1911_v32 = vpop.xlane.xlu0 %1910 }
0x106f   : > { %v1912_v33 = vmul.f32 0.03125, %v1911_v32 }
0x1071   : > { %v1913_v34 = vadd.f32 1e-05, %v1912_v33 }
0x1073   : > { %3965 = vrsqrt.f32 %v1913_v34 }
0x107d   : > { %v3966_v35 = vpop.eup %3965 }
0x107e   : > { %v1915_v2 = vmul.f32 %v3966_v35, %v1907_v4 }
0x1080   : > { %v1922_v38 = vmul.f32 %v3455_v36, %v1915_v2 }
0x1082   : > { %v4378_v39 = vadd.f32 %v3456_v37, %v1922_v38 }
0x1084   : > { %v4382_v40 = vpack.c.bf16 %v4378_v39, %v4378_v39 }
0x1086   : > { %3762 = vmatmul.mubr.msk.bf16.vlgmr.msra.gmra.mrb[44].mxu1 %vm755_vm2, %v4382_v40 }
0x1087   : > { %3773 = vmatprep.mubr.msk.bf16.mxu1 %vm3996_vm1, %v3995_v1 }
0x1159   : > { %v2027_v45 = vpop.f32.mrb[44].mxu1 }
0x115a   : > { %v2077_v46 = vpack.c.bf16 %v2027_v45, %v2027_v45  ;;  %v3763_v47 = vpop.f32.mrb[45].mxu1 }
0x115b   : > { %v2030_v48 = vpop.f32.mrb[46].mxu1 }
0x115c   : > { %v2082_v50 = vsel %vm755_vm2, %v2077_v46, 0  ;;  %v3764_v49 = vpop.f32.mrb[47].mxu1 }
0x115d   : > { %3772 = vmatpush3.bf16.xpose.msra.mxu1 %v2082_v50 }
0x115e   : > { %3783 = vmatprep.subr.bf16.mxu1 %v3995_v1 }
0x1164   : > { %3774 = vmatmul.mubr.msk.bf16.vlgmr.msra.gmra.mrb[48].mxu1 %vm755_vm2, %v2076_v51 }
0x1165   : > { %3784 = vmatpush3.bf16.msra.mxu1 %v4360_v7  ;;  %3785 = vmatprep.mubr.msk.bf16.mxu1 %vm3996_vm1, %v3995_v1 }
0x1166   : > { %3795 = vmatprep.subr.bf16.mxu1 %v3995_v1 }
0x116c   : > { %3786 = vmatmul.mubr.msk.bf16.vlgmr.msra.gmra.mrb[52].mxu1 %vm755_vm2, %v2194_v17 }
0x116d   : > { %3796 = vmatpush3.bf16.msra.mxu1 %v4399_v53  ;;  %3797 = vmatprep.mubr.msk.bf16.mxu1 %vm3996_vm1, %v3995_v1 }
0x116e   : > { %3807 = vmatprep.subr.bf16.mxu1 %v3995_v1 }
0x1174   : > { %3798 = vmatmul.mubr.msk.bf16.vlgmr.msra.gmra.mrb[56].mxu1 %vm755_vm2, %v2194_v17 }
0x1175   : > { %3809 = vmatprep.mubr.msk.bf16.mxu1 %vm3996_vm1, %v3995_v1 }
0x1237   : > { %v2118_v59 = vpop.f32.mrb[48].mxu1 }
0x1238   : > { %v2130_v60 = vsel %vm2129_vm6, -1e+20, %v2118_v59  ;;  %v3775_v61 = vpop.f32.mrb[49].mxu1 }
0x1239   : > { %v2131_v28 = vmul.f32 0.17677669, %v2130_v60  ;;  %v2121_v62 = vpop.f32.mrb[50].mxu1  ;;  %v1936_v60 = vld [vmem:[%s4640_s13 + $0x4] sm:$0xf] }
0x123a   : > { %v3776_v63 = vpop.f32.mrb[51].mxu1  ;;  %v2438_v61 = vsel %vm759_vm0, %v1936_v60, 0 }
0x123b   : > { %v2132_v0 = vsel %vm755_vm2, %v2131_v28, -inf  ;;  %v1935_v63 = vld [vmem:[%s4640_s13] sm:$0xf] }
0x123c   : > { %2133 = vmax.xlane.f32.xlu0 %v2132_v0 }
0x123f   : > { %v2232_v23 = vpop.f32.mrb[52].mxu1 }
0x1240   : > { %v3787_v8 = vpop.f32.mrb[53].mxu1  ;;  %v2324_v45 = vpack.c.bf16 %v2232_v23, %v2232_v23 }
0x1241   : > { %v2235_v4 = vpop.f32.mrb[54].mxu1 }
0x1242   : > { %v3788_v24 = vpop.f32.mrb[55].mxu1 }
0x1247   : > { %v2318_v25 = vpop.f32.mrb[56].mxu1 }
0x1248   : > { %v2386_v26 = vpack.c.bf16 %v2318_v25, %v2318_v25  ;;  %v3799_v6 = vpop.f32.mrb[57].mxu1 }
0x1249   : > { %v2321_v30 = vpop.f32.mrb[58].mxu1 }
0x124a   : > { %v2391_v32 = vsel %vm759_vm0, %v2386_v26, 0  ;;  %v3800_v33 = vpop.f32.mrb[59].mxu1 }
0x124b   : > { %3808 = vmatpush3.bf16.msra.mxu1 %v2391_v32 }
0x124c   : > { %3819 = vmatprep.subr.bf16.mxu1 %v3995_v1 }
0x12c9   : > { %v2134_v3 = vpop.xlane.xlu0 %2133 }
0x12ca   : > { %v2135_v5 = vsub.f32 %v2131_v28, %v2134_v3 }
0x12cc   : > { %v2136_v27 = vmul.f32 1.442695, %v2135_v5  ;;  %v2484_v5 = vsel %vm759_vm0, %v1935_v63, 0 }
0x12ce   : > { %3967 = vpow2.f32 %v2136_v27 }
0x12d8   : > { %v3968_v9 = vpop.eup %3967 }
0x12d9   : > { %v2138_v10 = vsel %vm755_vm2, %v3968_v9, 0.0 }
0x12da   : > { %2139 = vadd.xlane.f32.xlu0 %v2138_v10 }
0x12f0   : > { %2239 = vrot.lane.b32.xlu0 %v4382_v40, %s3997_s25 }
0x1367   : > { %v2140_v18 = vpop.xlane.xlu0 %2139 }
0x1368   : > { %3969 = vrcp.f32 %v2140_v18 }
0x136b   : > { %v2240_v22 = vpop.permute.xlu0 %2239 }
0x1372   : > { %v3970_v19 = vpop.eup %3969 }
0x1373   : > { %v2142_v20 = vmul.f32 %v3970_v19, %v3968_v9 }
0x1375   : > { %v2143_v21 = vpack.c.bf16 %v2142_v20, %v2142_v20 }
0x1377   : > { %3780 = vmatmul.mubr.msk.bf16.vlgmr.msra.gmra.mrb[60].mxu0 %vm755_vm2, %v2143_v21 }
0x1378   : > { %3790 = vmatpush3.bf16.msra.mxu0 %v4348_v29  ;;  %3791 = vmatprep.mubr.msk.bf16.mxu0 %vm3996_vm1, %v3995_v1 }
0x1379   : > { %3801 = vmatprep.subr.bf16.mxu0 %v3995_v1 }
0x137f   : > { %3792 = vmatmul.mubr.msk.bf16.vlgmr.msra.gmra.mrb[64].mxu0 %vm755_vm2, %v2240_v22 }
0x1380   : > { %3803 = vmatprep.mubr.msk.bf16.mxu0 %vm3996_vm1, %v3995_v1 }
0x144a   : > { %v2185_v34 = vpop.f32.mrb[60].mxu0 }
0x144b   : > { %v3781_v35 = vpop.f32.mrb[61].mxu0  ;;  %v2191_v27 = vpack.c.bf16 %v2185_v34, %v2185_v34 }
0x144c   : > { %v2188_v36 = vpop.f32.mrb[62].mxu0 }
0x144d   : > { %v3782_v2 = vpop.f32.mrb[63].mxu0 }
0x1452   : > { %v2278_v37 = vpop.f32.mrb[64].mxu0 }
0x1453   : > { %v2325_v38 = vpack.c.bf16 %v2278_v37, %v2278_v37  ;;  %v3793_v41 = vpop.f32.mrb[65].mxu0 }
0x1454   : > { %v2281_v42 = vpop.f32.mrb[66].mxu0 }
0x1455   : > { %v2330_v43 = vsel %vm755_vm2, %v2325_v38, 0  ;;  %v3794_v44 = vpop.f32.mrb[67].mxu0 }
0x1456   : > { %3802 = vmatpush3.bf16.xpose.msra.mxu0 %v2330_v43 }
0x1457   : > { %3813 = vmatprep.subr.bf16.mxu0 %v3995_v1 }
0x145d   : > { %3804 = vmatmul.mubr.msk.bf16.vlgmr.msra.gmra.mrb[68].mxu0 %vm755_vm2, %v2324_v45 }
0x145e   : > { %3815 = vmatprep.mubr.msk.bf16.mxu0 %vm3996_vm1, %v3995_v1  ;;  %3814 = vmatpush3.bf16.msra.mxu0 %v2438_v61 }
0x145f   : > { %3825 = vmatprep.subr.bf16.mxu0 %v3995_v1 }
0x1530   : > { %v2366_v46 = vpop.f32.mrb[68].mxu0 }
0x1531   : > { %v2372_v47 = vsel %vm2129_vm6, -1e+20, %v2366_v46  ;;  %v3805_v48 = vpop.f32.mrb[69].mxu0 }
0x1532   : > { %v2373_v50 = vmul.f32 0.17677669, %v2372_v47  ;;  %v2369_v49 = vpop.f32.mrb[70].mxu0 }
0x1533   : > { %v3806_v51 = vpop.f32.mrb[71].mxu0 }
0x1534   : > { %v2374_v52 = vsel %vm755_vm2, %v2373_v50, -inf }
0x1535   : > { %2375 = vmax.xlane.f32.xlu0 %v2374_v52 }
0x154b   : > { %2571 = vrot.lane.b32.xlu0 %v4382_v40, %s3998_s2 }
0x15c2   : > { %v2376_v54 = vpop.xlane.xlu0 %2375 }
0x15c3   : > { %v2377_v55 = vsub.f32 %v2373_v50, %v2376_v54 }
0x15c5   : > { %v2378_v56 = vmul.f32 1.442695, %v2377_v55 }
0x15c6   : > { %v2572_v9 = vpop.permute.xlu0 %2571 }
0x15c7   : > { %3971 = vpow2.f32 %v2378_v56 }
0x15d1   : > { %v3972_v57 = vpop.eup %3971 }
0x15d2   : > { %v2380_v59 = vsel %vm755_vm2, %v3972_v57, 0.0 }
0x15d3   : > { %2381 = vadd.xlane.f32.xlu1 %v2380_v59 }
0x15e4   : > { %2526 = vrot.lane.b32.xlu1 %v4363_v31, %s3998_s2 }
0x1660   : > { %v2382_v28 = vpop.xlane.xlu1 %2381 }
0x1661   : > { %3973 = vrcp.f32 %v2382_v28 }
0x1664   : > { %v2527_v16 = vpop.permute.xlu1 %2526 }
0x166b   : > { %v3974_v62 = vpop.eup %3973 }
0x166c   : > { %v2384_v0 = vmul.f32 %v3974_v62, %v3972_v57  ;;  %v1937_v57 = vld [vmem:[%s4640_s13 + $0x8] sm:$0xf] }
0x166d   : > { %v2770_v59 = vsel %vm759_vm0, %v1937_v57, 0 }
0x166e   : > { %v2385_v3 = vpack.c.bf16 %v2384_v0, %v2384_v0 }
0x1670   : > { %3810 = vmatmul.mubr.msk.bf16.vlgmr.msra.gmra.mrb[60].mxu1 %vm755_vm2, %v2385_v3 }
0x1671   : > { %3820 = vmatpush3.bf16.msra.mxu1 %v2484_v5  ;;  %3821 = vmatprep.mubr.msk.bf16.mxu1 %vm3996_vm1, %v3995_v1 }
0x1672   : > { %3831 = vmatprep.subr.bf16.mxu1 %v3995_v1 }
0x1678   : > { %3822 = vmatmul.mubr.msk.bf16.vlgmr.msra.gmra.mrb[64].mxu1 %vm755_vm2, %v2191_v27 }
0x1679   : > { %3832 = vmatpush3.bf16.msra.mxu1 %v4348_v29  ;;  %3833 = vmatprep.mubr.msk.bf16.mxu1 %vm3996_vm1, %v3995_v1 }
0x167a   : > { %3843 = vmatprep.subr.bf16.mxu1 %v3995_v1 }
0x1680   : > { %3834 = vmatmul.mubr.msk.bf16.vlgmr.msra.gmra.mrb[68].mxu1 %vm755_vm2, %v2572_v9 }
0x1681   : > { %3845 = vmatprep.mubr.msk.bf16.mxu1 %vm3996_vm1, %v3995_v1 }
0x1743   : > { %v2427_v10 = vpop.f32.mrb[60].mxu1 }
0x1744   : > { %v2433_v11 = vpack.c.bf16 %v2427_v10, %v2427_v10  ;;  %v3811_v12 = vpop.f32.mrb[61].mxu1 }
0x1745   : > { %v2430_v13 = vpop.f32.mrb[62].mxu1 }
0x1746   : > { %v3812_v14 = vpop.f32.mrb[63].mxu1  ;;  %3816 = vmatmul.mubr.msk.bf16.vlgmr.msra.gmra.mrb[72].mxu0 %vm755_vm2, %v2433_v11 }
0x1747   : > { %3826 = vmatpush3.bf16.msra.mxu0 %v4360_v7  ;;  %3827 = vmatprep.mubr.msk.bf16.mxu0 %vm3996_vm1, %v3995_v1 }
0x1748   : > { %3837 = vmatprep.subr.bf16.mxu0 %v3995_v1 }
0x174b   : > { %v2520_v15 = vpop.f32.mrb[64].mxu1 }
0x174c   : > { %v3823_v17 = vpop.f32.mrb[65].mxu1 }
0x174d   : > { %v2523_v18 = vpop.f32.mrb[66].mxu1 }
0x174e   : > { %v3824_v19 = vpop.f32.mrb[67].mxu1  ;;  %3828 = vmatmul.mubr.msk.bf16.vlgmr.msra.gmra.mrb[76].mxu0 %vm755_vm2, %v2527_v16 }
0x174f   : > { %3838 = vmatpush3.bf16.msra.mxu0 %v4399_v53  ;;  %3839 = vmatprep.mubr.msk.bf16.mxu0 %vm3996_vm1, %v3995_v1 }
0x1750   : > { %3849 = vmatprep.subr.bf16.mxu0 %v3995_v1 }
0x1753   : > { %v2610_v20 = vpop.f32.mrb[68].mxu1 }
0x1754   : > { %v2657_v21 = vpack.c.bf16 %v2610_v20, %v2610_v20  ;;  %v3835_v22 = vpop.f32.mrb[69].mxu1 }
0x1755   : > { %v2613_v23 = vpop.f32.mrb[70].mxu1 }
0x1756   : > { %v2662_v8 = vsel %vm755_vm2, %v2657_v21, 0  ;;  %v3836_v4 = vpop.f32.mrb[71].mxu1  ;;  %3840 = vmatmul.mubr.msk.bf16.vlgmr.msra.gmra.mrb[80].mxu0 %vm755_vm2, %v2527_v16 }
0x1757   : > { %3844 = vmatpush3.bf16.xpose.msra.mxu1 %v2662_v8  ;;  %3851 = vmatprep.mubr.msk.bf16.mxu0 %vm3996_vm1, %v3995_v1 }
0x1758   : > { %3855 = vmatprep.subr.bf16.mxu1 %v3995_v1 }
0x1819   : > { %v2474_v24 = vpop.f32.mrb[72].mxu0 }
0x181a   : > { %v4490_v25 = vadd.f32 %v2520_v15, %v2474_v24  ;;  %v3817_v26 = vpop.f32.mrb[73].mxu0 }
0x181b   : > { %v2477_v6 = vpop.f32.mrb[74].mxu0 }
0x181c   : > { %v3818_v30 = vpop.f32.mrb[75].mxu0 }
0x1821   : > { %v2565_v32 = vpop.f32.mrb[76].mxu0 }
0x1822   : > { %v2656_v33 = vpack.c.bf16 %v2565_v32, %v2565_v32  ;;  %v3829_v34 = vpop.f32.mrb[77].mxu0 }
0x1823   : > { %v2568_v35 = vpop.f32.mrb[78].mxu0 }
0x1824   : > { %v3830_v36 = vpop.f32.mrb[79].mxu0  ;;  %3846 = vmatmul.mubr.msk.bf16.vlgmr.msra.gmra.mrb[72].mxu1 %vm755_vm2, %v2656_v33 }
0x1825   : > { %3857 = vmatprep.mubr.msk.bf16.mxu1 %vm3996_vm1, %v3995_v1  ;;  %3856 = vmatpush3.bf16.msra.mxu1 %v2770_v59 }
0x1826   : > { %3867 = vmatprep.subr.bf16.mxu1 %v3995_v1 }
0x1829   : > { %v2650_v2 = vpop.f32.mrb[80].mxu0 }
0x182a   : > { %v2718_v37 = vpack.c.bf16 %v2650_v2, %v2650_v2  ;;  %v3841_v38 = vpop.f32.mrb[81].mxu0 }
0x182b   : > { %v2653_v41 = vpop.f32.mrb[82].mxu0 }
0x182c   : > { %v2723_v42 = vsel %vm759_vm0, %v2718_v37, 0  ;;  %v3842_v43 = vpop.f32.mrb[83].mxu0 }
0x182d   : > { %3850 = vmatpush3.bf16.msra.mxu0 %v2723_v42  ;;  %v3057_v42 = vsel %vm759_vm0, %v1938_v58, 0 }
0x182e   : > { %3861 = vmatprep.subr.bf16.mxu0 %v3995_v1 }
0x18f7   : > { %v2698_v44 = vpop.f32.mrb[72].mxu1 }
0x18f8   : > { %v2704_v45 = vsel %vm2129_vm6, -1e+20, %v2698_v44  ;;  %v3847_v46 = vpop.f32.mrb[73].mxu1 }
0x18f9   : > { %v2705_v47 = vmul.f32 0.17677669, %v2704_v45  ;;  %v2701_v48 = vpop.f32.mrb[74].mxu1 }
0x18fa   : > { %v3848_v50 = vpop.f32.mrb[75].mxu1 }
0x18fb   : > { %v2706_v49 = vsel %vm755_vm2, %v2705_v47, -inf }
0x18fc   : > { %2707 = vmax.xlane.f32.xlu0 %v2706_v49 }
0x1912   : > { %2858 = vrot.lane.b32.xlu0 %v4382_v40, %s3999_s3 }
0x1989   : > { %v2708_v51 = vpop.xlane.xlu0 %2707 }
0x198a   : > { %v2709_v52 = vsub.f32 %v2705_v47, %v2708_v51 }
0x198c   : > { %v2710_v54 = vmul.f32 1.442695, %v2709_v52  ;;  %v3481_v52 = vld [vmem:[%s4641_s14] ss:$0 sm:$0xff] }
0x198e   : > { %3975 = vpow2.f32 %v2710_v54 }
0x1998   : > { %v3976_v55 = vpop.eup %3975 }
0x1999   : > { %v2712_v56 = vsel %vm755_vm2, %v3976_v55, 0.0 }
0x199a   : > { %2713 = vadd.xlane.f32.xlu1 %v2712_v56 }
0x19ab   : > { %2813 = vrot.lane.b32.xlu1 %v4363_v31, %s3999_s3 }
0x1a27   : > { %v2714_v40 = vpop.xlane.xlu1 %2713 }
0x1a28   : > { %3977 = vrcp.f32 %v2714_v40 }
0x1a2b   : > { %v2814_v31 = vpop.permute.xlu1 %2813 }
0x1a32   : > { %v3978_v60 = vpop.eup %3977 }
0x1a33   : > { %v2716_v61 = vmul.f32 %v3978_v60, %v3976_v55 }
0x1a35   : > { %v2717_v28 = vpack.c.bf16 %v2716_v61, %v2716_v61 }
0x1a37   : > { %3852 = vmatmul.mubr.msk.bf16.vlgmr.msra.gmra.mrb[84].mxu0 %vm755_vm2, %v2717_v28 }
0x1a38   : > { %3862 = vmatpush3.bf16.msra.mxu0 %v4360_v7  ;;  %3863 = vmatprep.mubr.msk.bf16.mxu0 %vm3996_vm1, %v3995_v1 }
0x1a39   : > { %3873 = vmatprep.subr.bf16.mxu0 %v3995_v1 }
0x1a3f   : > { %3864 = vmatmul.mubr.msk.bf16.vlgmr.msra.gmra.mrb[88].mxu0 %vm755_vm2, %v2814_v31 }
0x1a40   : > { %3874 = vmatpush3.bf16.msra.mxu0 %v4399_v53  ;;  %3875 = vmatprep.mubr.msk.bf16.mxu0 %vm3996_vm1, %v3995_v1  ;;  %v2859_v53 = vpop.permute.xlu0 %2858 }
0x1a41   : > { %3885 = vmatprep.subr.bf16.mxu0 %v3995_v1 }
0x1a47   : > { %3876 = vmatmul.mubr.msk.bf16.vlgmr.msra.gmra.mrb[92].mxu0 %vm755_vm2, %v2814_v31 }
0x1a48   : > { %3887 = vmatprep.mubr.msk.bf16.mxu0 %vm3996_vm1, %v3995_v1 }
0x1b0a   : > { %v2759_v7 = vpop.f32.mrb[84].mxu0 }
0x1b0b   : > { %v2765_v62 = vpack.c.bf16 %v2759_v7, %v2759_v7  ;;  %v3853_v63 = vpop.f32.mrb[85].mxu0 }
0x1b0c   : > { %v2762_v0 = vpop.f32.mrb[86].mxu0 }
0x1b0d   : > { %v3854_v3 = vpop.f32.mrb[87].mxu0  ;;  %3858 = vmatmul.mubr.msk.bf16.vlgmr.msra.gmra.mrb[76].mxu1 %vm755_vm2, %v2765_v62  ;;  %v3939_v0 = vld [vmem:[%s4644_s17] sm:$0xff]  }
0x1b0e   : > { %3868 = vmatpush3.bf16.msra.mxu1 %v4348_v29  ;;  %3869 = vmatprep.mubr.msk.bf16.mxu1 %vm3996_vm1, %v3995_v1  ;;  %v3941_v3 = vld [vmem:[%s4646_s19] sm:$0xff]  }
0x1b0f   : > { %3879 = vmatprep.subr.bf16.mxu1 %v3995_v1 }
0x1b12   : > { %v2852_v5 = vpop.f32.mrb[88].mxu0 }
0x1b13   : > { %v3865_v27 = vpop.f32.mrb[89].mxu0  ;;  %v2943_v26 = vpack.c.bf16 %v2852_v5, %v2852_v5  ;;  %v3943_v5 = vld [vmem:[%s4646_s19 + $0x10] sm:$0xff]  }
0x1b14   : > { %v2855_v9 = vpop.f32.mrb[90].mxu0  ;;  %v3944_v27 = vld [vmem:[%s4646_s19 + $0x18] sm:$0xff]  }
0x1b15   : > { %3870 = vmatmul.mubr.msk.bf16.vlgmr.msra.gmra.mrb[80].mxu1 %vm755_vm2, %v2859_v53  ;;  %v3866_v10 = vpop.f32.mrb[91].mxu0  ;;  %v3942_v53 = vld [vmem:[%s4646_s19 + $0x8] sm:$0xff]   ;;  %v3945_v9 = vld [vmem:[%s4646_s19 + $0x20] sm:$0xff]  }
0x1b16   : > { %3881 = vmatprep.mubr.msk.bf16.mxu1 %vm3996_vm1, %v3995_v1  ;;  %v3946_v10 = vld [vmem:[%s4646_s19 + $0x28] sm:$0xff]  }
0x1b1a   : > { %v2937_v11 = vpop.f32.mrb[92].mxu0 }
0x1b1b   : > { %v3005_v12 = vpack.c.bf16 %v2937_v11, %v2937_v11  ;;  %v3877_v13 = vpop.f32.mrb[93].mxu0 }
0x1b1c   : > { %v2940_v14 = vpop.f32.mrb[94].mxu0 }
0x1b1d   : > { %v3010_v29 = vsel %vm759_vm0, %v3005_v12, 0  ;;  %v3878_v15 = vpop.f32.mrb[95].mxu0 }
0x1b1e   : > { %3886 = vmatpush3.bf16.msra.mxu0 %v3010_v29  ;;  %v3482_v29 = vld [vmem:[%s4642_s15] ss:$0 sm:$0xff] }
0x1b1f   : > { %3897 = vmatprep.subr.bf16.mxu0 %v3995_v1 }
0x1be0   : > { %v2806_v16 = vpop.f32.mrb[76].mxu1 }
0x1be1   : > { %v2812_v17 = vadd.f32 %v2806_v16, %v4490_v25  ;;  %v3859_v18 = vpop.f32.mrb[77].mxu1  ;;  %v3483_v16 = vld [vmem:[%s4643_s16] ss:$0 sm:$0xff] }
0x1be2   : > { %v2809_v19 = vpop.f32.mrb[78].mxu1 }
0x1be3   : > { %v3860_v20 = vpop.f32.mrb[79].mxu1 }
0x1be4   : > { %v3947_v20 = vld [vmem:[%s4646_s19 + $0x30] sm:$0xff]  }
0x1be8   : > { %v2897_v21 = vpop.f32.mrb[80].mxu1 }
0x1be9   : > { %v2944_v22 = vpack.c.bf16 %v2897_v21, %v2897_v21  ;;  %v3871_v23 = vpop.f32.mrb[81].mxu1  ;;  %v3948_v21 = vld [vmem:[%s4646_s19 + $0x38] sm:$0xff]  }
0x1bea   : > { %v2900_v8 = vpop.f32.mrb[82].mxu1 }
0x1beb   : > { %v2949_v4 = vsel %vm755_vm2, %v2944_v22, 0  ;;  %v3872_v24 = vpop.f32.mrb[83].mxu1  ;;  %v3484_v22 = vld [vmem:[%s4645_s18] ss:$0 sm:$0xff] }
0x1bec   : > { %3880 = vmatpush3.bf16.xpose.msra.mxu1 %v2949_v4 }
0x1bed   : > { %3891 = vmatprep.subr.bf16.mxu1 %v3995_v1 }
0x1bf3   : > { %3882 = vmatmul.mubr.msk.bf16.vlgmr.msra.gmra.mrb[84].mxu1 %vm755_vm2, %v2943_v26 }
0x1bf4   : > { %3893 = vmatprep.mubr.msk.bf16.mxu1 %vm3996_vm1, %v3995_v1  ;;  %3892 = vmatpush3.bf16.msra.mxu1 %v3057_v42 }
0x1bf5   : > { %3905 = vmatprep.subr.bf16.mxu1 %v3995_v1 }
0x1cc6   : > { %v2985_v25 = vpop.f32.mrb[84].mxu1 }
0x1cc7   : > { %v2991_v6 = vsel %vm2129_vm6, -1e+20, %v2985_v25  ;;  %v3883_v30 = vpop.f32.mrb[85].mxu1 }
0x1cc8   : > { %v2992_v32 = vmul.f32 0.17677669, %v2991_v6  ;;  %v2988_v33 = vpop.f32.mrb[86].mxu1 }
0x1cc9   : > { %v3884_v34 = vpop.f32.mrb[87].mxu1 }
0x1cca   : > { %v2993_v35 = vsel %vm755_vm2, %v2992_v32, -inf }
0x1ccb   : > { %2994 = vmax.xlane.f32.xlu0 %v2993_v35 }
0x1d58   : > { %v2995_v36 = vpop.xlane.xlu0 %2994 }
0x1d59   : > { %v2996_v2 = vsub.f32 %v2992_v32, %v2995_v36 }
0x1d5b   : > { %v2997_v37 = vmul.f32 1.442695, %v2996_v2 }
0x1d5d   : > { %3979 = vpow2.f32 %v2997_v37 }
0x1d67   : > { %v3980_v38 = vpop.eup %3979 }
0x1d68   : > { %v2999_v41 = vsel %vm755_vm2, %v3980_v38, 0.0 }
0x1d69   : > { %3000 = vadd.xlane.f32.xlu1 %v2999_v41 }
0x1df6   : > { %v3001_v43 = vpop.xlane.xlu1 %3000 }
0x1df7   : > { %3981 = vrcp.f32 %v3001_v43 }
0x1e01   : > { %v3982_v44 = vpop.eup %3981 }
0x1e02   : > { %v3003_v45 = vmul.f32 %v3982_v44, %v3980_v38 }
0x1e04   : > { %v3004_v46 = vpack.c.bf16 %v3003_v45, %v3003_v45 }
0x1e06   : > { %3888 = vmatmul.mubr.msk.bf16.vlgmr.msra.gmra.mrb[96].mxu0 %vm755_vm2, %v3004_v46 }
0x1e07   : > { %3901 = vmatprep.mubr.msk.bf16.mxu0 %vm3996_vm1, %v3995_v1  ;;  %3898 = vmatpush3.bf16.msra.mxu0 %v3939_v0 }
0x1e08   : > { %3899 = vmatprep.subr.bf16.mxu0 %v3995_v1 }
0x1ed9   : > { %v3046_v47 = vpop.f32.mrb[96].mxu0 }
0x1eda   : > { %v3052_v48 = vpack.c.bf16 %v3046_v47, %v3046_v47  ;;  %v3889_v50 = vpop.f32.mrb[97].mxu0  ;;  %v3497_v47 = vld [vmem:[%s4648_s21] ss:$0 sm:$0xff] }
0x1edb   : > { %v3049_v49 = vpop.f32.mrb[98].mxu0  ;;  %v3498_v50 = vld [vmem:[%s4649_s22] ss:$0 sm:$0xff] }
0x1edc   : > { %v3890_v51 = vpop.f32.mrb[99].mxu0  ;;  %3894 = vmatmul.mubr.msk.bf16.vlgmr.msra.gmra.mrb[88].mxu1 %vm755_vm2, %v3052_v48 }
0x1edd   : > { %3921 = vmatprep.mubr.msk.bf16.mxu1 %vm3996_vm1, %v3995_v1  ;;  %3906 = vmatpush3.bf16.msra.mxu1 %v3941_v3 }
0x1ede   : > { %3907 = vmatprep.subr.bf16.mxu1 %v3995_v1 }
0x1ee1   : > { %3908 = vmatpush3.bf16.msra.mxu1 %v3942_v53 }
0x1ee2   : > { %3909 = vmatprep.subr.bf16.mxu1 %v3995_v1 }
0x1ee5   : > { %3910 = vmatpush3.bf16.msra.mxu1 %v3943_v5 }
0x1ee6   : > { %3911 = vmatprep.subr.bf16.mxu1 %v3995_v1 }
0x1ee9   : > { %3912 = vmatpush3.bf16.msra.mxu1 %v3944_v27 }
0x1eea   : > { %3913 = vmatprep.subr.bf16.mxu1 %v3995_v1 }
0x1eed   : > { %3914 = vmatpush3.bf16.msra.mxu1 %v3945_v9 }
0x1eee   : > { %3915 = vmatprep.subr.bf16.mxu1 %v3995_v1 }
0x1ef1   : > { %3916 = vmatpush3.bf16.msra.mxu1 %v3946_v10 }
0x1ef2   : > { %3917 = vmatprep.subr.bf16.mxu1 %v3995_v1 }
0x1ef5   : > { %3918 = vmatpush3.bf16.msra.mxu1 %v3947_v20 }
0x1ef6   : > { %3919 = vmatprep.subr.bf16.mxu1 %v3995_v1  ;;  %v3488_v1 = vld [vmem:[%s4647_s20] ss:$0 sm:$0xff] }
0x1ef9   : > { %3920 = vmatpush3.bf16.msra.mxu1 %v3948_v21 }
0x1faf   : > { %v3093_v54 = vpop.f32.mrb[88].mxu1 }
0x1fb0   : > { %v3099_v55 = vadd.f32 %v3093_v54, %v2812_v17  ;;  %v3895_v56 = vpop.f32.mrb[89].mxu1 }
0x1fb1   : > { %v3096_v57 = vpop.f32.mrb[90].mxu1 }
0x1fb2   : > { %v3106_v59 = vadd.f32 %v3481_v52, %v3099_v55  ;;  %v3896_v40 = vpop.f32.mrb[91].mxu1 }
0x1fb4   : > { %v3107_v60 = vadd.f32 %v3106_v59, %v4378_v39  ;;  %v3940_v39 = vld [vmem:[%s4644_s17 + $0x8] sm:$0xff]  }
0x1fb5   : > { %3900 = vmatpush3.bf16.msra.mxu0 %v3940_v39 }
0x1fb6   : > { %v3110_v61 = vsel %vm1901_vm4, %v3107_v60, 0.0 }
0x1fb7   : > { %3111 = vadd.xlane.f32.xlu0 %v3110_v61 }
0x2044   : > { %v3112_v28 = vpop.xlane.xlu0 %3111 }
0x2045   : > { %v3113_v31 = vmul.f32 0.03125, %v3112_v28 }
0x2047   : > { %v3114_v7 = vsub.f32 %v3107_v60, %v3113_v31 }
0x2049   : > { %v3115_v62 = vmul.f32 %v3114_v7, %v3114_v7 }
0x204b   : > { %v3116_v63 = vsel %vm1901_vm4, %v3115_v62, 0.0 }
0x204c   : > { %3117 = vadd.xlane.f32.xlu0 %v3116_v63 }
0x20d9   : > { %v3118_v11 = vpop.xlane.xlu0 %3117 }
0x20da   : > { %v3119_v12 = vmul.f32 0.03125, %v3118_v11 }
0x20dc   : > { %v3120_v13 = vadd.f32 1e-05, %v3119_v12 }
0x20de   : > { %3983 = vrsqrt.f32 %v3120_v13 }
0x20e8   : > { %v3984_v14 = vpop.eup %3983 }
0x20e9   : > { %v3122_v15 = vmul.f32 %v3984_v14, %v3114_v7 }
0x20eb   : > { %v3129_v17 = vmul.f32 %v3482_v29, %v3122_v15 }
0x20ed   : > { %v3136_v18 = vadd.f32 %v3483_v16, %v3129_v17 }
0x20ef   : > { %v3159_v19 = vpack.c.bf16 %v3136_v18, %v3136_v18 }
0x20f1   : > { %3902 = vmatmul.mubr.msk.bf16.vlgmr.msra.gmra.mrb[100].mxu0 %vm1901_vm4, %v3159_v19 }
0x21c4   : > { %v3215_v23 = vpop.f32.mrb[100].mxu0 }
0x21c5   : > { %v3216_v8 = vadd.f32 %v3484_v22, %v3215_v23  ;;  %v3903_v4 = vpop.f32.mrb[101].mxu0 }
0x21c6   : > { %v3218_v24 = vpop.f32.mrb[102].mxu0 }
0x21c7   : > { %v3221_v26 = vmax.f32 %v3216_v8, 0.0  ;;  %v3904_v25 = vpop.f32.mrb[103].mxu0 }
0x21c9   : > { %v3222_v6 = vpack.c.bf16 %v3221_v26, %v3221_v26 }
0x21cb   : > { %3922 = vmatmul.mubr.bf16.vlgmr.msra.gmra.mrb[92].mxu1 %v3222_v6 }
0x229e   : > { %v3311_v30 = vpop.f32.mrb[92].mxu1 }
0x229f   : > { %v3312_v32 = vadd.f32 %v3488_v1, %v3311_v30  ;;  %v3923_v33 = vpop.f32.mrb[93].mxu1 }
0x22a0   : > { %v3314_v34 = vpop.f32.mrb[94].mxu1 }
0x22a1   : > { %v3924_v35 = vpop.f32.mrb[95].mxu1  ;;  %v3317_v36 = vadd.f32 %v3312_v32, %v3136_v18 }
0x22a3   : > { %v3320_v2 = vsel %vm1901_vm4, %v3317_v36, 0.0 }
0x22a4   : > { %3321 = vadd.xlane.f32.xlu0 %v3320_v2 }
0x2331   : > { %v3322_v37 = vpop.xlane.xlu0 %3321 }
0x2332   : > { %v3323_v38 = vmul.f32 0.03125, %v3322_v37 }
0x2334   : > { %v3324_v41 = vsub.f32 %v3317_v36, %v3323_v38 }
0x2336   : > { %v3325_v58 = vmul.f32 %v3324_v41, %v3324_v41 }
0x2338   : > { %v3326_v42 = vsel %vm1901_vm4, %v3325_v58, 0.0 }
0x2339   : > { %3327 = vadd.xlane.f32.xlu0 %v3326_v42 }
0x23c6   : > { %v3328_v43 = vpop.xlane.xlu0 %3327 }
0x23c7   : > { %v3329_v44 = vmul.f32 0.03125, %v3328_v43 }
0x23c9   : > { %v3330_v45 = vadd.f32 1e-05, %v3329_v44 }
0x23cb   : > { %3985 = vrsqrt.f32 %v3330_v45 }
0x23d5   : > { %v3986_v46 = vpop.eup %3985 }
0x23d6   : > { %v3332_v48 = vmul.f32 %v3986_v46, %v3324_v41 }
0x23d8   : > { %v3339_v49 = vmul.f32 %v3497_v47, %v3332_v48 }
0x23da   : > { %v3346_v51 = vadd.f32 %v3498_v50, %v3339_v49 }
0x23dc   : > { %3347 = vst.msk [vmem:[%s736_s1] sm:$0xff] %vm1901_vm4, %v3346_v51 }
0x23dd PF: > { %s33_s4 = sadd.s32 1, %s3993_s4  }
0x23de   : > { %p30_p4 = scmp.ge.s32.totalorder %s33_s4, 4  }
0x23e0   :  { %32 = sbr.rel (!%p30_p4) target bundleno = 9 (0x9), region = 148 }

</bundles_post_ra>
